<compile_context>
chip_gen: v5e
topology: v5e:2x2
jax: 0.10.0
libtpu: 0.0.40
codegen_flags: <defaults>
</compile_context>

<pallas_src>
import functools

import jax
import jax.numpy as jnp
import numpy as np
from jax import lax
from jax.experimental import pallas as pl
from jax.experimental.pallas import tpu as pltpu

LANE = 128


def _basic_block_kernel(TH, W, Cp,
                        x_ref, w1_ref, s1_ref, b1_ref,
                        w2_ref, s2_ref, b2_ref,
                        out_ref,
                        xpad_ref, mid_ref):
    """One (batch element, row band) per grid step.

    x_ref   : (H+4, W, Cp)    f32   channel-padded + 2-row-H-haloed input image
                                    (VMEM resident; constant over the band axis)
    w1_ref  : (9, Cp, Cp)     bf16  conv1 per-tap weights  [tap, Cin, Cout]
    s1/b1   : (1, Cp)         f32   folded bn1 scale / bias
    w2_ref  : (9, Cp, Cp)     bf16  conv2 per-tap weights
    s2/b2   : (1, Cp)         f32   folded bn2 scale / bias
    out_ref : (TH, W, Cp)           output row band (lane-dense Cp store)
    xpad_ref: (TH+4, W+2, Cp) bf16  scratch: W-haloed conv1 tap source
    mid_ref : (TH+2, W+2, Cp) bf16  scratch: W-haloed conv1 activation
    """
    f32 = jnp.float32
    bf16 = jnp.bfloat16
    b = pl.program_id(1)
    last_band = pl.num_programs(1) - 1

    # Padded-image rows [r0, r0+TH+4) == original rows [b*TH-2, b*TH+TH+2).
    # Single f32 load; also serves as the residual (skip connection stays f32).
    r0 = pl.multiple_of(b * TH, TH)
    xband = x_ref[pl.ds(r0, TH + 4), :, :]                   # (TH+4, W, Cp) f32

    # Re-zero only the W-halo columns each step (interiors are fully rewritten
    # below; the H halo arrives zero-padded from the wrapper).  Not gated on a
    # "first iteration" flag so it stays correct under megacore sharding.
    xpad_ref[:, 0:1, :] = jnp.zeros((TH + 4, 1, Cp), bf16)
    xpad_ref[:, W + 1:W + 2, :] = jnp.zeros((TH + 4, 1, Cp), bf16)
    mid_ref[:, 0:1, :] = jnp.zeros((TH + 2, 1, Cp), bf16)
    mid_ref[:, W + 1:W + 2, :] = jnp.zeros((TH + 2, 1, Cp), bf16)

    # Single f32->bf16 cast of the band into the tap-source scratch.
    xpad_ref[:, 1:W + 1, :] = xband.astype(bf16)

    def conv3x3(src_ref, w_ref, rows):
        # 9 accumulating MXU matmuls: bf16 operands, f32 accumulation.
        # (Replaces v1's (rows*W, 9*Cp) im2col staging + single deep-K matmul.)
        acc = None
        for ky in range(3):
            for kx in range(3):
                tap = src_ref[ky:ky + rows, kx:kx + W, :].reshape(rows * W, Cp)
                part = jnp.dot(tap, w_ref[ky * 3 + kx],
                               preferred_element_type=f32)
                acc = part if acc is None else acc + part
        return acc                                            # (rows*W, Cp) f32

    # ---- conv1 -> bn1 -> relu over TH+2 rows (1-row halo for conv2) ----
    a1 = conv3x3(xpad_ref, w1_ref, TH + 2)
    a1 = jnp.maximum(a1 * s1_ref[...] + b1_ref[...], 0.0)
    mid_ref[:, 1:W + 1, :] = a1.reshape(TH + 2, W, Cp).astype(bf16)

    # "SAME" padding for conv2: at the image boundary the halo row must be
    # zero, not conv1 evaluated on zero-padded x.
    @pl.when(b == 0)
    def _():
        mid_ref[0:1, :, :] = jnp.zeros((1, W + 2, Cp), bf16)

    @pl.when(b == last_band)
    def _():
        mid_ref[TH + 1:TH + 2, :, :] = jnp.zeros((1, W + 2, Cp), bf16)

    # ---- conv2 -> bn2 -> + residual (f32) -> relu ----
    a2 = conv3x3(mid_ref, w2_ref, TH)
    a2 = a2 * s2_ref[...] + b2_ref[...]
    a2 = a2 + xband[2:2 + TH].reshape(TH * W, Cp)             # f32 skip connection
    a2 = jnp.maximum(a2, 0.0)
    out_ref[...] = a2.reshape(TH, W, Cp).astype(out_ref.dtype)


# ---------------------------------------------------------------------------
# Packing helpers (hoistable across a chain of BasicBlocks).
# ---------------------------------------------------------------------------
def fold_bn(bn, Cp, eps=1e-5):
    """Eval-mode BatchNorm -> per-channel (scale, bias), zero-padded to Cp."""
    gamma, beta, mean, var = bn
    scale = gamma / jnp.sqrt(var + eps)
    bias = beta - mean * scale
    pad = lambda v: jnp.zeros((1, Cp), jnp.float32).at[0, :v.shape[0]].set(v)
    return pad(scale), pad(bias)


def pack_conv3x3(w_oihw, Cp):
    """(Cout, Cin, 3, 3) -> (9, Cp, Cp) bf16 per-tap matrices [tap, Cin, Cout]."""
    co, ci = w_oihw.shape[0], w_oihw.shape[1]
    wk = jnp.transpose(w_oihw, (2, 3, 1, 0)).reshape(9, ci, co)
    wp = jnp.zeros((9, Cp, Cp), jnp.float32).at[:, :ci, :co].set(wk)
    return wp.astype(jnp.bfloat16)


def pad_input(x_nhwc, Cp):
    """Channel-pad to the lane width and add the 2-row H halo in ONE pad pass."""
    N, H, W, Cin = x_nhwc.shape
    return jnp.zeros((N, H + 4, W, Cp), jnp.float32
                     ).at[:, 2:H + 2, :, :Cin].set(x_nhwc)


def basic_block_forward_packed(xp, w1p, s1, b1, w2p, s2, b2,
                               *, band_rows=None, out_dtype=jnp.float32):
    """Fused block on pre-packed operands.

    xp: (N, H+4, W, Cp) f32 channel-padded, H-haloed input.
    Returns (N, H, W, Cp) in the channel-padded layout (padded output channels
    are exactly zero), so chained blocks avoid per-call pad/slice HBM passes.
    """
    N, Hp, W, Cp = xp.shape
    H = Hp - 4
    TH = band_rows if band_rows is not None else (8 if H % 8 == 0 else H)
    assert H % TH == 0, "row-band size must divide H"
    NB = H // TH

    kernel = functools.partial(_basic_block_kernel, TH, W, Cp)
    return pl.pallas_call(
        kernel,
        out_shape=jax.ShapeDtypeStruct((N, H, W, Cp), out_dtype),
        grid=(N, NB),
        in_specs=[
            # Full padded image; block index constant over the band axis, so it
            # is DMA'd once per image and stays VMEM-resident while its bands run.
            pl.BlockSpec((None, H + 4, W, Cp), lambda n, b: (n, 0, 0, 0)),
            pl.BlockSpec((9, Cp, Cp), lambda n, b: (0, 0, 0)),
            pl.BlockSpec((1, Cp), lambda n, b: (0, 0)),
            pl.BlockSpec((1, Cp), lambda n, b: (0, 0)),
            pl.BlockSpec((9, Cp, Cp), lambda n, b: (0, 0, 0)),
            pl.BlockSpec((1, Cp), lambda n, b: (0, 0)),
            pl.BlockSpec((1, Cp), lambda n, b: (0, 0)),
        ],
        out_specs=pl.BlockSpec((None, TH, W, Cp), lambda n, b: (n, b, 0, 0)),
        scratch_shapes=[
            pltpu.VMEM((TH + 4, W + 2, Cp), jnp.bfloat16),   # xpad (tap source)
            pltpu.VMEM((TH + 2, W + 2, Cp), jnp.bfloat16),   # mid  (conv1 act)
        ],
        compiler_params=pltpu.CompilerParams(
            dimension_semantics=("parallel", "parallel")),
    )(xp, w1p, s1, b1, w2p, s2, b2)


def basic_block_forward(x_nhwc, w1_oihw, bn1, w2_oihw, bn2,
                        eps=1e-5, band_rows=None):
    """Convenience wrapper for standalone use: NHWC f32 in -> NHWC f32 out."""
    N, H, W, Cin = x_nhwc.shape
    Cout = w1_oihw.shape[0]
    assert Cin == Cout, "identity residual requires inplanes == planes"
    Cp = ((max(Cin, Cout) + LANE - 1) // LANE) * LANE

    s1, b1 = fold_bn(bn1, Cp, eps)
    s2, b2 = fold_bn(bn2, Cp, eps)
    w1p = pack_conv3x3(w1_oihw, Cp)
    w2p = pack_conv3x3(w2_oihw, Cp)
    xp = pad_input(x_nhwc, Cp)

    out = basic_block_forward_packed(xp, w1p, s1, b1, w2p, s2, b2,
                                     band_rows=band_rows)
    return out[..., :Cout]


def _ref_forward(x_nhwc, w1_oihw, bn1, w2_oihw, bn2, eps=1e-5):
    """Pure-JAX reference with matching numerics (bf16 matmul operands,
    f32 accumulation, f32 elementwise, f32 residual)."""
    def fold(bn):
        gamma, beta, mean, var = bn
        scale = gamma / jnp.sqrt(var + eps)
        return scale, beta - mean * scale

    s1, b1 = fold(bn1)
    s2, b2 = fold(bn2)
    dn = ('NHWC', 'HWIO', 'NHWC')
    w1 = jnp.transpose(w1_oihw, (2, 3, 1, 0)).astype(jnp.bfloat16)
    w2 = jnp.transpose(w2_oihw, (2, 3, 1, 0)).astype(jnp.bfloat16)
    o = lax.conv_general_dilated(x_nhwc.astype(jnp.bfloat16), w1, (1, 1), 'SAME',
                                 dimension_numbers=dn,
                                 preferred_element_type=jnp.float32)
    o = jnp.maximum(o * s1 + b1, 0.0)
    o = lax.conv_general_dilated(o.astype(jnp.bfloat16), w2, (1, 1), 'SAME',
                                 dimension_numbers=dn,
                                 preferred_element_type=jnp.float32)
    o = o * s2 + b2
    return jnp.maximum(o + x_nhwc, 0.0)


if __name__ == "__main__":
    key = jax.random.PRNGKey(0)
    N, C, H, W = 2, 8, 16, 16          # inplanes == planes == 8, stride=1

    k = jax.random.split(key, 11)
    # Input follows the PyTorch NCHW convention, then transposed to NHWC.
    x_nchw = jax.random.normal(k[0], (N, C, H, W), jnp.float32)
    x_nhwc = jnp.transpose(x_nchw, (0, 2, 3, 1))

    # conv weights in PyTorch layout (Cout, Cin, 3, 3), bias=False
    w1 = 0.1 * jax.random.normal(k[1], (C, C, 3, 3), jnp.float32)
    w2 = 0.1 * jax.random.normal(k[2], (C, C, 3, 3), jnp.float32)

    # BatchNorm2d params (gamma, beta, running_mean, running_var)
    bn1 = (1.0 + 0.1 * jax.random.normal(k[3], (C,), jnp.float32),
           0.1 * jax.random.normal(k[4], (C,), jnp.float32),
           0.1 * jax.random.normal(k[5], (C,), jnp.float32),
           1.0 + 0.1 * jax.random.uniform(k[6], (C,), jnp.float32))
    bn2 = (1.0 + 0.1 * jax.random.normal(k[7], (C,), jnp.float32),
           0.1 * jax.random.normal(k[8], (C,), jnp.float32),
           0.1 * jax.random.normal(k[9], (C,), jnp.float32),
           1.0 + 0.1 * jax.random.uniform(k[10], (C,), jnp.float32))

    out = jax.block_until_ready(basic_block_forward(x_nhwc, w1, bn1, w2, bn2))
    ref = jax.block_until_ready(_ref_forward(x_nhwc, w1, bn1, w2, bn2))
    np.testing.assert_allclose(np.asarray(out), np.asarray(ref),
                               rtol=5e-3, atol=5e-3)
    print("KERNEL_OK")
</pallas_src>

<mosaic_0001>
module attributes {stable_mosaic.version = 11 : i64} {
  func.func @_basic_block_kernel(%arg0: i32, %arg1: i32, %arg2: memref<1x20x16x128xf32, #tpu.memory_space<vmem>>, %arg3: memref<9x128x128xbf16, #tpu.memory_space<vmem>>, %arg4: memref<1x128xf32, #tpu.memory_space<vmem>>, %arg5: memref<1x128xf32, #tpu.memory_space<vmem>>, %arg6: memref<9x128x128xbf16, #tpu.memory_space<vmem>>, %arg7: memref<1x128xf32, #tpu.memory_space<vmem>>, %arg8: memref<1x128xf32, #tpu.memory_space<vmem>>, %arg9: memref<1x8x16x128xf32, #tpu.memory_space<vmem>>, %arg10: memref<12x18x128xbf16, #tpu.memory_space<vmem>>, %arg11: memref<10x18x128xbf16, #tpu.memory_space<vmem>>) attributes {dimension_semantics = [#tpu.dimension_semantics<parallel>, #tpu.dimension_semantics<parallel>], iteration_bounds = array<i64: 2, 2>, scalar_prefetch = 0 : i64, scratch_operands = 2 : i64, tpu.core_type = #tpu.core_type<tc>, window_params = [{transform_indices = @transform_0, window_bounds = array<i64: 1, 20, 16, 128>}, {pipeline_mode = #tpu.pipeline_mode<synchronous>, transform_indices = @transform_1, window_bounds = array<i64: 9, 128, 128>}, {pipeline_mode = #tpu.pipeline_mode<synchronous>, transform_indices = @transform_2, window_bounds = array<i64: 1, 128>}, {pipeline_mode = #tpu.pipeline_mode<synchronous>, transform_indices = @transform_3, window_bounds = array<i64: 1, 128>}, {pipeline_mode = #tpu.pipeline_mode<synchronous>, transform_indices = @transform_4, window_bounds = array<i64: 9, 128, 128>}, {pipeline_mode = #tpu.pipeline_mode<synchronous>, transform_indices = @transform_5, window_bounds = array<i64: 1, 128>}, {pipeline_mode = #tpu.pipeline_mode<synchronous>, transform_indices = @transform_6, window_bounds = array<i64: 1, 128>}, {transform_indices = @transform_7, window_bounds = array<i64: 1, 8, 16, 128>}]} {
    %c8_i32 = arith.constant 8 : i32
    %0 = arith.muli %arg1, %c8_i32 : i32
    %1 = tpu.assume_multiple %0, 8 : i32
    %c0 = arith.constant 0 : index
    %2 = arith.index_cast %1 : i32 to index
    %c0_0 = arith.constant 0 : index
    %c0_1 = arith.constant 0 : index
    %3 = vector.load %arg2[%c0, %2, %c0_0, %c0_1] : memref<1x20x16x128xf32, #tpu.memory_space<vmem>>, vector<1x12x16x128xf32>
    %4 = vector.shape_cast %3 : vector<1x12x16x128xf32> to vector<12x16x128xf32>
    %cst = arith.constant 0.000000e+00 : bf16
    %5 = vector.broadcast %cst : bf16 to vector<12x1x128xbf16>
    %c0_2 = arith.constant 0 : index
    %c0_3 = arith.constant 0 : index
    %c0_4 = arith.constant 0 : index
    %6 = vector.load %arg10[%c0_2, %c0_3, %c0_4] : memref<12x18x128xbf16, #tpu.memory_space<vmem>>, vector<12x1x128xbf16>
    tpu.vector_store %arg10[%c0_2, %c0_3, %c0_4], %5 {strides = array<i32>} : memref<12x18x128xbf16, #tpu.memory_space<vmem>>, vector<12x1x128xbf16>,
    %cst_5 = arith.constant 0.000000e+00 : bf16
    %7 = vector.broadcast %cst_5 : bf16 to vector<12x1x128xbf16>
    %c0_6 = arith.constant 0 : index
    %c17 = arith.constant 17 : index
    %c0_7 = arith.constant 0 : index
    %8 = vector.load %arg10[%c0_6, %c17, %c0_7] : memref<12x18x128xbf16, #tpu.memory_space<vmem>>, vector<12x1x128xbf16>
    tpu.vector_store %arg10[%c0_6, %c17, %c0_7], %7 {strides = array<i32>} : memref<12x18x128xbf16, #tpu.memory_space<vmem>>, vector<12x1x128xbf16>,
    %cst_8 = arith.constant 0.000000e+00 : bf16
    %9 = vector.broadcast %cst_8 : bf16 to vector<10x1x128xbf16>
    %c0_9 = arith.constant 0 : index
    %c0_10 = arith.constant 0 : index
    %c0_11 = arith.constant 0 : index
    %10 = vector.load %arg11[%c0_9, %c0_10, %c0_11] : memref<10x18x128xbf16, #tpu.memory_space<vmem>>, vector<10x1x128xbf16>
    tpu.vector_store %arg11[%c0_9, %c0_10, %c0_11], %9 {strides = array<i32>} : memref<10x18x128xbf16, #tpu.memory_space<vmem>>, vector<10x1x128xbf16>,
    %cst_12 = arith.constant 0.000000e+00 : bf16
    %11 = vector.broadcast %cst_12 : bf16 to vector<10x1x128xbf16>
    %c0_13 = arith.constant 0 : index
    %c17_14 = arith.constant 17 : index
    %c0_15 = arith.constant 0 : index
    %12 = vector.load %arg11[%c0_13, %c17_14, %c0_15] : memref<10x18x128xbf16, #tpu.memory_space<vmem>>, vector<10x1x128xbf16>
    tpu.vector_store %arg11[%c0_13, %c17_14, %c0_15], %11 {strides = array<i32>} : memref<10x18x128xbf16, #tpu.memory_space<vmem>>, vector<10x1x128xbf16>,
    %13 = arith.truncf %4 : vector<12x16x128xf32> to vector<12x16x128xbf16>
    %c0_16 = arith.constant 0 : index
    %c1 = arith.constant 1 : index
    %c0_17 = arith.constant 0 : index
    %14 = vector.load %arg10[%c0_16, %c1, %c0_17] : memref<12x18x128xbf16, #tpu.memory_space<vmem>>, vector<12x16x128xbf16>
    tpu.vector_store %arg10[%c0_16, %c1, %c0_17], %13 {strides = array<i32>} : memref<12x18x128xbf16, #tpu.memory_space<vmem>>, vector<12x16x128xbf16>,
    %c0_18 = arith.constant 0 : index
    %c0_19 = arith.constant 0 : index
    %c0_20 = arith.constant 0 : index
    %15 = vector.load %arg10[%c0_18, %c0_19, %c0_20] : memref<12x18x128xbf16, #tpu.memory_space<vmem>>, vector<10x16x128xbf16>
    %16 = vector.shape_cast %15 : vector<10x16x128xbf16> to vector<160x128xbf16>
    %c0_21 = arith.constant 0 : index
    %c0_22 = arith.constant 0 : index
    %c0_23 = arith.constant 0 : index
    %17 = vector.load %arg3[%c0_21, %c0_22, %c0_23] : memref<9x128x128xbf16, #tpu.memory_space<vmem>>, vector<1x128x128xbf16>
    %18 = vector.shape_cast %17 : vector<1x128x128xbf16> to vector<128x128xbf16>
    %cst_24 = arith.constant dense<0.000000e+00> : vector<160x128xf32>
    %19 = tpu.matmul %16, %18, %cst_24 {dimension_numbers = #tpu.dot_dimension_numbers<[1], [0], [0], [1], [0, 0, 1, 1], [], []>} : vector<160x128xbf16>, vector<128x128xbf16>, vector<160x128xf32> -> vector<160x128xf32>
    %c0_25 = arith.constant 0 : index
    %c1_26 = arith.constant 1 : index
    %c0_27 = arith.constant 0 : index
    %20 = vector.load %arg10[%c0_25, %c1_26, %c0_27] : memref<12x18x128xbf16, #tpu.memory_space<vmem>>, vector<10x16x128xbf16>
    %21 = vector.shape_cast %20 : vector<10x16x128xbf16> to vector<160x128xbf16>
    %c1_28 = arith.constant 1 : index
    %c0_29 = arith.constant 0 : index
    %c0_30 = arith.constant 0 : index
    %22 = vector.load %arg3[%c1_28, %c0_29, %c0_30] : memref<9x128x128xbf16, #tpu.memory_space<vmem>>, vector<1x128x128xbf16>
    %23 = vector.shape_cast %22 : vector<1x128x128xbf16> to vector<128x128xbf16>
    %cst_31 = arith.constant dense<0.000000e+00> : vector<160x128xf32>
    %24 = tpu.matmul %21, %23, %cst_31 {dimension_numbers = #tpu.dot_dimension_numbers<[1], [0], [0], [1], [0, 0, 1, 1], [], []>} : vector<160x128xbf16>, vector<128x128xbf16>, vector<160x128xf32> -> vector<160x128xf32>
    %25 = arith.addf %19, %24 : vector<160x128xf32>
    %c0_32 = arith.constant 0 : index
    %c2 = arith.constant 2 : index
    %c0_33 = arith.constant 0 : index
    %26 = vector.load %arg10[%c0_32, %c2, %c0_33] : memref<12x18x128xbf16, #tpu.memory_space<vmem>>, vector<10x16x128xbf16>
    %27 = vector.shape_cast %26 : vector<10x16x128xbf16> to vector<160x128xbf16>
    %c2_34 = arith.constant 2 : index
    %c0_35 = arith.constant 0 : index
    %c0_36 = arith.constant 0 : index
    %28 = vector.load %arg3[%c2_34, %c0_35, %c0_36] : memref<9x128x128xbf16, #tpu.memory_space<vmem>>, vector<1x128x128xbf16>
    %29 = vector.shape_cast %28 : vector<1x128x128xbf16> to vector<128x128xbf16>
    %cst_37 = arith.constant dense<0.000000e+00> : vector<160x128xf32>
    %30 = tpu.matmul %27, %29, %cst_37 {dimension_numbers = #tpu.dot_dimension_numbers<[1], [0], [0], [1], [0, 0, 1, 1], [], []>} : vector<160x128xbf16>, vector<128x128xbf16>, vector<160x128xf32> -> vector<160x128xf32>
    %31 = arith.addf %25, %30 : vector<160x128xf32>
    %c1_38 = arith.constant 1 : index
    %c0_39 = arith.constant 0 : index
    %c0_40 = arith.constant 0 : index
    %32 = vector.load %arg10[%c1_38, %c0_39, %c0_40] : memref<12x18x128xbf16, #tpu.memory_space<vmem>>, vector<10x16x128xbf16>
    %33 = vector.shape_cast %32 : vector<10x16x128xbf16> to vector<160x128xbf16>
    %c3 = arith.constant 3 : index
    %c0_41 = arith.constant 0 : index
    %c0_42 = arith.constant 0 : index
    %34 = vector.load %arg3[%c3, %c0_41, %c0_42] : memref<9x128x128xbf16, #tpu.memory_space<vmem>>, vector<1x128x128xbf16>
    %35 = vector.shape_cast %34 : vector<1x128x128xbf16> to vector<128x128xbf16>
    %cst_43 = arith.constant dense<0.000000e+00> : vector<160x128xf32>
    %36 = tpu.matmul %33, %35, %cst_43 {dimension_numbers = #tpu.dot_dimension_numbers<[1], [0], [0], [1], [0, 0, 1, 1], [], []>} : vector<160x128xbf16>, vector<128x128xbf16>, vector<160x128xf32> -> vector<160x128xf32>
    %37 = arith.addf %31, %36 : vector<160x128xf32>
    %c1_44 = arith.constant 1 : index
    %c1_45 = arith.constant 1 : index
    %c0_46 = arith.constant 0 : index
    %38 = vector.load %arg10[%c1_44, %c1_45, %c0_46] : memref<12x18x128xbf16, #tpu.memory_space<vmem>>, vector<10x16x128xbf16>
    %39 = vector.shape_cast %38 : vector<10x16x128xbf16> to vector<160x128xbf16>
    %c4 = arith.constant 4 : index
    %c0_47 = arith.constant 0 : index
    %c0_48 = arith.constant 0 : index
    %40 = vector.load %arg3[%c4, %c0_47, %c0_48] : memref<9x128x128xbf16, #tpu.memory_space<vmem>>, vector<1x128x128xbf16>
    %41 = vector.shape_cast %40 : vector<1x128x128xbf16> to vector<128x128xbf16>
    %cst_49 = arith.constant dense<0.000000e+00> : vector<160x128xf32>
    %42 = tpu.matmul %39, %41, %cst_49 {dimension_numbers = #tpu.dot_dimension_numbers<[1], [0], [0], [1], [0, 0, 1, 1], [], []>} : vector<160x128xbf16>, vector<128x128xbf16>, vector<160x128xf32> -> vector<160x128xf32>
    %43 = arith.addf %37, %42 : vector<160x128xf32>
    %c1_50 = arith.constant 1 : index
    %c2_51 = arith.constant 2 : index
    %c0_52 = arith.constant 0 : index
    %44 = vector.load %arg10[%c1_50, %c2_51, %c0_52] : memref<12x18x128xbf16, #tpu.memory_space<vmem>>, vector<10x16x128xbf16>
    %45 = vector.shape_cast %44 : vector<10x16x128xbf16> to vector<160x128xbf16>
    %c5 = arith.constant 5 : index
    %c0_53 = arith.constant 0 : index
    %c0_54 = arith.constant 0 : index
    %46 = vector.load %arg3[%c5, %c0_53, %c0_54] : memref<9x128x128xbf16, #tpu.memory_space<vmem>>, vector<1x128x128xbf16>
    %47 = vector.shape_cast %46 : vector<1x128x128xbf16> to vector<128x128xbf16>
    %cst_55 = arith.constant dense<0.000000e+00> : vector<160x128xf32>
    %48 = tpu.matmul %45, %47, %cst_55 {dimension_numbers = #tpu.dot_dimension_numbers<[1], [0], [0], [1], [0, 0, 1, 1], [], []>} : vector<160x128xbf16>, vector<128x128xbf16>, vector<160x128xf32> -> vector<160x128xf32>
    %49 = arith.addf %43, %48 : vector<160x128xf32>
    %c2_56 = arith.constant 2 : index
    %c0_57 = arith.constant 0 : index
    %c0_58 = arith.constant 0 : index
    %50 = vector.load %arg10[%c2_56, %c0_57, %c0_58] : memref<12x18x128xbf16, #tpu.memory_space<vmem>>, vector<10x16x128xbf16>
    %51 = vector.shape_cast %50 : vector<10x16x128xbf16> to vector<160x128xbf16>
    %c6 = arith.constant 6 : index
    %c0_59 = arith.constant 0 : index
    %c0_60 = arith.constant 0 : index
    %52 = vector.load %arg3[%c6, %c0_59, %c0_60] : memref<9x128x128xbf16, #tpu.memory_space<vmem>>, vector<1x128x128xbf16>
    %53 = vector.shape_cast %52 : vector<1x128x128xbf16> to vector<128x128xbf16>
    %cst_61 = arith.constant dense<0.000000e+00> : vector<160x128xf32>
    %54 = tpu.matmul %51, %53, %cst_61 {dimension_numbers = #tpu.dot_dimension_numbers<[1], [0], [0], [1], [0, 0, 1, 1], [], []>} : vector<160x128xbf16>, vector<128x128xbf16>, vector<160x128xf32> -> vector<160x128xf32>
    %55 = arith.addf %49, %54 : vector<160x128xf32>
    %c2_62 = arith.constant 2 : index
    %c1_63 = arith.constant 1 : index
    %c0_64 = arith.constant 0 : index
    %56 = vector.load %arg10[%c2_62, %c1_63, %c0_64] : memref<12x18x128xbf16, #tpu.memory_space<vmem>>, vector<10x16x128xbf16>
    %57 = vector.shape_cast %56 : vector<10x16x128xbf16> to vector<160x128xbf16>
    %c7 = arith.constant 7 : index
    %c0_65 = arith.constant 0 : index
    %c0_66 = arith.constant 0 : index
    %58 = vector.load %arg3[%c7, %c0_65, %c0_66] : memref<9x128x128xbf16, #tpu.memory_space<vmem>>, vector<1x128x128xbf16>
    %59 = vector.shape_cast %58 : vector<1x128x128xbf16> to vector<128x128xbf16>
    %cst_67 = arith.constant dense<0.000000e+00> : vector<160x128xf32>
    %60 = tpu.matmul %57, %59, %cst_67 {dimension_numbers = #tpu.dot_dimension_numbers<[1], [0], [0], [1], [0, 0, 1, 1], [], []>} : vector<160x128xbf16>, vector<128x128xbf16>, vector<160x128xf32> -> vector<160x128xf32>
    %61 = arith.addf %55, %60 : vector<160x128xf32>
    %c2_68 = arith.constant 2 : index
    %c2_69 = arith.constant 2 : index
    %c0_70 = arith.constant 0 : index
    %62 = vector.load %arg10[%c2_68, %c2_69, %c0_70] : memref<12x18x128xbf16, #tpu.memory_space<vmem>>, vector<10x16x128xbf16>
    %63 = vector.shape_cast %62 : vector<10x16x128xbf16> to vector<160x128xbf16>
    %c8 = arith.constant 8 : index
    %c0_71 = arith.constant 0 : index
    %c0_72 = arith.constant 0 : index
    %64 = vector.load %arg3[%c8, %c0_71, %c0_72] : memref<9x128x128xbf16, #tpu.memory_space<vmem>>, vector<1x128x128xbf16>
    %65 = vector.shape_cast %64 : vector<1x128x128xbf16> to vector<128x128xbf16>
    %cst_73 = arith.constant dense<0.000000e+00> : vector<160x128xf32>
    %66 = tpu.matmul %63, %65, %cst_73 {dimension_numbers = #tpu.dot_dimension_numbers<[1], [0], [0], [1], [0, 0, 1, 1], [], []>} : vector<160x128xbf16>, vector<128x128xbf16>, vector<160x128xf32> -> vector<160x128xf32>
    %67 = arith.addf %61, %66 : vector<160x128xf32>
    %c0_74 = arith.constant 0 : index
    %c0_75 = arith.constant 0 : index
    %68 = vector.load %arg4[%c0_74, %c0_75] : memref<1x128xf32, #tpu.memory_space<vmem>>, vector<1x128xf32>
    %69 = vector.broadcast %68 : vector<1x128xf32> to vector<160x128xf32>
    %70 = arith.mulf %67, %69 : vector<160x128xf32>
    %c0_76 = arith.constant 0 : index
    %c0_77 = arith.constant 0 : index
    %71 = vector.load %arg5[%c0_76, %c0_77] : memref<1x128xf32, #tpu.memory_space<vmem>>, vector<1x128xf32>
    %72 = vector.broadcast %71 : vector<1x128xf32> to vector<160x128xf32>
    %73 = arith.addf %70, %72 : vector<160x128xf32>
    %cst_78 = arith.constant 0.000000e+00 : f32
    %74 = vector.broadcast %cst_78 : f32 to vector<160x128xf32>
    %75 = arith.maximumf %73, %74 : vector<160x128xf32>
    %76 = vector.shape_cast %75 : vector<160x128xf32> to vector<10x16x128xf32>
    %77 = arith.truncf %76 : vector<10x16x128xf32> to vector<10x16x128xbf16>
    %c0_79 = arith.constant 0 : index
    %c1_80 = arith.constant 1 : index
    %c0_81 = arith.constant 0 : index
    %78 = vector.load %arg11[%c0_79, %c1_80, %c0_81] : memref<10x18x128xbf16, #tpu.memory_space<vmem>>, vector<10x16x128xbf16>
    tpu.vector_store %arg11[%c0_79, %c1_80, %c0_81], %77 {strides = array<i32>} : memref<10x18x128xbf16, #tpu.memory_space<vmem>>, vector<10x16x128xbf16>,
    %c0_i32 = arith.constant 0 : i32
    %79 = arith.cmpi eq, %arg1, %c0_i32 : i32
    %80 = arith.extui %79 : i1 to i32
    %c0_i32_82 = arith.constant 0 : i32
    %81 = arith.cmpi ne, %80, %c0_i32_82 : i32
    scf.if %81 {
      %cst_156 = arith.constant 0.000000e+00 : bf16
      %153 = vector.broadcast %cst_156 : bf16 to vector<1x18x128xbf16>
      %c0_157 = arith.constant 0 : index
      %c0_158 = arith.constant 0 : index
      %c0_159 = arith.constant 0 : index
      %154 = vector.load %arg11[%c0_157, %c0_158, %c0_159] : memref<10x18x128xbf16, #tpu.memory_space<vmem>>, vector<1x18x128xbf16>
      tpu.vector_store %arg11[%c0_157, %c0_158, %c0_159], %153 {strides = array<i32>} : memref<10x18x128xbf16, #tpu.memory_space<vmem>>, vector<1x18x128xbf16>,
    } else {
    }
    %c1_i32 = arith.constant 1 : i32
    %82 = arith.cmpi eq, %arg1, %c1_i32 : i32
    %83 = arith.extui %82 : i1 to i32
    %c0_i32_83 = arith.constant 0 : i32
    %84 = arith.cmpi ne, %83, %c0_i32_83 : i32
    scf.if %84 {
      %cst_156 = arith.constant 0.000000e+00 : bf16
      %153 = vector.broadcast %cst_156 : bf16 to vector<1x18x128xbf16>
      %c9 = arith.constant 9 : index
      %c0_157 = arith.constant 0 : index
      %c0_158 = arith.constant 0 : index
      %154 = vector.load %arg11[%c9, %c0_157, %c0_158] : memref<10x18x128xbf16, #tpu.memory_space<vmem>>, vector<1x18x128xbf16>
      tpu.vector_store %arg11[%c9, %c0_157, %c0_158], %153 {strides = array<i32>} : memref<10x18x128xbf16, #tpu.memory_space<vmem>>, vector<1x18x128xbf16>,
    } else {
    }
    %c0_84 = arith.constant 0 : index
    %c0_85 = arith.constant 0 : index
    %c0_86 = arith.constant 0 : index
    %85 = vector.load %arg11[%c0_84, %c0_85, %c0_86] : memref<10x18x128xbf16, #tpu.memory_space<vmem>>, vector<8x16x128xbf16>
    %86 = vector.shape_cast %85 : vector<8x16x128xbf16> to vector<128x128xbf16>
    %c0_87 = arith.constant 0 : index
    %c0_88 = arith.constant 0 : index
    %c0_89 = arith.constant 0 : index
    %87 = vector.load %arg6[%c0_87, %c0_88, %c0_89] : memref<9x128x128xbf16, #tpu.memory_space<vmem>>, vector<1x128x128xbf16>
    %88 = vector.shape_cast %87 : vector<1x128x128xbf16> to vector<128x128xbf16>
    %cst_90 = arith.constant dense<0.000000e+00> : vector<128x128xf32>
    %89 = tpu.matmul %86, %88, %cst_90 {dimension_numbers = #tpu.dot_dimension_numbers<[1], [0], [0], [1], [0, 0, 1, 1], [], []>} : vector<128x128xbf16>, vector<128x128xbf16>, vector<128x128xf32> -> vector<128x128xf32>
    %c0_91 = arith.constant 0 : index
    %c1_92 = arith.constant 1 : index
    %c0_93 = arith.constant 0 : index
    %90 = vector.load %arg11[%c0_91, %c1_92, %c0_93] : memref<10x18x128xbf16, #tpu.memory_space<vmem>>, vector<8x16x128xbf16>
    %91 = vector.shape_cast %90 : vector<8x16x128xbf16> to vector<128x128xbf16>
    %c1_94 = arith.constant 1 : index
    %c0_95 = arith.constant 0 : index
    %c0_96 = arith.constant 0 : index
    %92 = vector.load %arg6[%c1_94, %c0_95, %c0_96] : memref<9x128x128xbf16, #tpu.memory_space<vmem>>, vector<1x128x128xbf16>
    %93 = vector.shape_cast %92 : vector<1x128x128xbf16> to vector<128x128xbf16>
    %cst_97 = arith.constant dense<0.000000e+00> : vector<128x128xf32>
    %94 = tpu.matmul %91, %93, %cst_97 {dimension_numbers = #tpu.dot_dimension_numbers<[1], [0], [0], [1], [0, 0, 1, 1], [], []>} : vector<128x128xbf16>, vector<128x128xbf16>, vector<128x128xf32> -> vector<128x128xf32>
    %95 = arith.addf %89, %94 : vector<128x128xf32>
    %c0_98 = arith.constant 0 : index
    %c2_99 = arith.constant 2 : index
    %c0_100 = arith.constant 0 : index
    %96 = vector.load %arg11[%c0_98, %c2_99, %c0_100] : memref<10x18x128xbf16, #tpu.memory_space<vmem>>, vector<8x16x128xbf16>
    %97 = vector.shape_cast %96 : vector<8x16x128xbf16> to vector<128x128xbf16>
    %c2_101 = arith.constant 2 : index
    %c0_102 = arith.constant 0 : index
    %c0_103 = arith.constant 0 : index
    %98 = vector.load %arg6[%c2_101, %c0_102, %c0_103] : memref<9x128x128xbf16, #tpu.memory_space<vmem>>, vector<1x128x128xbf16>
    %99 = vector.shape_cast %98 : vector<1x128x128xbf16> to vector<128x128xbf16>
    %cst_104 = arith.constant dense<0.000000e+00> : vector<128x128xf32>
    %100 = tpu.matmul %97, %99, %cst_104 {dimension_numbers = #tpu.dot_dimension_numbers<[1], [0], [0], [1], [0, 0, 1, 1], [], []>} : vector<128x128xbf16>, vector<128x128xbf16>, vector<128x128xf32> -> vector<128x128xf32>
    %101 = arith.addf %95, %100 : vector<128x128xf32>
    %c1_105 = arith.constant 1 : index
    %c0_106 = arith.constant 0 : index
    %c0_107 = arith.constant 0 : index
    %102 = vector.load %arg11[%c1_105, %c0_106, %c0_107] : memref<10x18x128xbf16, #tpu.memory_space<vmem>>, vector<8x16x128xbf16>
    %103 = vector.shape_cast %102 : vector<8x16x128xbf16> to vector<128x128xbf16>
    %c3_108 = arith.constant 3 : index
    %c0_109 = arith.constant 0 : index
    %c0_110 = arith.constant 0 : index
    %104 = vector.load %arg6[%c3_108, %c0_109, %c0_110] : memref<9x128x128xbf16, #tpu.memory_space<vmem>>, vector<1x128x128xbf16>
    %105 = vector.shape_cast %104 : vector<1x128x128xbf16> to vector<128x128xbf16>
    %cst_111 = arith.constant dense<0.000000e+00> : vector<128x128xf32>
    %106 = tpu.matmul %103, %105, %cst_111 {dimension_numbers = #tpu.dot_dimension_numbers<[1], [0], [0], [1], [0, 0, 1, 1], [], []>} : vector<128x128xbf16>, vector<128x128xbf16>, vector<128x128xf32> -> vector<128x128xf32>
    %107 = arith.addf %101, %106 : vector<128x128xf32>
    %c1_112 = arith.constant 1 : index
    %c1_113 = arith.constant 1 : index
    %c0_114 = arith.constant 0 : index
    %108 = vector.load %arg11[%c1_112, %c1_113, %c0_114] : memref<10x18x128xbf16, #tpu.memory_space<vmem>>, vector<8x16x128xbf16>
    %109 = vector.shape_cast %108 : vector<8x16x128xbf16> to vector<128x128xbf16>
    %c4_115 = arith.constant 4 : index
    %c0_116 = arith.constant 0 : index
    %c0_117 = arith.constant 0 : index
    %110 = vector.load %arg6[%c4_115, %c0_116, %c0_117] : memref<9x128x128xbf16, #tpu.memory_space<vmem>>, vector<1x128x128xbf16>
    %111 = vector.shape_cast %110 : vector<1x128x128xbf16> to vector<128x128xbf16>
    %cst_118 = arith.constant dense<0.000000e+00> : vector<128x128xf32>
    %112 = tpu.matmul %109, %111, %cst_118 {dimension_numbers = #tpu.dot_dimension_numbers<[1], [0], [0], [1], [0, 0, 1, 1], [], []>} : vector<128x128xbf16>, vector<128x128xbf16>, vector<128x128xf32> -> vector<128x128xf32>
    %113 = arith.addf %107, %112 : vector<128x128xf32>
    %c1_119 = arith.constant 1 : index
    %c2_120 = arith.constant 2 : index
    %c0_121 = arith.constant 0 : index
    %114 = vector.load %arg11[%c1_119, %c2_120, %c0_121] : memref<10x18x128xbf16, #tpu.memory_space<vmem>>, vector<8x16x128xbf16>
    %115 = vector.shape_cast %114 : vector<8x16x128xbf16> to vector<128x128xbf16>
    %c5_122 = arith.constant 5 : index
    %c0_123 = arith.constant 0 : index
    %c0_124 = arith.constant 0 : index
    %116 = vector.load %arg6[%c5_122, %c0_123, %c0_124] : memref<9x128x128xbf16, #tpu.memory_space<vmem>>, vector<1x128x128xbf16>
    %117 = vector.shape_cast %116 : vector<1x128x128xbf16> to vector<128x128xbf16>
    %cst_125 = arith.constant dense<0.000000e+00> : vector<128x128xf32>
    %118 = tpu.matmul %115, %117, %cst_125 {dimension_numbers = #tpu.dot_dimension_numbers<[1], [0], [0], [1], [0, 0, 1, 1], [], []>} : vector<128x128xbf16>, vector<128x128xbf16>, vector<128x128xf32> -> vector<128x128xf32>
    %119 = arith.addf %113, %118 : vector<128x128xf32>
    %c2_126 = arith.constant 2 : index
    %c0_127 = arith.constant 0 : index
    %c0_128 = arith.constant 0 : index
    %120 = vector.load %arg11[%c2_126, %c0_127, %c0_128] : memref<10x18x128xbf16, #tpu.memory_space<vmem>>, vector<8x16x128xbf16>
    %121 = vector.shape_cast %120 : vector<8x16x128xbf16> to vector<128x128xbf16>
    %c6_129 = arith.constant 6 : index
    %c0_130 = arith.constant 0 : index
    %c0_131 = arith.constant 0 : index
    %122 = vector.load %arg6[%c6_129, %c0_130, %c0_131] : memref<9x128x128xbf16, #tpu.memory_space<vmem>>, vector<1x128x128xbf16>
    %123 = vector.shape_cast %122 : vector<1x128x128xbf16> to vector<128x128xbf16>
    %cst_132 = arith.constant dense<0.000000e+00> : vector<128x128xf32>
    %124 = tpu.matmul %121, %123, %cst_132 {dimension_numbers = #tpu.dot_dimension_numbers<[1], [0], [0], [1], [0, 0, 1, 1], [], []>} : vector<128x128xbf16>, vector<128x128xbf16>, vector<128x128xf32> -> vector<128x128xf32>
    %125 = arith.addf %119, %124 : vector<128x128xf32>
    %c2_133 = arith.constant 2 : index
    %c1_134 = arith.constant 1 : index
    %c0_135 = arith.constant 0 : index
    %126 = vector.load %arg11[%c2_133, %c1_134, %c0_135] : memref<10x18x128xbf16, #tpu.memory_space<vmem>>, vector<8x16x128xbf16>
    %127 = vector.shape_cast %126 : vector<8x16x128xbf16> to vector<128x128xbf16>
    %c7_136 = arith.constant 7 : index
    %c0_137 = arith.constant 0 : index
    %c0_138 = arith.constant 0 : index
    %128 = vector.load %arg6[%c7_136, %c0_137, %c0_138] : memref<9x128x128xbf16, #tpu.memory_space<vmem>>, vector<1x128x128xbf16>
    %129 = vector.shape_cast %128 : vector<1x128x128xbf16> to vector<128x128xbf16>
    %cst_139 = arith.constant dense<0.000000e+00> : vector<128x128xf32>
    %130 = tpu.matmul %127, %129, %cst_139 {dimension_numbers = #tpu.dot_dimension_numbers<[1], [0], [0], [1], [0, 0, 1, 1], [], []>} : vector<128x128xbf16>, vector<128x128xbf16>, vector<128x128xf32> -> vector<128x128xf32>
    %131 = arith.addf %125, %130 : vector<128x128xf32>
    %c2_140 = arith.constant 2 : index
    %c2_141 = arith.constant 2 : index
    %c0_142 = arith.constant 0 : index
    %132 = vector.load %arg11[%c2_140, %c2_141, %c0_142] : memref<10x18x128xbf16, #tpu.memory_space<vmem>>, vector<8x16x128xbf16>
    %133 = vector.shape_cast %132 : vector<8x16x128xbf16> to vector<128x128xbf16>
    %c8_143 = arith.constant 8 : index
    %c0_144 = arith.constant 0 : index
    %c0_145 = arith.constant 0 : index
    %134 = vector.load %arg6[%c8_143, %c0_144, %c0_145] : memref<9x128x128xbf16, #tpu.memory_space<vmem>>, vector<1x128x128xbf16>
    %135 = vector.shape_cast %134 : vector<1x128x128xbf16> to vector<128x128xbf16>
    %cst_146 = arith.constant dense<0.000000e+00> : vector<128x128xf32>
    %136 = tpu.matmul %133, %135, %cst_146 {dimension_numbers = #tpu.dot_dimension_numbers<[1], [0], [0], [1], [0, 0, 1, 1], [], []>} : vector<128x128xbf16>, vector<128x128xbf16>, vector<128x128xf32> -> vector<128x128xf32>
    %137 = arith.addf %131, %136 : vector<128x128xf32>
    %c0_147 = arith.constant 0 : index
    %c0_148 = arith.constant 0 : index
    %138 = vector.load %arg7[%c0_147, %c0_148] : memref<1x128xf32, #tpu.memory_space<vmem>>, vector<1x128xf32>
    %139 = vector.broadcast %138 : vector<1x128xf32> to vector<128x128xf32>
    %140 = arith.mulf %137, %139 : vector<128x128xf32>
    %c0_149 = arith.constant 0 : index
    %c0_150 = arith.constant 0 : index
    %141 = vector.load %arg8[%c0_149, %c0_150] : memref<1x128xf32, #tpu.memory_space<vmem>>, vector<1x128xf32>
    %142 = vector.broadcast %141 : vector<1x128xf32> to vector<128x128xf32>
    %143 = arith.addf %140, %142 : vector<128x128xf32>
    %144 = vector.extract_strided_slice %4 {offsets = [2, 0, 0], sizes = [8, 16, 128], strides = [1, 1, 1]} : vector<12x16x128xf32> to vector<8x16x128xf32>
    %145 = vector.shape_cast %144 : vector<8x16x128xf32> to vector<128x128xf32>
    %146 = arith.addf %143, %145 : vector<128x128xf32>
    %cst_151 = arith.constant 0.000000e+00 : f32
    %147 = vector.broadcast %cst_151 : f32 to vector<128x128xf32>
    %148 = arith.maximumf %146, %147 : vector<128x128xf32>
    %149 = vector.shape_cast %148 : vector<128x128xf32> to vector<8x16x128xf32>
    %c0_152 = arith.constant 0 : index
    %c0_153 = arith.constant 0 : index
    %c0_154 = arith.constant 0 : index
    %c0_155 = arith.constant 0 : index
    %150 = vector.load %arg9[%c0_152, %c0_153, %c0_154, %c0_155] : memref<1x8x16x128xf32, #tpu.memory_space<vmem>>, vector<1x8x16x128xf32>
    %151 = vector.shape_cast %150 : vector<1x8x16x128xf32> to vector<8x16x128xf32>
    %152 = vector.shape_cast %149 : vector<8x16x128xf32> to vector<1x8x16x128xf32>
    tpu.vector_store %arg9[%c0_152, %c0_153, %c0_154, %c0_155], %152 {strides = array<i32>} : memref<1x8x16x128xf32, #tpu.memory_space<vmem>>, vector<1x8x16x128xf32>,
    return
  }
  func.func @transform_0(%arg0: i32, %arg1: i32) -> (i32, i32, i32, i32) {
    %c0_i32 = arith.constant 0 : i32
    %c0_i32_0 = arith.constant 0 : i32
    %c0_i32_1 = arith.constant 0 : i32
    %c0_i32_2 = arith.constant 0 : i32
    return %arg0, %c0_i32, %c0_i32_0, %c0_i32_1 : i32, i32, i32, i32
  }
  func.func @transform_1(%arg0: i32, %arg1: i32) -> (i32, i32, i32) {
    %c0_i32 = arith.constant 0 : i32
    %c0_i32_0 = arith.constant 0 : i32
    %c0_i32_1 = arith.constant 0 : i32
    %c0_i32_2 = arith.constant 0 : i32
    return %c0_i32, %c0_i32_0, %c0_i32_1 : i32, i32, i32
  }
  func.func @transform_2(%arg0: i32, %arg1: i32) -> (i32, i32) {
    %c0_i32 = arith.constant 0 : i32
    %c0_i32_0 = arith.constant 0 : i32
    %c0_i32_1 = arith.constant 0 : i32
    return %c0_i32, %c0_i32_0 : i32, i32
  }
  func.func @transform_3(%arg0: i32, %arg1: i32) -> (i32, i32) {
    %c0_i32 = arith.constant 0 : i32
    %c0_i32_0 = arith.constant 0 : i32
    %c0_i32_1 = arith.constant 0 : i32
    return %c0_i32, %c0_i32_0 : i32, i32
  }
  func.func @transform_4(%arg0: i32, %arg1: i32) -> (i32, i32, i32) {
    %c0_i32 = arith.constant 0 : i32
    %c0_i32_0 = arith.constant 0 : i32
    %c0_i32_1 = arith.constant 0 : i32
    %c0_i32_2 = arith.constant 0 : i32
    return %c0_i32, %c0_i32_0, %c0_i32_1 : i32, i32, i32
  }
  func.func @transform_5(%arg0: i32, %arg1: i32) -> (i32, i32) {
    %c0_i32 = arith.constant 0 : i32
    %c0_i32_0 = arith.constant 0 : i32
    %c0_i32_1 = arith.constant 0 : i32
    return %c0_i32, %c0_i32_0 : i32, i32
  }
  func.func @transform_6(%arg0: i32, %arg1: i32) -> (i32, i32) {
    %c0_i32 = arith.constant 0 : i32
    %c0_i32_0 = arith.constant 0 : i32
    %c0_i32_1 = arith.constant 0 : i32
    return %c0_i32, %c0_i32_0 : i32, i32
  }
  func.func @transform_7(%arg0: i32, %arg1: i32) -> (i32, i32, i32, i32) {
    %c0_i32 = arith.constant 0 : i32
    %c0_i32_0 = arith.constant 0 : i32
    %c0_i32_1 = arith.constant 0 : i32
    return %arg0, %arg1, %c0_i32, %c0_i32_0 : i32, i32, i32, i32
  }
}

</mosaic_0001>

<bundles_post_ra>
// kernel: tpu_custom_call.1
= control target key start
LH: loop header
LB: loop body
LE: loop exit
PB: predicated region body
PF: predicated region fallthrough
CT: control target
= control target key end

     0   :  { %s10141_s0 = inlined_call_operand.hbm [shape: f32[2,20,16,128], index: 0, kind: input, shape index: {}]   ;;  %s10142_s1 = inlined_call_operand.hbm [shape: bf16[9,128,128], index: 1, kind: input, shape index: {}]   ;;  %s10143_s2 = inlined_call_operand.vmem [shape: f32[1,128], index: 2, kind: input, shape index: {}]   ;;  %s10144_s3 = inlined_call_operand.vmem [shape: f32[1,128], index: 3, kind: input, shape index: {}]   ;;  %s10145_s4 = inlined_call_operand.hbm [shape: bf16[9,128,128], index: 4, kind: input, shape index: {}]   ;;  %s10146_s5 = inlined_call_operand.vmem [shape: f32[1,128], index: 5, kind: input, shape index: {}]   ;;  %s10147_s6 = inlined_call_operand.vmem [shape: f32[1,128], index: 6, kind: input, shape index: {}]   ;;  %s10148_s7 = inlined_call_operand.hbm [shape: f32[2,16,16,128], index: 7, kind: output, shape index: {}]  }
   0x1   :  { %10179 = sst [smem:[#allocation50_spill]] %s10142_s1 }
   0x2   :  { %10180 = sst [smem:[#allocation51_spill]] %s10145_s4 }
   0x3   :  { %10181 = sst [smem:[#allocation52_spill]] %s10146_s5 }
   0x4   :  { %10182 = sst [smem:[#allocation53_spill]] %s10147_s6 }
   0x5   :  { %10183 = sst [smem:[#allocation54_spill]] %s10148_s7 }
   0x6   :  { %12 = vsyncpa [#allocation5], 0 }
   0x7   :  { %14 = vsyncpa [#allocation5 + $0x1], 0 }
   0x8   :  { %15 = vsyncpa [#allocation8], 0 }
   0x9   :  { %16 = vsyncpa [#allocation6], 0 }
   0xa   :  { %18 = vsyncpa [#allocation6 + $0x1], 0  ;;  %s8222_s24 = smov 0   ;;  %s8224_s25 = smov 0  }
   0xb   :  { %s8226_s26 = smov 0   ;;  %s8228_s27 = smov 0  }
   0xc   :  { %s8230_s28 = smov 0   ;;  %s8232_s29 = smov 0  }
   0xd   :  { %s8234_s30 = smov 0   ;;  %s8236_s8 = smov 0  }
   0xe   :  { %s8238_s9 = smov 0   ;;  %s8240_s10 = smov 0  }
   0xf   :  { %s8242_s11 = smov 0  }
  0x10 LB: > { %10184 = sst [smem:[#allocation14_spill]] %s8130_s24  ;;  %s6716_s12 = sadd.s32 4294967295, %s8170_s11   ;;  %s8170_s11 = sphi %s8242_s11, %s24_s11   ;;  %s8166_s10 = sphi %s8240_s10, %s10288_s10   ;;  %s8162_s9 = sphi %s8238_s9, %s10287_s9   ;;  %s8158_s8 = sphi %s8236_s8, %s10286_s8   ;;  %s8154_s30 = sphi %s8234_s30, %s10277_s30   ;;  %s8150_s29 = sphi %s8232_s29, %s10285_s29   ;;  %s8146_s28 = sphi %s8230_s28, %s10284_s28   ;;  %s8142_s27 = sphi %s8228_s27, %s10283_s27   ;;  %s8138_s26 = sphi %s8226_s26, %s10282_s26   ;;  %s8134_s25 = sphi %s8224_s25, %s10281_s25   ;;  %s8130_s24 = sphi %s8222_s24, %s10280_s24  }
  0x11   : > { %10185 = sst [smem:[#allocation15_spill]] %s8158_s8  ;;  %s6717_s13 = sadd.s32 4294967294, %s8170_s11  }
  0x12   : > { %10186 = sst [smem:[#allocation16_spill]] %s8162_s9  ;;  %p56_p0 = scmp.ne.s32.totalorder %s8146_s28, %s8142_s27 }
  0x13   : > { %p8278_p1 = scmp.eq.s32.totalorder %s6716_s12, 0  ;;  %p207_p2 = scmp.ne.s32.totalorder %s8138_s26, %s8134_s25 }
  0x14   : > { %p208_p3 = scmp.eq.s32.totalorder %s6716_s12, 3  ;;  %p213_p5 = scmp.ne.s32.totalorder %s8134_s25, %s8130_s24 }
  0x15   : > { %p8286_p4 = por %p8278_p1, %p56_p0  ;;  %p214_p7 = scmp.eq.s32.totalorder %s6717_s13, 3 }
  0x16   : > { %p8292_p6 = por %p208_p3, %p207_p2  ;;  %p6718_p8 = scmp.ge.s32.totalorder %s8170_s11, 1 }
  0x17   : > { %p221_p9 = scmp.lt.s32.totalorder %s8170_s11, 5  ;;  %p8298_p10 = por %p214_p7, %p213_p5 }
  0x18   : > { %s10189_s16 = scalar_select %p8292_p6, 1, 0 }
  0x19   : > { %s10191_s17 = scalar_select %p8298_p10, 1, 0 }
  0x1a   : > { %10190 = sst [smem:[#allocation17_spill]] %s10189_s16  ;;  %p8302_p11 = pnand %p6718_p8, %p221_p9 }
  0x1b   : > { %10192 = sst [smem:[#allocation18_spill]] %s10191_s17  ;;  %s8172_s22 = smov [#allocation7]  }
  0x1c   : > { %s10194_s1 = sld [smem:[#allocation50_spill]]  ;;  %p7815_p12 = pneg %p8302_p11 }
  0x1d   : > { %s234_s23 = sshll.u32 %s8172_s22, 4  ;;  %s10195_s4 = sld [smem:[#allocation51_spill]]  ;;  %s235_s23 = int_to_ptr.vmem [resolvable:$true] %s234_s23 }
  0x1e   : > { %p7816_p13 = pnand %p7815_p12, %p8278_p1  ;;  %s8173_s19 = smov 64  }
  0x1f   : > { %s8174_s20 = smov 4   ;;  %s33_s17 = sadd.s32 1, %s8162_s9 }
  0x20   : > { %p34_p0 = scmp.ge.s32.totalorder %s33_s17, 2  ;;  %s36_s27 = sadd.s32 1, %s8166_s10 }
  0x21   : > { %s43_s12 = sadd.s32 1, %s8150_s29  ;;  %p50_p2 = scmp.ne.s32.totalorder %s8150_s29, %s8146_s28 }
  0x22   : > { %s232_s21 = sshll.u32 %s10194_s1, 4  ;;  %s8175_s1 = smov [#allocation9]   ;;  %s233_s21 = int_to_ptr.hbm [resolvable:$true] %s232_s21 }
  0x23   : > { %s252_s13 = sshll.u32 %s10195_s4, 4  ;;  %s254_s22 = sshll.u32 %s8175_s1, 4  ;;  %s253_s13 = int_to_ptr.hbm [resolvable:$true] %s252_s13  ;;  %s255_s22 = int_to_ptr.vmem [resolvable:$true] %s254_s22 }
  0x24   : > { %7818 = dma.hbm_to_vmem [thread:$0]  (!%p7816_p13), %s233_s21, 9216, %s235_s23, [#allocation8], %s8173_s19, %s8173_s19, %s8174_s20  }
  0x25   : > { %7821 = dma.hbm_to_vmem [thread:$0]  (!%p7816_p13), %s253_s13, 9216, %s255_s22, [#allocation8], %s8173_s19, %s8173_s19, %s8174_s20  }
  0x26   : > { %s10290_s17 = smov (%p34_p0, %s33_s17), 0  ;;  %s10292_s27 = smov (!%p34_p0, %s36_s27), %s8166_s10 }
  0x27   : > { %10196 = sst [smem:[#allocation19_spill]] %s10290_s17  ;;  %p51_p3 = scmp.eq.s32.totalorder %s8170_s11, 0 }
  0x28   : > { %s193_s21 = ssub.s32 %s8162_s9, %s10290_s17  ;;  %p38_p5 = scmp.ge.s32.totalorder %s10292_s27, 2 }
  0x29   : > { %s197_s1 = sadd.s32 1, %s8138_s26  ;;  %p8328_p7 = por %p51_p3, %p50_p2 }
  0x2a   : > { %p7832_p8 = scmp.lt.s32.totalorder %s8170_s11, 4  ;;  %s10294_s27 = smov (%p38_p5, %s10292_s27), 0 }
  0x2b   : > { %10198 = sst [smem:[#allocation20_spill]] %s10294_s27  ;;  %s274_s13 = sand.u32 1, %s8150_s29  }
  0x2c   : > { %s7801_s19 = smul.u32 320, %s8166_s10  ;;  %s40_s20 = ssub.s32 %s8166_s10, %s10294_s27 }
  0x2d   : > { %p41_p9 = scmp.eq.s32.totalorder %s40_s20, 0  ;;  %s194_s22 = sor.u32 %s193_s21, %s40_s20 }
  0x2e   : > { %p195_p12 = scmp.eq.s32.totalorder %s194_s22, 0  ;;  %s7800_s4 = smul.u32 320, %s274_s13 }
  0x2f   : > { %s8340_s17 = scalar_select %p41_p9, %s8150_s29, %s43_s12  }
  0x30   : > { %s8343_s9 = scalar_select %p195_p12, %s8138_s26, %s197_s1  }
  0x31   : > { %s283_s7 = scalar_lea.hbm %s10141_s0, %s7801_s19  ;;  %s278_s6 = scalar_lea.vmem [#allocation4], %s7800_s4 }
  0x32   : > { %s284_s8 = sshll.u32 %s283_s7, 4  ;;  %s286_s5 = sshll.u32 %s278_s6, 4  ;;  %s285_s8 = int_to_ptr.hbm [resolvable:$true] %s284_s8  ;;  %s287_s5 = int_to_ptr.vmem [resolvable:$true] %s286_s5 }
  0x33   : > { %p7823_p13 = pnand %p7832_p8, %p8328_p7  ;;  %s275_s27 = scalar_lea.sflag [#allocation5], %s274_s13 }
  0x34   : > { %s8176_s21 = smov 128   ;;  %s8177_s20 = smov 8  }
  0x35   : > { %7825 = dma.hbm_to_vmem [thread:$0]  (!%p7823_p13), %s285_s8, 5120, %s287_s5, %s275_s27, %s8176_s21, %s8176_s21, %s8177_s20  }
  0x36   : > { %298 = sbr.rel (%p8302_p11) target bundleno = 1341 (0x53d), region = 48 }
  0x3b   : > { %s300_s12 = sand.u32 1, %s8146_s28  }
  0x3c   : > { %s7802_s24 = smul.u32 320, %s300_s12  ;;  %s301_s16 = scalar_lea.sflag [#allocation5], %s300_s12 }
  0x3e   : > { %s304_s7 = scalar_lea.vmem [#allocation4], %s7802_s24 }
  0x3f   : > { %8117 = dma.done.wait (%p8286_p4), %s301_s16, 5120  }
  0x40   : > { %8119 = vsyncadd (%p8286_p4), %s301_s16, 4294962176 }
  0x41   : > { %8121 = dma.done.wait (%p8278_p1), [#allocation8], 18432  }
  0x42   : > { %8123 = vsyncadd (%p8278_p1), [#allocation8], 4294948864  ;;  %s343_s4 = sand.u32 1, %s8134_s25   ;;  %s7584_s6 = sshll.u32 %s8154_s30, 7  ;;  %v7610_v0 = vld [vmem:[#allocation7 + $0x78] sm:$0xff]  ;;  %vm375_vm0 = vcmask 1040384  }
  0x43   : > { %s8366_s5 = sshll.u32 %s343_s4, 7  ;;  %v7602_v1 = vld [vmem:[#allocation7 + $0x38] sm:$0xff]  ;;  %vm376_vm1 = vsmask.f32 256  ;;  %vm414_vm2 = vsmask.f32 7938  ;;  %1258 = vmatpush.bf16.msra.mxu0 %v7610_v0  ;;  %s8369_s8 = scalar_lea.vmem %s304_s7, %s7584_s6 [#allocation4] }
  0x44   : > { %1425 = vmatpush.bf16.msra.mxu1 %v7602_v1  ;;  %v7609_v2 = vld [vmem:[#allocation7 + $0x70] sm:$0xff]  ;;  %7784 = vmatpush.bf16.msra.mxu3 %v7602_v1  ;;  %vm8372_vm3 = vmand %vm375_vm0, %vm376_vm1  ;;  %v7608_v6 = vld [vmem:[#allocation7 + $0x68] sm:$0xff]  ;;  %vm536_vm5 = vsmask.f32 4368  ;;  %vm778_vm6 = vcmask 1043456   ;;  %v10205_v36 = vmov 0 }
  0x45   : > { %v7601_v3 = vld [vmem:[#allocation7 + $0x30] sm:$0xff]  ;;  %vm8377_vm4 = vmand %vm375_vm0, %vm414_vm2  ;;  %v351_v7 = vld [vmem:[%s8369_s8] sm:$0xff]  ;;  %v10209_v48 = vmov 0  ;;  %vm910_vm9 = vsmask.f32 3328  ;;  %vm1514_vm12 = vcmask 1042432  }
  0x46   : > { %v352_v8 = vld [vmem:[%s8369_s8 + $0x8] sm:$0xff]  ;;  %v7600_v9 = vld [vmem:[#allocation7 + $0x28] sm:$0xff]  ;;  %v378_v10 = vld [vmem:[#allocation2] sm:$0x1]  ;;  %v512_v12 = vpack.c.bf16 %v351_v7, %v351_v7  ;;  %vm911_vm10 = vsmask.f32 7440 }
  0x47   : > { %1259 = vmatpush.bf16.msra.mxu0 %v7609_v2  ;;  %v416_v11 = vld [vmem:[#allocation2 + $0x8] sm:$0x1]  ;;  %v513_v13 = vpack.c.bf16 %v352_v8, %v352_v8  ;;  %v379_v14 = vsel %vm8372_vm3, 0, %v378_v10  ;;  %v8388_v16 = vld [vmem:[%s8369_s8 + $0x70] sm:$0xff]  ;;  %v8391_v17 = vld [vmem:[%s8369_s8 + $0x78] sm:$0xff]  ;;  %vm1515_vm13 = vcmask 1046532  }
  0x48   : > { %1426 = vmatpush.bf16.msra.mxu1 %v7601_v3  ;;  %7785 = vmatpush.bf16.msra.mxu3 %v7601_v3  ;;  %v417_v15 = vsel %vm8377_vm4, 0, %v416_v11  ;;  %10203 = vst [vmem:[#allocation21_spill] sm:$0xff] %v8388_v16  ;;  %v399_v18 = vld [vmem:[#allocation2 + $0x54] sm:$0x1]  ;;  %v7607_v19 = vld [vmem:[#allocation7 + $0x60] sm:$0xff]  ;;  %v539_v21 = vshrl.u32 %v512_v12, 16  ;;  %v526_v26 = vpack.c.bf16 %v8388_v16, %v8388_v16  ;;  %v527_v27 = vpack.c.bf16 %v8391_v17, %v8391_v17  ;;  %vm8405_vm7 = vmor %vm376_vm1, %vm536_vm5 }
  0x49   : > { %10204 = vst [vmem:[#allocation22_spill] sm:$0xff] %v8391_v17  ;;  %v7599_v20 = vld [vmem:[#allocation7 + $0x20] sm:$0xff]  ;;  %v542_v22 = vshll.u32 %v512_v12, 16  ;;  %v547_v23 = vshrl.u32 %v513_v13, 16  ;;  %v550_v24 = vshll.u32 %v513_v13, 16  ;;  %v400_v25 = vsel %vm8372_vm3, 0, %v399_v18  ;;  %vm8415_vm8 = vmand %vm778_vm6, %vm414_vm2 }
  0x4a   : > { %380 = vst [vmem:[#allocation2] sm:$0x1] %v379_v14  ;;  %v8399_v28 = vld [vmem:[#allocation7 + $0xb8] sm:$0xff]  ;;  %v353_v29 = vld [vmem:[%s8369_s8 + $0x10] sm:$0xff]  ;;  %v354_v30 = vld [vmem:[%s8369_s8 + $0x18] sm:$0xff]  ;;  %v541_v31 = vrot.slane %v539_v21, 7 }
  0x4b   : > { %418 = vst [vmem:[#allocation2 + $0x8] sm:$0x1] %v417_v15  ;;  %1260 = vmatpush.bf16.msra.mxu0 %v7608_v6  ;;  %v549_v32 = vrot.slane %v547_v23, 7  ;;  %v381_v33 = vld [vmem:[#allocation2 + $0xc] sm:$0x1]  ;;  %v514_v34 = vpack.c.bf16 %v353_v29, %v353_v29  ;;  %v515_v35 = vpack.c.bf16 %v354_v30, %v354_v30  ;;  %v10206_v36 = vsel %vm8405_vm7, 4294967295, %v10205_v36  ;;  %7792 = vmatpush.bf16.msra.mxu2 %v8399_v28  ;;  %vm8477_vm11 = vmor %vm910_vm9, %vm911_vm10 }
  0x4c   : > { %1427 = vmatpush.bf16.msra.mxu1 %v7600_v9  ;;  %401 = vst [vmem:[#allocation2 + $0x54] sm:$0x1] %v400_v25  ;;  %7786 = vmatpush.bf16.msra.mxu3 %v7600_v9  ;;  %v658_v37 = vshrl.u32 %v526_v26, 16  ;;  %v661_v38 = vshll.u32 %v526_v26, 16  ;;  %v666_v39 = vshrl.u32 %v527_v27, 16  ;;  %v669_v40 = vshll.u32 %v527_v27, 16  ;;  %vm8643_vm14 = vmor %vm1514_vm12, %vm1515_vm13 }
  0x4d   : > { %10207 = vst [vmem:[#allocation23_spill] sm:$0xff] %v10206_v36  ;;  %v419_v41 = vld [vmem:[#allocation2 + $0x14] sm:$0x1]  ;;  %v7606_v42 = vld [vmem:[#allocation7 + $0x58] sm:$0xff]  ;;  %v544_v43 = vor.u32 %v542_v22, %v541_v31  ;;  %v545_v44 = vrot.slane %v541_v31, 4  ;;  %v552_v45 = vor.u32 %v550_v24, %v549_v32  ;;  %v554_v46 = vrot.slane %v549_v32, 4 }
  0x4e   : > { %v8411_v47 = vld [vmem:[%s8369_s8 + $0x80] sm:$0xff]  ;;  %v10210_v48 = vsel %vm8415_vm8, 4294967295, %v10209_v48  ;;  %v660_v49 = vrot.slane %v658_v37, 7  ;;  %v8419_v50 = vrot.slane %v666_v39, 7  ;;  %v382_v51 = vsel %vm8372_vm3, 0, %v381_v33  ;;  %v8429_v63 = vld [vmem:[%s8369_s8 + $0x88] sm:$0xff] }
  0x4f   : > { %10208 = vst [vmem:[#allocation24_spill] sm:$0xff] %v8411_v47  ;;  %v420_v52 = vsel %vm8377_vm4, 0, %v419_v41  ;;  %v402_v53 = vld [vmem:[#allocation2 + $0x60] sm:$0x1]  ;;  %1261 = vmatpush.bf16.msra.mxu0 %v7607_v19  ;;  %v553_v55 = vsel %vm8405_vm7, %v545_v44, %v552_v45  ;;  %v556_v56 = vshrl.u32 %v514_v34, 16  ;;  %v559_v57 = vshll.u32 %v514_v34, 16 }
  0x50   : > { %10211 = vst [vmem:[#allocation25_spill] sm:$0xff] %v10210_v48  ;;  %1428 = vmatpush.bf16.msra.mxu1 %v7599_v20  ;;  %v7598_v54 = vld [vmem:[#allocation7 + $0x18] sm:$0xff]  ;;  %v564_v58 = vshrl.u32 %v515_v35, 16  ;;  %7787 = vmatpush.bf16.msra.mxu3 %v7599_v20  ;;  %v663_v60 = vor.u32 %v661_v38, %v660_v49  ;;  %v664_v61 = vrot.slane %v660_v49, 4  ;;  %v671_v62 = vor.u32 %v669_v40, %v8419_v50  ;;  %v7605_v0 = vld [vmem:[#allocation7 + $0x50] sm:$0xff]  ;;  %v7604_v23 = vld [vmem:[#allocation7 + $0x48] sm:$0xff] }
  0x51   : > { %383 = vst [vmem:[#allocation2 + $0xc] sm:$0x1] %v382_v51  ;;  %v780_v59 = vld [vmem:[#allocation2] sm:$0xf]  ;;  %v558_v3 = vrot.slane %v556_v56, 7  ;;  %v528_v7 = vpack.c.bf16 %v8411_v47, %v8411_v47  ;;  %v7597_v8 = vld [vmem:[#allocation7 + $0x10] sm:$0xff]  ;;  %v529_v21 = vpack.c.bf16 %v8429_v63, %v8429_v63 }
  0x52   : > { %783 = vst [vmem:[#allocation2 + $0x4] sm:$0xf] %v553_v55  ;;  %v781_v1 = vsel %vm8415_vm8, %v544_v43, %v780_v59  ;;  %v784_v2 = vld [vmem:[#allocation2 + $0x8] sm:$0x1]  ;;  %v566_v6 = vrot.slane %v564_v58, 7  ;;  %v672_v10 = vsel %vm8405_vm7, %v664_v61, %v671_v62  ;;  %v567_v12 = vshll.u32 %v515_v35, 16 }
  0x53   : > { %10212 = vst [vmem:[#allocation26_spill] sm:$0xff] %v8429_v63  ;;  %v785_v9 = vsel %vm8372_vm3, %v554_v46, %v784_v2  ;;  %v829_v11 = vld [vmem:[#allocation2 + $0x54] sm:$0xf]  ;;  %1262 = vmatpush.bf16.msra.mxu0 %v7606_v42  ;;  %v561_v14 = vor.u32 %v559_v57, %v558_v3  ;;  %v562_v15 = vrot.slane %v558_v3, 4  ;;  %v403_v18 = vsel %vm8372_vm3, 0, %v402_v53  ;;  %v8448_v27 = vld [vmem:[%s8369_s8 + $0x20] sm:$0xff] }
  0x54   : > { %421 = vst [vmem:[#allocation2 + $0x14] sm:$0x1] %v420_v52  ;;  %1429 = vmatpush.bf16.msra.mxu1 %v7598_v54  ;;  %v830_v13 = vsel %vm8415_vm8, %v663_v60, %v829_v11  ;;  %v8443_v19 = vld [vmem:[#allocation2 + $0x18] sm:$0x1]  ;;  %7788 = vmatpush.bf16.msra.mxu3 %v7598_v54  ;;  %v569_v20 = vor.u32 %v567_v12, %v566_v6  ;;  %v675_v22 = vshrl.u32 %v528_v7, 16  ;;  %v7596_v24 = vld [vmem:[#allocation7 + $0x8] sm:$0xff] }
  0x55   : > { %782 = vst [vmem:[#allocation2] sm:$0xf] %v781_v1  ;;  %v571_v25 = vrot.slane %v566_v6, 4  ;;  %v678_v26 = vshll.u32 %v528_v7, 16  ;;  %v385_v29 = vsel %vm8372_vm3, 0, %v8443_v19  ;;  %v683_v33 = vshrl.u32 %v529_v21, 16 }
  0x56   : > { %786 = vst [vmem:[#allocation2 + $0x8] sm:$0x1] %v785_v9  ;;  %v570_v30 = vsel %vm8405_vm7, %v562_v15, %v569_v20  ;;  %v677_v32 = vrot.slane %v675_v22, 7  ;;  %v8456_v34 = vld [vmem:[%s8369_s8 + $0x28] sm:$0xff]  ;;  %v8458_v35 = vld [vmem:[#allocation2 + $0x20] sm:$0x1]  ;;  %v8466_v44 = vpack.c.bf16 %v8448_v27, %v8448_v27 }
  0x57   : > { %831 = vst [vmem:[#allocation2 + $0x54] sm:$0xf] %v830_v13  ;;  %1263 = vmatpush.bf16.msra.mxu0 %v7605_v0  ;;  %v686_v39 = vshll.u32 %v529_v21, 16  ;;  %v8462_v40 = vld [vmem:[#allocation7 + $0xb0] sm:$0xff]  ;;  %v7603_v45 = vld [vmem:[#allocation7 + $0x40] sm:$0xff]  ;;  %v8470_v53 = vrot.slane %v683_v33, 7  ;;  %v8489_v2 = vpack.c.bf16 %v8456_v34, %v8456_v34 }
  0x58   : > { %832 = vst [vmem:[#allocation2 + $0x58] sm:$0xf] %v672_v10  ;;  %v787_v31 = vld [vmem:[#allocation2 + $0xc] sm:$0xf]  ;;  %1430 = vmatpush.bf16.msra.mxu1 %v7597_v8  ;;  %7789 = vmatpush.bf16.msra.mxu3 %v7597_v8  ;;  %v680_v51 = vor.u32 %v678_v26, %v677_v32  ;;  %v681_v52 = vrot.slane %v677_v32, 4  ;;  %v8482_v0 = vld [vmem:[#allocation7 + $0xa8] sm:$0xff] }
  0x59   : > { %10213 = vst [vmem:[#allocation27_spill] sm:$0xff] %v8448_v27  ;;  %v865_v37 = vld [vmem:[#allocation2 + $0x4] sm:$0xf]  ;;  %v788_v38 = vsel %vm8415_vm8, %v561_v14, %v787_v31  ;;  %7793 = vmatpush.bf16.msra.mxu2 %v8462_v40  ;;  %v7595_v59 = vld [vmem:[#allocation7] sm:$0xff]  ;;  %v688_v62 = vor.u32 %v686_v39, %v8470_v53  ;;  %v423_v1 = vsel %vm8377_vm4, 0, %v8458_v35  ;;  %v573_v9 = vshrl.u32 %v8466_v44, 16 }
  0x5a   : > { %404 = vst [vmem:[#allocation2 + $0x60] sm:$0x1] %v403_v18  ;;  %v923_v41 = vshll.u32 %v865_v37, 16  ;;  %v927_v42 = vshrl.u32 %v865_v37, 16  ;;  %v8494_v10 = vld [vmem:[%s8369_s8 + $0x90] sm:$0xff]  ;;  %v8497_v11 = vld [vmem:[%s8369_s8 + $0x98] sm:$0xff] }
  0x5b   : > { %10214 = vst [vmem:[#allocation28_spill] sm:$0xff] %v8456_v34  ;;  %v791_v43 = vld [vmem:[#allocation2 + $0x14] sm:$0x1]  ;;  %1264 = vmatpush.bf16.msra.mxu0 %v7604_v23  ;;  %v689_v13 = vsel %vm8405_vm7, %v681_v52, %v688_v62  ;;  %v7636_v15 = vld [vmem:[#allocation7 + $0xf8] sm:$0xff]  ;;  %v8502_v18 = vld [vmem:[#allocation7 + $0xa0] sm:$0xff]  ;;  %v576_v20 = vshll.u32 %v8466_v44, 16  ;;  %v8512_v37 = vpack.c.bf16 %v8494_v10, %v8494_v10 }
  0x5c   : > { %790 = vst [vmem:[#allocation2 + $0x10] sm:$0xf] %v570_v30  ;;  %v864_v46 = vld [vmem:[#allocation2] sm:$0xf]  ;;  %v792_v49 = vsel %vm8372_vm3, %v571_v25, %v791_v43  ;;  %v8473_v57 = vrot.slane %v923_v41, 5  ;;  %v929_v58 = vrot.slane %v927_v42, 4  ;;  %1431 = vmatpush.bf16.msra.mxu1 %v7596_v24  ;;  %7790 = vmatpush.bf16.msra.mxu3 %v7596_v24 }
  0x5d   : > { %789 = vst [vmem:[#allocation2 + $0xc] sm:$0xf] %v788_v38  ;;  %v900_v54 = vld [vmem:[#allocation2 + $0x8] sm:$0x1]  ;;  %v914_v55 = vshrl.u32 %v864_v46, 16  ;;  %v917_v56 = vshll.u32 %v864_v46, 16  ;;  %7794 = vmatpush.bf16.msra.mxu2 %v8482_v0 }
  0x5e   : > { %v933_v61 = vshll.u32 %v900_v54, 16  ;;  %793 = vst [vmem:[#allocation2 + $0x14] sm:$0x1] %v792_v49  ;;  %v930_v7 = vor.u32 %v929_v58, %v8473_v57  ;;  %v7585_v8 = vld [vmem:[#allocation2] sm:$0xff]  ;;  %v8507_v25 = vrot.slane %v573_v9, 7  ;;  %v7635_v33 = vld [vmem:[#allocation7 + $0xf0] sm:$0xff] }
  0x5f   : > { %v916_v3 = vrot.slane %v914_v55, 4  ;;  %v919_v6 = vrot.slane %v917_v56, 5  ;;  %10217 = vst [vmem:[#allocation29_spill] sm:$0xff] %v8494_v10  ;;  %1265 = vmatpush.bf16.msra.mxu0 %v7603_v45  ;;  %v7592_v26 = vld [vmem:[#allocation2 + $0x54] sm:$0xff]  ;;  %v581_v35 = vshrl.u32 %v8489_v2, 16  ;;  %v8517_v43 = vld [vmem:[#allocation7 + $0x98] sm:$0xff] }
  0x60   : > { %10218 = vst [vmem:[#allocation30_spill] sm:$0xff] %v8497_v11  ;;  %v935_v12 = vrot.slane %v933_v61, 5  ;;  %v931_v22 = vrot.slane %v930_v7, 4  ;;  %1432 = vmatpush.bf16.msra.mxu1 %v7595_v59  ;;  %7791 = vmatpush.bf16.msra.mxu3 %v7595_v59  ;;  %v405_v49 = vld [vmem:[#allocation2 + $0x6c] sm:$0x1]  ;;  %v578_v56 = vor.u32 %v576_v20, %v8507_v25  ;;  %v579_v59 = vrot.slane %v8507_v25, 4 }
  0x61   : > { %v836_v14 = vld [vmem:[#allocation2 + $0x60] sm:$0xf]  ;;  %v920_v21 = vor.u32 %v919_v6, %v916_v3  ;;  %839 = vst [vmem:[#allocation2 + $0x64] sm:$0xf] %v689_v13  ;;  %7795 = vmatpush.bf16.msra.mxu2 %v8502_v18  ;;  %v583_v62 = vrot.slane %v581_v35, 7  ;;  %v406_v3 = vsel %vm8372_vm3, 0, %v405_v49 }
  0x62   : > { %v837_v24 = vsel %vm8415_vm8, %v680_v51, %v836_v14  ;;  %v936_v39 = vsel %vm8477_vm11, %v931_v22, %v935_v12  ;;  %386 = vst [vmem:[#allocation2 + $0x18] sm:$0x1] %v385_v29  ;;  %v8541_v6 = vld [vmem:[%s8369_s8 + $0x30] sm:$0xff]  ;;  %v692_v12 = vshrl.u32 %v8512_v37, 16  ;;  %v387_v20 = vld [vmem:[#allocation2 + $0x24] sm:$0x1] }
  0x63   : > { %v867_v23 = vld [vmem:[#allocation2 + $0x10] sm:$0xf]  ;;  %v921_v38 = vrot.slane %v920_v21, 4  ;;  %1692 = vmatpush.bf16.msrb.mxu0 %v8399_v28  ;;  %838 = vst [vmem:[#allocation2 + $0x60] sm:$0xf] %v837_v24  ;;  %v1171_v44 = vunpack.c.l.b16 %v936_v39  ;;  %v8528_v28 = vpack.c.bf16 %v8497_v11, %v8497_v11  ;;  %1433 = vmatmul.bf16.vlgmr.msra.gmra.mxu1 %v7585_v8  ;;  %v588_v14 = vrot.slane %v583_v62, 4 }
  0x64   : > { %v866_v30 = vld [vmem:[#allocation2 + $0xc] sm:$0xf]  ;;  %v947_v31 = vshll.u32 %v867_v23, 16  ;;  %v951_v32 = vshrl.u32 %v867_v23, 16  ;;  %1917 = vmatpush.bf16.msrb.mxu3 %v7636_v15  ;;  %424 = vst [vmem:[#allocation2 + $0x20] sm:$0x1] %v423_v1  ;;  %v518_v25 = vpack.c.bf16 %v8541_v6, %v8541_v6 }
  0x65   : > { %v938_v41 = vshrl.u32 %v866_v30, 16  ;;  %v941_v42 = vshll.u32 %v866_v30, 16  ;;  %v926_v51 = vsel %vm8477_vm11, %v921_v38, %v8473_v57  ;;  %v901_v52 = vld [vmem:[#allocation2 + $0x14] sm:$0x1]  ;;  %1468 = vmatmul.bf16.vlgmr.msra.gmra.mxu3 %v7592_v26  ;;  %v584_v57 = vshll.u32 %v8489_v2, 16  ;;  %10219 = vst [vmem:[#allocation31_spill] sm:$0xff] %v8541_v6  ;;  %7796 = vmatpush.bf16.msra.mxu2 %v8517_v43 }
  0x66   : > { %v8519_v45 = vrot.slane %v947_v31, 5  ;;  %v953_v46 = vrot.slane %v951_v32, 4  ;;  %v1170_v58 = vunpack.c.l.b16 %v926_v51  ;;  %v957_v29 = vshll.u32 %v901_v52, 16  ;;  %v7634_v9 = vld [vmem:[#allocation7 + $0xe8] sm:$0xff]  ;;  %407 = vst [vmem:[#allocation2 + $0x6c] sm:$0x1] %v406_v3 }
  0x67   : > { %v940_v54 = vrot.slane %v938_v41, 4  ;;  %v943_v55 = vrot.slane %v941_v42, 5  ;;  %1693 = vmatpush.bf16.msrb.mxu0 %v8462_v40  ;;  %v586_v13 = vor.u32 %v584_v57, %v583_v62  ;;  %v695_v2 = vshll.u32 %v8512_v37, 16  ;;  %v8546_v15 = vld [vmem:[#allocation7 + $0x90] sm:$0xff]  ;;  %v425_v24 = vld [vmem:[#allocation2 + $0x2c] sm:$0x1] }
  0x68   : > { %v954_v19 = vor.u32 %v953_v46, %v8519_v45  ;;  %v1190_v1 = vpack.c.b16 %v1171_v44, %v1170_v58  ;;  %v959_v8 = vrot.slane %v957_v29, 5  ;;  %1918 = vmatpush.bf16.msrb.mxu3 %v7635_v33  ;;  %v694_v21 = vrot.slane %v692_v12, 7  ;;  %v8550_v23 = vld [vmem:[%s8369_s8 + $0x38] sm:$0xff]  ;;  %v7633_v31 = vld [vmem:[#allocation7 + $0xe0] sm:$0xff]  ;;  %v8562_v37 = vld [vmem:[#allocation7 + $0x88] sm:$0xff]  ;;  %s9675_s1 = scalar_lea.vmem [#allocation10], %s8366_s5 }
  0x69   : > { %v944_v61 = vor.u32 %v943_v55, %v940_v54  ;;  %v700_v22 = vshrl.u32 %v8528_v28, 16  ;;  %10220 = vst [vmem:[#allocation32_spill] sm:$0xff] %v8550_v23  ;;  %v587_v32 = vsel %vm8405_vm7, %v579_v59, %v586_v13  ;;  %v794_v33 = vld [vmem:[#allocation2 + $0x18] sm:$0xf]  ;;  %v703_v35 = vshll.u32 %v8528_v28, 16  ;;  %7797 = vmatpush.bf16.msra.mxu2 %v8546_v15  ;;  %v8579_v28 = vld [vmem:[%s8369_s8 + $0x40] sm:$0xff] }
  0x6a   : > { %v955_v7 = vrot.slane %v954_v19, 4  ;;  %1266 = vmatmul.bf16.vlgmr.msra.gmra.mxu0 %v1190_v1  ;;  %v795_v38 = vsel %vm8415_vm8, %v578_v56, %v794_v33  ;;  %797 = vst [vmem:[#allocation2 + $0x1c] sm:$0xf] %v587_v32  ;;  %v697_v41 = vor.u32 %v695_v2, %v694_v21  ;;  %v698_v42 = vrot.slane %v694_v21, 4  ;;  %v7632_v54 = vld [vmem:[#allocation7 + $0xd8] sm:$0xff]  ;;  %v7586_v56 = vld [vmem:[#allocation2 + $0xc] sm:$0xff] }
  0x6b   : > { %v945_v40 = vrot.slane %v944_v61, 4  ;;  %1694 = vmatpush.bf16.msrb.mxu0 %v8482_v0  ;;  %v798_v39 = vld [vmem:[#allocation2 + $0x20] sm:$0x1]  ;;  %v388_v44 = vsel %vm8372_vm3, 0, %v387_v20  ;;  %796 = vst [vmem:[#allocation2 + $0x18] sm:$0xf] %v795_v38  ;;  %v519_v49 = vpack.c.bf16 %v8550_v23, %v8550_v23  ;;  %v520_v61 = vpack.c.bf16 %v8579_v28, %v8579_v28 }
  0x6c   : > { %v960_v30 = vsel %vm8477_vm11, %v955_v7, %v959_v8  ;;  %1919 = vmatpush.bf16.msrb.mxu3 %v7634_v9  ;;  %v8572_v46 = vrot.slane %v700_v22, 7  ;;  %v426_v0 = vsel %vm8377_vm4, 0, %v425_v24  ;;  %10221 = vst [vmem:[#allocation33_spill] sm:$0xff] %v8579_v28  ;;  %v590_v55 = vshrl.u32 %v518_v25, 16  ;;  %v7593_v62 = vld [vmem:[#allocation2 + $0x60] sm:$0xff]  ;;  %v8592_v3 = vld [vmem:[#allocation7 + $0x80] sm:$0xff] }
  0x6d   : > { %v950_v26 = vsel %vm8477_vm11, %v945_v40, %v8519_v45  ;;  %v799_v45 = vsel %vm8372_vm3, %v588_v14, %v798_v39  ;;  %v8583_v52 = vunpack.c.l.b16 %v960_v30  ;;  %v843_v19 = vld [vmem:[#allocation2 + $0x6c] sm:$0xf]  ;;  %389 = vst [vmem:[#allocation2 + $0x24] sm:$0x1] %v388_v44  ;;  %v593_v29 = vshll.u32 %v518_v25, 16  ;;  %7798 = vmatpush.bf16.msra.mxu2 %v8562_v37  ;;  %v7631_v22 = vld [vmem:[#allocation7 + $0xd0] sm:$0xff] }
  0x6e   : > { %v8581_v51 = vunpack.c.l.b16 %v950_v26  ;;  %800 = vst [vmem:[#allocation2 + $0x20] sm:$0x1] %v799_v45  ;;  %v705_v58 = vor.u32 %v703_v35, %v8572_v46  ;;  %v598_v59 = vshrl.u32 %v519_v49, 16  ;;  %v844_v57 = vsel %vm8415_vm8, %v697_v41, %v843_v19  ;;  %v8595_v8 = vld [vmem:[%s8369_s8 + $0x48] sm:$0xff]  ;;  %v390_v12 = vld [vmem:[#allocation2 + $0x30] sm:$0x1] }
  0x6f   : > { %1695 = vmatpush.bf16.msrb.mxu0 %v8502_v18  ;;  %427 = vst [vmem:[#allocation2 + $0x2c] sm:$0x1] %v426_v0  ;;  %v592_v1 = vrot.slane %v590_v55, 7  ;;  %v601_v7 = vshll.u32 %v519_v49, 16  ;;  %v607_v40 = vshrl.u32 %v520_v61, 16  ;;  %v391_v14 = vsel %vm8372_vm3, 0, %v390_v12 }
  0x70   : > { %1920 = vmatpush.bf16.msrb.mxu3 %v7633_v31  ;;  %10222 = vst [vmem:[#allocation34_spill] sm:$0xff] %v8595_v8  ;;  %v706_v18 = vsel %vm8405_vm7, %v698_v42, %v705_v58  ;;  %v600_v9 = vrot.slane %v598_v59, 7  ;;  %v428_v2 = vld [vmem:[#allocation2 + $0x38] sm:$0x1]  ;;  %v1191_v20 = vpack.c.b16 %v8583_v52, %v8581_v51  ;;  %v610_v51 = vshll.u32 %v520_v61, 16  ;;  %p7167_p1 = scmp.ne.s32.totalorder %s8154_s30, 0 }
  0x71   : > { %845 = vst [vmem:[#allocation2 + $0x6c] sm:$0xf] %v844_v57  ;;  %v596_v13 = vrot.slane %v592_v1, 4  ;;  %v869_v21 = vld [vmem:[#allocation2 + $0x1c] sm:$0xf]  ;;  %v595_v24 = vor.u32 %v593_v29, %v592_v1  ;;  %v429_v26 = vsel %vm8377_vm4, 0, %v428_v2  ;;  %7799 = vmatpush.bf16.msra.mxu2 %v8592_v3 }
  0x72   : > { %846 = vst [vmem:[#allocation2 + $0x70] sm:$0xf] %v706_v18  ;;  %v603_v25 = vor.u32 %v601_v7, %v600_v9  ;;  %v868_v30 = vld [vmem:[#allocation2 + $0x18] sm:$0xf]  ;;  %v971_v31 = vshll.u32 %v869_v21, 16  ;;  %v975_v32 = vshrl.u32 %v869_v21, 16 }
  0x73   : > { %392 = vst [vmem:[#allocation2 + $0x30] sm:$0x1] %v391_v14  ;;  %1696 = vmatpush.bf16.msrb.mxu0 %v8517_v43  ;;  %v605_v33 = vrot.slane %v600_v9, 4  ;;  %v8607_v35 = vrot.slane %v607_v40, 7  ;;  %1438 = vmatmul.bf16.gmra.mxu1 %v7586_v56  ;;  %v962_v39 = vshrl.u32 %v868_v30, 16  ;;  %v965_v41 = vshll.u32 %v868_v30, 16 }
  0x74   : > { %1921 = vmatpush.bf16.msrb.mxu3 %v7632_v54  ;;  %v604_v42 = vsel %vm8405_vm7, %v596_v13, %v603_v25  ;;  %430 = vst [vmem:[#allocation2 + $0x38] sm:$0x1] %v429_v26  ;;  %v521_v43 = vpack.c.bf16 %v8595_v8, %v8595_v8  ;;  %v973_v44 = vrot.slane %v971_v31, 5  ;;  %v977_v45 = vrot.slane %v975_v32, 4  ;;  %v801_v49 = vld [vmem:[#allocation2 + $0x24] sm:$0xf] }
  0x75   : > { %v902_v38 = vld [vmem:[#allocation2 + $0x20] sm:$0x1]  ;;  %1473 = vmatmul.bf16.gmra.mxu3 %v7593_v62  ;;  %v964_v52 = vrot.slane %v962_v39, 4  ;;  %v967_v54 = vrot.slane %v965_v41, 5  ;;  %v802_v55 = vsel %vm8415_vm8, %v595_v24, %v801_v49  ;;  %804 = vst [vmem:[#allocation2 + $0x28] sm:$0xf] %v604_v42  ;;  %v612_v61 = vor.u32 %v610_v51, %v8607_v35 }
  0x76   : > { %v981_v0 = vshll.u32 %v902_v38, 16  ;;  %v805_v56 = vld [vmem:[#allocation2 + $0x2c] sm:$0x1]  ;;  %v978_v58 = vor.u32 %v977_v45, %v973_v44  ;;  %v7630_v29 = vld [vmem:[#allocation7 + $0xc8] sm:$0xff]  ;;  %803 = vst [vmem:[#allocation2 + $0x24] sm:$0xf] %v802_v55 }
  0x77   : > { %1697 = vmatpush.bf16.msrb.mxu0 %v8546_v15  ;;  %v806_v59 = vsel %vm8372_vm3, %v605_v33, %v805_v56  ;;  %v968_v62 = vor.u32 %v967_v54, %v964_v52  ;;  %v615_v57 = vshrl.u32 %v521_v43, 16  ;;  %v618_v1 = vshll.u32 %v521_v43, 16  ;;  %v393_v9 = vld [vmem:[#allocation2 + $0x3c] sm:$0x1]  ;;  %v7629_v40 = vld [vmem:[#allocation7 + $0xc0] sm:$0xff]  ;;  %v8623_v2 = vld [vmem:[%s8369_s8 + $0x50] sm:$0xff] }
  0x78   : > { %v983_v19 = vrot.slane %v981_v0, 5  ;;  %1922 = vmatpush.bf16.msrb.mxu3 %v7631_v22  ;;  %807 = vst [vmem:[#allocation2 + $0x2c] sm:$0x1] %v806_v59  ;;  %v979_v7 = vrot.slane %v978_v58, 4  ;;  %v613_v15 = vrot.slane %v8607_v35, 4  ;;  %v8626_v21 = vld [vmem:[%s8369_s8 + $0x58] sm:$0xff]  ;;  %v522_v32 = vpack.c.bf16 %v8623_v2, %v8623_v2 }
  0x79   : > { %v969_v12 = vrot.slane %v968_v62, 4  ;;  %v617_v13 = vrot.slane %v615_v57, 7  ;;  %10223 = vst [vmem:[#allocation35_spill] sm:$0xff] %v8623_v2  ;;  %v394_v22 = vsel %vm8372_vm3, 0, %v393_v9  ;;  %v431_v25 = vld [vmem:[#allocation2 + $0x44] sm:$0x1] }
  0x7a   : > { %1271 = vmatmul.bf16.gmra.mxu0 %v1191_v20  ;;  %v808_v18 = vld [vmem:[#allocation2 + $0x30] sm:$0xf]  ;;  %10224 = vst [vmem:[#allocation36_spill] sm:$0xff] %v8626_v21  ;;  %v984_v20 = vsel %vm8477_vm11, %v979_v7, %v983_v19  ;;  %v7587_v39 = vld [vmem:[#allocation2 + $0x18] sm:$0xff]  ;;  %v432_v56 = vsel %vm8377_vm4, 0, %v431_v25  ;;  %v624_v59 = vshrl.u32 %v522_v32, 16 }
  0x7b   : > { %v809_v14 = vsel %vm8415_vm8, %v612_v61, %v808_v18  ;;  %1698 = vmatpush.bf16.msrb.mxu0 %v8562_v37  ;;  %v812_v24 = vld [vmem:[#allocation2 + $0x38] sm:$0x1]  ;;  %v974_v26 = vsel %vm8477_vm11, %v969_v12, %v973_v44  ;;  %v620_v30 = vor.u32 %v618_v1, %v617_v13  ;;  %v622_v31 = vrot.slane %v617_v13, 4  ;;  %395 = vst [vmem:[#allocation2 + $0x3c] sm:$0x1] %v394_v22  ;;  %v7594_v61 = vld [vmem:[#allocation2 + $0x6c] sm:$0xff] }
  0x7c   : > { %1923 = vmatpush.bf16.msrb.mxu3 %v7630_v29  ;;  %810 = vst [vmem:[#allocation2 + $0x30] sm:$0xf] %v809_v14  ;;  %v1174_v33 = vunpack.c.l.b16 %v974_v26  ;;  %v1175_v35 = vunpack.c.l.b16 %v984_v20  ;;  %v871_v38 = vld [vmem:[#allocation2 + $0x28] sm:$0xf]  ;;  %v8639_v37 = vpack.c.bf16 %v8626_v21, %v8626_v21  ;;  %v626_v22 = vrot.slane %v624_v59, 7 }
  0x7d   : > { %v1487_v41 = vld [vmem:[#allocation2 + $0x24] sm:$0xe]  ;;  %v1540_v43 = vrot.slane %v871_v38, 5  ;;  %v995_v45 = vshll.u32 %v871_v38, 16  ;;  %v621_v0 = vsel %vm8405_vm7, %v613_v15, %v620_v30  ;;  %v813_v49 = vsel %vm8372_vm3, %v622_v31, %v812_v24  ;;  %433 = vst [vmem:[#allocation2 + $0x44] sm:$0x1] %v432_v56 }
  0x7e   : > { %v870_v44 = vld [vmem:[#allocation2 + $0x24] sm:$0xf]  ;;  %v6836_v52 = vrot.slane %v1487_v41, 9  ;;  %v999_v29 = vshrl.u32 %v871_v38, 16  ;;  %811 = vst [vmem:[#allocation2 + $0x34] sm:$0xf] %v621_v0  ;;  %v1192_v24 = vpack.c.b16 %v1175_v35, %v1174_v33 }
  0x7f   : > { %1699 = vmatpush.bf16.msrb.mxu0 %v8592_v3  ;;  %v903_v51 = vld [vmem:[#allocation2 + $0x2c] sm:$0x1]  ;;  %v986_v54 = vshrl.u32 %v870_v44, 16  ;;  %v989_v55 = vshll.u32 %v870_v44, 16  ;;  %v1542_v58 = vrot.slane %v1540_v43, 4  ;;  %v8656_v3 = vrot.slane %v995_v45, 5 }
  0x80   : > { %1924 = vmatpush.bf16.msrb.mxu3 %v7629_v40  ;;  %v1543_v19 = vrot.slane %v903_v51, 5  ;;  %v1541_v62 = vsel %vm8643_vm14, %v6836_v52, %v1540_v43  ;;  %814 = vst [vmem:[#allocation2 + $0x38] sm:$0x1] %v813_v49  ;;  %v1001_v18 = vrot.slane %v999_v29, 4  ;;  %v1005_v12 = vshll.u32 %v903_v51, 16  ;;  %v7654_v2 = vld [vmem:[#allocation2 + $0x24] sm:$0xff] }
  0x81   : > { %v988_v57 = vrot.slane %v986_v54, 4  ;;  %v991_v1 = vrot.slane %v989_v55, 5  ;;  %v1610_v15 = vunpack.c.l.b16 %v1541_v62  ;;  %v632_v13 = vshrl.u32 %v8639_v37, 16  ;;  %v396_v62 = vld [vmem:[#allocation2 + $0x48] sm:$0x1] }
  0x82   : > { %v1544_v7 = vsel %vm8643_vm14, %v1542_v58, %v1543_v19  ;;  %v627_v20 = vshll.u32 %v522_v32, 16  ;;  %v1002_v30 = vor.u32 %v1001_v18, %v8656_v3  ;;  %v1007_v38 = vrot.slane %v1005_v12, 5  ;;  %v815_v54 = vld [vmem:[#allocation2 + $0x3c] sm:$0xf]  ;;  %v8673_v18 = vld [vmem:[%s8369_s8 + $0x60] sm:$0xff] }
  0x83   : > { %v1611_v9 = vunpack.c.l.b16 %v1544_v7  ;;  %v1488_v40 = vld [vmem:[#allocation2 + $0x30] sm:$0xe]  ;;  %1443 = vmatmul.bf16.gmra.mxu1 %v7587_v39  ;;  %v992_v26 = vor.u32 %v991_v1, %v988_v57  ;;  %v634_v44 = vrot.slane %v632_v13, 7  ;;  %v635_v51 = vshll.u32 %v8639_v37, 16  ;;  %v434_v37 = vld [vmem:[#allocation2 + $0x50] sm:$0x1] }
  0x84   : > { %v872_v14 = vld [vmem:[#allocation2 + $0x30] sm:$0xf]  ;;  %v6837_v31 = vrot.slane %v1488_v40, 9  ;;  %v629_v39 = vor.u32 %v627_v20, %v626_v22  ;;  %v1003_v33 = vrot.slane %v1002_v30, 4  ;;  %v630_v19 = vrot.slane %v626_v22, 4  ;;  %10227 = vst [vmem:[#allocation37_spill] sm:$0xff] %v8673_v18 }
  0x85   : > { %1478 = vmatmul.bf16.gmra.mxu3 %v7594_v61  ;;  %v1627_v25 = vpack.c.b16 %v1611_v9, %v1610_v15  ;;  %v873_v41 = vld [vmem:[#allocation2 + $0x34] sm:$0xf]  ;;  %v1010_v43 = vshrl.u32 %v872_v14, 16  ;;  %v1013_v49 = vshll.u32 %v872_v14, 16  ;;  %v993_v32 = vrot.slane %v992_v26, 4  ;;  %v8676_v9 = vld [vmem:[%s8369_s8 + $0x68] sm:$0xff] }
  0x86   : > { %v1547_v0 = vrot.slane %v873_v41, 5  ;;  %v639_v52 = vrot.slane %v634_v44, 4  ;;  %v1019_v58 = vshll.u32 %v873_v41, 16  ;;  %v819_v29 = vld [vmem:[#allocation2 + $0x44] sm:$0x1]  ;;  %v1023_v61 = vshrl.u32 %v873_v41, 16 }
  0x87   : > { %1715 = vmatmul.bf16.vlgmr.msra.gmra.mxu2 %v1627_v25  ;;  %v8662_v45 = vld [vmem:[#allocation2 + $0x38] sm:$0x1]  ;;  %v1012_v59 = vrot.slane %v1010_v43, 4  ;;  %v1015_v1 = vrot.slane %v1013_v49, 5  ;;  %v637_v7 = vor.u32 %v635_v51, %v634_v44  ;;  %v816_v15 = vsel %vm8415_vm8, %v629_v39, %v815_v54  ;;  %10228 = vst [vmem:[#allocation38_spill] sm:$0xff] %v8676_v9  ;;  %v7619_v44 = vld [vmem:[#allocation2 + $0xc] sm:$0xff] }
  0x88   : > { %v1550_v35 = vrot.slane %v8662_v45, 5  ;;  %v1548_v55 = vsel %vm8643_vm14, %v6837_v31, %v1547_v0  ;;  %v1549_v56 = vrot.slane %v1547_v0, 4  ;;  %v998_v12 = vsel %vm8477_vm11, %v993_v32, %v8656_v3  ;;  %817 = vst [vmem:[#allocation2 + $0x3c] sm:$0xf] %v816_v15  ;;  %v2970_v11 = vld [vmem:[#allocation2 + $0x1c] sm:$0xf] }
  0x89   : > { %v1008_v40 = vsel %vm8477_vm11, %v1003_v33, %v1007_v38  ;;  %v1612_v13 = vunpack.c.l.b16 %v1548_v55  ;;  %v820_v14 = vsel %vm8372_vm3, %v639_v52, %v819_v29  ;;  %v8685_v22 = vrot.slane %v1019_v58, 5  ;;  %v7588_v38 = vld [vmem:[#allocation2 + $0x24] sm:$0xff] }
  0x8a   : > { %1276 = vmatmul.bf16.gmra.mxu0 %v1192_v24  ;;  %v1551_v57 = vsel %vm8643_vm14, %v1549_v56, %v1550_v35  ;;  %v638_v20 = vsel %vm8405_vm7, %v630_v19, %v637_v7  ;;  %821 = vst [vmem:[#allocation2 + $0x44] sm:$0x1] %v820_v14  ;;  %v397_v24 = vsel %vm8372_vm3, 0, %v396_v62  ;;  %v435_v3 = vsel %vm8377_vm4, 0, %v434_v37 }
  0x8b   : > { %v1613_v25 = vunpack.c.l.b16 %v1551_v57  ;;  %v1025_v26 = vrot.slane %v1023_v61, 4  ;;  %818 = vst [vmem:[#allocation2 + $0x40] sm:$0xf] %v638_v20  ;;  %v524_v30 = vpack.c.bf16 %v8673_v18, %v8673_v18  ;;  %v525_v31 = vpack.c.bf16 %v8676_v9, %v8676_v9 }
  0x8c   : > { %398 = vst [vmem:[#allocation2 + $0x48] sm:$0x1] %v397_v24  ;;  %v1176_v41 = vunpack.c.l.b16 %v998_v12  ;;  %v1177_v43 = vunpack.c.l.b16 %v1008_v40  ;;  %v1016_v39 = vor.u32 %v1015_v1, %v1012_v59  ;;  %v1029_v51 = vshll.u32 %v8662_v45, 16 }
  0x8d   : > { %436 = vst [vmem:[#allocation2 + $0x50] sm:$0x1] %v435_v3  ;;  %v641_v0 = vshrl.u32 %v524_v30, 16  ;;  %v649_v49 = vshrl.u32 %v525_v31, 16  ;;  %v644_v32 = vshll.u32 %v524_v30, 16  ;;  %v652_v33 = vshll.u32 %v525_v31, 16 }
  0x8e   : > { %v1628_v35 = vpack.c.b16 %v1613_v25, %v1612_v13  ;;  %v1026_v52 = vor.u32 %v1025_v26, %v8685_v22  ;;  %v1193_v56 = vpack.c.b16 %v1177_v43, %v1176_v41  ;;  %v1017_v59 = vrot.slane %v1016_v39, 4  ;;  %v437_v30 = vld [vmem:[#allocation2 + $0x5c] sm:$0x1] }
  0x8f   : > { %v643_v54 = vrot.slane %v641_v0, 7  ;;  %v651_v55 = vrot.slane %v649_v49, 7  ;;  %v1489_v19 = vld [vmem:[#allocation2 + $0x3c] sm:$0xe]  ;;  %v1031_v57 = vrot.slane %v1029_v51, 5  ;;  %v438_v43 = vsel %vm8377_vm4, 0, %v437_v30 }
  0x90   : > { %v1027_v45 = vrot.slane %v1026_v52, 4  ;;  %v6838_v7 = vrot.slane %v1489_v19, 9  ;;  %v874_v24 = vld [vmem:[#allocation2 + $0x3c] sm:$0xf]  ;;  %v1022_v26 = vsel %vm8477_vm11, %v1017_v59, %v8685_v22  ;;  %439 = vst [vmem:[#allocation2 + $0x5c] sm:$0x1] %v438_v43 }
  0x91   : > { %v8699_v58 = vld [vmem:[#allocation2 + $0x44] sm:$0x1]  ;;  %v646_v61 = vor.u32 %v644_v32, %v643_v54  ;;  %v647_v62 = vrot.slane %v643_v54, 4  ;;  %v654_v37 = vor.u32 %v652_v33, %v651_v55  ;;  %v656_v40 = vrot.slane %v651_v55, 4  ;;  %v7589_v52 = vld [vmem:[#allocation2 + $0x30] sm:$0xff]  ;;  %v7620_v54 = vld [vmem:[#allocation2 + $0x18] sm:$0xff] }
  0x92   : > { %v875_v29 = vld [vmem:[#allocation2 + $0x40] sm:$0xf]  ;;  %v1557_v15 = vrot.slane %v8699_v58, 5  ;;  %v1032_v31 = vsel %vm8477_vm11, %v1027_v45, %v1031_v57  ;;  %v1037_v0 = vshll.u32 %v874_v24, 16  ;;  %v673_v32 = vrot.slane %v8419_v50, 4 }
  0x93   : > { %1448 = vmatmul.bf16.gmra.mxu1 %v7588_v38  ;;  %v1554_v1 = vrot.slane %v875_v29, 5  ;;  %v655_v12 = vsel %vm8405_vm7, %v647_v62, %v654_v37  ;;  %v822_v13 = vld [vmem:[#allocation2 + $0x48] sm:$0xf]  ;;  %v1043_v49 = vshll.u32 %v875_v29, 16  ;;  %v1047_v39 = vshrl.u32 %v875_v29, 16 }
  0x94   : > { %825 = vst [vmem:[#allocation2 + $0x4c] sm:$0xf] %v655_v12  ;;  %v826_v20 = vld [vmem:[#allocation2 + $0x50] sm:$0x1]  ;;  %v823_v3 = vsel %vm8415_vm8, %v646_v61, %v822_v13  ;;  %v1178_v33 = vunpack.c.l.b16 %v1022_v26  ;;  %v440_v30 = vld [vmem:[#allocation2 + $0x68] sm:$0x1] }
  0x95   : > { %1925 = vmatmul.bf16.vlgmr.msrb.gmra.mxu3 %v7619_v44  ;;  %v1556_v14 = vrot.slane %v1554_v1, 4  ;;  %v827_v25 = vsel %vm8372_vm3, %v656_v40, %v826_v20  ;;  %824 = vst [vmem:[#allocation2 + $0x48] sm:$0xf] %v823_v3  ;;  %v1555_v38 = vsel %vm8643_vm14, %v6838_v7, %v1554_v1  ;;  %v1034_v44 = vshrl.u32 %v874_v24, 16 }
  0x96   : > { %828 = vst [vmem:[#allocation2 + $0x50] sm:$0x1] %v827_v25  ;;  %v1614_v22 = vunpack.c.l.b16 %v1555_v38  ;;  %v1045_v19 = vrot.slane %v1043_v49, 5  ;;  %v1049_v61 = vrot.slane %v1047_v39, 4  ;;  %v1053_v7 = vshll.u32 %v8699_v58, 16 }
  0x97   : > { %1720 = vmatmul.bf16.gmra.mxu2 %v1628_v35  ;;  %v1558_v41 = vsel %vm8643_vm14, %v1556_v14, %v1557_v15  ;;  %v1179_v35 = vunpack.c.l.b16 %v1032_v31  ;;  %v1036_v55 = vrot.slane %v1034_v44, 4  ;;  %v833_v57 = vld [vmem:[#allocation2 + $0x5c] sm:$0x1] }
  0x98   : > { %v1615_v51 = vunpack.c.l.b16 %v1558_v41  ;;  %v1050_v1 = vor.u32 %v1049_v61, %v1045_v19  ;;  %v834_v12 = vsel %vm8372_vm3, %v673_v32, %v833_v57  ;;  %v1055_v3 = vrot.slane %v1053_v7, 5  ;;  %v1491_v57 = vld [vmem:[#allocation2 + $0x54] sm:$0xe] }
  0x99   : > { %v1194_v59 = vpack.c.b16 %v1179_v35, %v1178_v33  ;;  %835 = vst [vmem:[#allocation2 + $0x5c] sm:$0x1] %v834_v12  ;;  %v7621_v35 = vld [vmem:[#allocation2 + $0x24] sm:$0xff]  ;;  %v6840_v12 = vrot.slane %v1491_v57, 9 }
  0x9a   : > { %1281 = vmatmul.bf16.gmra.mxu0 %v1193_v56  ;;  %v1039_v56 = vrot.slane %v1037_v0, 5  ;;  %v1629_v37 = vpack.c.b16 %v1615_v51, %v1614_v22  ;;  %v1051_v24 = vrot.slane %v1050_v1, 4  ;;  %v441_v22 = vsel %vm8377_vm4, 0, %v440_v30  ;;  %v7590_v51 = vld [vmem:[#allocation2 + $0x3c] sm:$0xff] }
  0x9b   : > { %v877_v62 = vld [vmem:[#allocation2 + $0x4c] sm:$0xf]  ;;  %442 = vst [vmem:[#allocation2 + $0x68] sm:$0x1] %v441_v22 }
  0x9c   : > { %v1561_v45 = vrot.slane %v877_v62, 5  ;;  %v1040_v29 = vor.u32 %v1039_v56, %v1036_v55  ;;  %v1490_v15 = vld [vmem:[#allocation2 + $0x48] sm:$0xe]  ;;  %v1056_v38 = vsel %vm8477_vm11, %v1051_v24, %v1055_v3  ;;  %v1067_v44 = vshll.u32 %v877_v62, 16 }
  0x9d   : > { %v906_v50 = vld [vmem:[#allocation2 + $0x50] sm:$0x1]  ;;  %v6839_v40 = vrot.slane %v1490_v15, 9  ;;  %v876_v25 = vld [vmem:[#allocation2 + $0x48] sm:$0xf]  ;;  %v1071_v0 = vshrl.u32 %v877_v62, 16  ;;  %v1181_v33 = vunpack.c.l.b16 %v1056_v38 }
  0x9e   : > { %v1563_v13 = vrot.slane %v1561_v45, 4  ;;  %v1564_v14 = vrot.slane %v906_v50, 5  ;;  %v1041_v20 = vrot.slane %v1040_v29, 4  ;;  %v1058_v41 = vshrl.u32 %v876_v25, 16 }
  0x9f   : > { %v1562_v26 = vsel %vm8643_vm14, %v6839_v40, %v1561_v45  ;;  %v1061_v43 = vshll.u32 %v876_v25, 16  ;;  %v1069_v56 = vrot.slane %v1067_v44, 5  ;;  %v1077_v7 = vshll.u32 %v906_v50, 16 }
  0xa0   : > { %v1565_v58 = vsel %vm8643_vm14, %v1563_v13, %v1564_v14  ;;  %v1046_v31 = vsel %vm8477_vm11, %v1041_v20, %v1045_v19  ;;  %v1616_v49 = vunpack.c.l.b16 %v1562_v26  ;;  %v1073_v19 = vrot.slane %v1071_v0, 4  ;;  %v907_v45 = vld [vmem:[#allocation2 + $0x5c] sm:$0x1]  ;;  %v878_v14 = vld [vmem:[#allocation2 + $0x54] sm:$0xf] }
  0xa1   : > { %v1617_v39 = vunpack.c.l.b16 %v1565_v58  ;;  %v1180_v32 = vunpack.c.l.b16 %v1046_v31  ;;  %v1063_v55 = vrot.slane %v1061_v43, 5  ;;  %v1571_v13 = vrot.slane %v907_v45, 5  ;;  %v443_v58 = vld [vmem:[#allocation2 + $0x74] sm:$0x1] }
  0xa2   : > { %v1074_v1 = vor.u32 %v1073_v19, %v1069_v56  ;;  %v840_v15 = vld [vmem:[#allocation2 + $0x68] sm:$0x1]  ;;  %v1079_v3 = vrot.slane %v1077_v7, 5  ;;  %v1082_v25 = vshrl.u32 %v878_v14, 16  ;;  %v1085_v26 = vshll.u32 %v878_v14, 16 }
  0xa3   : > { %1453 = vmatmul.bf16.gmra.mxu1 %v7589_v52  ;;  %v879_v52 = vld [vmem:[#allocation2 + $0x58] sm:$0xf]  ;;  %v1630_v61 = vpack.c.b16 %v1617_v39, %v1616_v49  ;;  %v707_v19 = vrot.slane %v8572_v46, 4 }
  0xa4   : > { %v1568_v62 = vrot.slane %v879_v52, 5  ;;  %v1075_v24 = vrot.slane %v1074_v1, 4  ;;  %v1091_v31 = vshll.u32 %v879_v52, 16  ;;  %v1095_v38 = vshrl.u32 %v879_v52, 16  ;;  %v7622_v52 = vld [vmem:[#allocation2 + $0x30] sm:$0xff] }
  0xa5   : > { %1930 = vmatmul.bf16.gmra.mxu3 %v7620_v54  ;;  %v1060_v54 = vrot.slane %v1058_v41, 4  ;;  %v444_v41 = vsel %vm8377_vm4, 0, %v443_v58  ;;  %v1084_v39 = vrot.slane %v1082_v25, 4  ;;  %v1087_v22 = vrot.slane %v1085_v26, 5  ;;  %v1492_v1 = vld [vmem:[#allocation2 + $0x60] sm:$0xe] }
  0xa6   : > { %v1570_v40 = vrot.slane %v1568_v62, 4  ;;  %v1569_v50 = vsel %vm8643_vm14, %v6840_v12, %v1568_v62  ;;  %v1080_v44 = vsel %vm8477_vm11, %v1075_v24, %v1079_v3  ;;  %445 = vst [vmem:[#allocation2 + $0x74] sm:$0x1] %v444_v41  ;;  %v6841_v46 = vrot.slane %v1492_v1, 9 }
  0xa7   : > { %1725 = vmatmul.bf16.gmra.mxu2 %v1629_v37  ;;  %v690_v37 = vrot.slane %v8470_v53, 4  ;;  %v1064_v29 = vor.u32 %v1063_v55, %v1060_v54  ;;  %v1618_v0 = vunpack.c.l.b16 %v1569_v50  ;;  %v1183_v54 = vunpack.c.l.b16 %v1080_v44  ;;  %v881_v55 = vld [vmem:[#allocation2 + $0x64] sm:$0xf]  ;;  %v7623_v44 = vld [vmem:[#allocation2 + $0x3c] sm:$0xff] }
  0xa8   : > { %v1572_v30 = vsel %vm8643_vm14, %v1570_v40, %v1571_v13  ;;  %v1115_v50 = vshll.u32 %v881_v55, 16 }
  0xa9   : > { %v841_v20 = vsel %vm8372_vm3, %v690_v37, %v840_v15  ;;  %v1065_v53 = vrot.slane %v1064_v29, 4  ;;  %v1619_v49 = vunpack.c.l.b16 %v1572_v30  ;;  %v1088_v37 = vor.u32 %v1087_v22, %v1084_v39 }
  0xaa   : > { %1286 = vmatmul.bf16.gmra.mxu0 %v1194_v59  ;;  %v1195_v59 = vpack.c.b16 %v1181_v33, %v1180_v32  ;;  %842 = vst [vmem:[#allocation2 + $0x68] sm:$0x1] %v841_v20  ;;  %v1093_v32 = vrot.slane %v1091_v31, 5  ;;  %v1097_v33 = vrot.slane %v1095_v38, 4  ;;  %v1119_v30 = vshrl.u32 %v881_v55, 16 }
  0xab   : > { %v1070_v43 = vsel %vm8477_vm11, %v1065_v53, %v1069_v56  ;;  %v1101_v56 = vshll.u32 %v907_v45, 16  ;;  %v1089_v12 = vrot.slane %v1088_v37, 4  ;;  %v880_v45 = vld [vmem:[#allocation2 + $0x60] sm:$0xf]  ;;  %v1117_v39 = vrot.slane %v1115_v50, 5 }
  0xac   : > { %v1098_v62 = vor.u32 %v1097_v33, %v1093_v32  ;;  %v1106_v26 = vshrl.u32 %v880_v45, 16  ;;  %v1109_v58 = vshll.u32 %v880_v45, 16  ;;  %v1121_v22 = vrot.slane %v1119_v30, 4  ;;  %v1493_v37 = vld [vmem:[#allocation2 + $0x6c] sm:$0xe] }
  0xad   : > { %v847_v7 = vld [vmem:[#allocation2 + $0x74] sm:$0x1]  ;;  %v1103_v40 = vrot.slane %v1101_v56, 5  ;;  %v1094_v53 = vsel %vm8477_vm11, %v1089_v12, %v1093_v32 }
  0xae   : > { %v848_v15 = vsel %vm8372_vm3, %v707_v19, %v847_v7  ;;  %v1099_v13 = vrot.slane %v1098_v62, 4  ;;  %v1184_v41 = vunpack.c.l.b16 %v1094_v53  ;;  %v882_v7 = vld [vmem:[#allocation2 + $0x6c] sm:$0xf] }
  0xaf   : > { %849 = vst [vmem:[#allocation2 + $0x74] sm:$0x1] %v848_v15 }
  0xb0   : > { %v1104_v24 = vsel %vm8477_vm11, %v1099_v13, %v1103_v40  ;;  %v1130_v13 = vshrl.u32 %v882_v7, 16 }
  0xb1   : > { %v908_v29 = vld [vmem:[#allocation2 + $0x68] sm:$0x1] }
  0xb2   : > { %v1578_v20 = vrot.slane %v908_v29, 5  ;;  %v1125_v19 = vshll.u32 %v908_v29, 16 }
  0xb3   : > { %1458 = vmatmul.bf16.gmra.mxu1 %v7590_v51  ;;  %v7591_v51 = vld [vmem:[#allocation2 + $0x48] sm:$0xff] }
  0xb4   : > { %v1127_v1 = vrot.slane %v1125_v19, 5 }
  0xb5   : > { %1935 = vmatmul.bf16.gmra.mxu3 %v7621_v35  ;;  %v1182_v35 = vunpack.c.l.b16 %v1070_v43  ;;  %v1185_v43 = vunpack.c.l.b16 %v1104_v24 }
  0xb7   : > { %1730 = vmatmul.bf16.gmra.mxu2 %v1630_v61  ;;  %v1631_v61 = vpack.c.b16 %v1619_v49, %v1618_v0  ;;  %v1196_v57 = vpack.c.b16 %v1183_v54, %v1182_v35  ;;  %v1108_v0 = vrot.slane %v1106_v26, 4  ;;  %v1111_v49 = vrot.slane %v1109_v58, 5  ;;  %v7624_v26 = vld [vmem:[#allocation2 + $0x48] sm:$0xff] }
  0xb8   : > { %v1197_v35 = vpack.c.b16 %v1185_v43, %v1184_v41  ;;  %v1132_v58 = vrot.slane %v1130_v13, 4  ;;  %v7670_v13 = vld [vmem:[#allocation7 + $0x1b8] sm:$0xff] }
  0xb9   : > { %v1112_v54 = vor.u32 %v1111_v49, %v1108_v0  ;;  %2890 = vmatpush.bf16.msrb.mxu2 %v7670_v13 }
  0xba   : > { %1291 = vmatmul.bf16.gmra.mxu0 %v1195_v59  ;;  %v1575_v59 = vrot.slane %v881_v55, 5  ;;  %v6842_v55 = vrot.slane %v1493_v37, 9  ;;  %v7643_v37 = vld [vmem:[#allocation7 + $0x130] sm:$0xff] }
  0xbc   : > { %v1577_v14 = vrot.slane %v1575_v59, 4  ;;  %v1576_v3 = vsel %vm8643_vm14, %v6841_v46, %v1575_v59  ;;  %v1113_v59 = vrot.slane %v1112_v54, 4  ;;  %v1133_v46 = vshll.u32 %v882_v7, 16 }
  0xbd   : > { %v1620_v31 = vunpack.c.l.b16 %v1576_v3 }
  0xbe   : > { %v1579_v25 = vsel %vm8643_vm14, %v1577_v14, %v1578_v20  ;;  %v1118_v29 = vsel %vm8477_vm11, %v1113_v59, %v1117_v39  ;;  %v1135_v50 = vrot.slane %v1133_v46, 5  ;;  %v371_v46 = vld [vmem:[%s8369_s8 + $0xa0] sm:$0xff] }
  0xbf   : > { %v1621_v38 = vunpack.c.l.b16 %v1579_v25  ;;  %v1186_v3 = vunpack.c.l.b16 %v1118_v29  ;;  %v7936_v29 = vld [vmem:[#allocation2 + $0x4] sm:$0xf] }
  0xc1   : > { %v1632_v32 = vpack.c.b16 %v1621_v38, %v1620_v31 }
  0xc3   : > { %1463 = vmatmul.bf16.gmra.mxu1 %v7591_v51  ;;  %v883_v51 = vld [vmem:[#allocation2 + $0x70] sm:$0xf] }
  0xc4   : > { %v1582_v33 = vrot.slane %v883_v51, 5  ;;  %v1139_v14 = vshll.u32 %v883_v51, 16  ;;  %v1143_v20 = vshrl.u32 %v883_v51, 16 }
  0xc5   : > { %1940 = vmatmul.bf16.gmra.mxu3 %v7622_v52  ;;  %v1122_v52 = vor.u32 %v1121_v22, %v1117_v39 }
  0xc6   : > { %v1584_v56 = vrot.slane %v1582_v33, 4  ;;  %v1583_v15 = vsel %vm8643_vm14, %v6842_v55, %v1582_v33  ;;  %v1141_v30 = vrot.slane %v1139_v14, 5  ;;  %v1145_v31 = vrot.slane %v1143_v20, 4  ;;  %v372_v14 = vld [vmem:[%s8369_s8 + $0xa8] sm:$0xff] }
  0xc7   : > { %1735 = vmatmul.bf16.gmra.mxu2 %v1631_v61  ;;  %v909_v61 = vld [vmem:[#allocation2 + $0x74] sm:$0x1]  ;;  %v1622_v45 = vunpack.c.l.b16 %v1583_v15  ;;  %v408_v15 = vld [vmem:[#allocation2 + $0x78] sm:$0x1] }
  0xc8   : > { %v1585_v62 = vrot.slane %v909_v61, 5  ;;  %v1146_v0 = vor.u32 %v1145_v31, %v1141_v30  ;;  %v1149_v49 = vshll.u32 %v909_v61, 16  ;;  %v409_v20 = vsel %vm8372_vm3, 0, %v408_v15  ;;  %v7669_v31 = vld [vmem:[#allocation7 + $0x1b0] sm:$0xff] }
  0xc9   : > { %410 = vst [vmem:[#allocation2 + $0x78] sm:$0x1] %v409_v20  ;;  %2891 = vmatpush.bf16.msrb.mxu2 %v7669_v31 }
  0xca   : > { %1296 = vmatmul.bf16.gmra.mxu0 %v1196_v57  ;;  %v1123_v57 = vrot.slane %v1122_v52, 4  ;;  %v1586_v12 = vsel %vm8643_vm14, %v1584_v56, %v1585_v62  ;;  %v1151_v54 = vrot.slane %v1149_v49, 5 }
  0xcb   : > { %v1623_v53 = vunpack.c.l.b16 %v1586_v12 }
  0xcc   : > { %v1128_v40 = vsel %vm8477_vm11, %v1123_v57, %v1127_v1  ;;  %v7625_v57 = vld [vmem:[#allocation2 + $0x54] sm:$0xff] }
  0xcd   : > { %v1187_v25 = vunpack.c.l.b16 %v1128_v40  ;;  %v1633_v38 = vpack.c.b16 %v1623_v53, %v1622_v45  ;;  %v7642_v1 = vld [vmem:[#allocation7 + $0x128] sm:$0xff]  ;;  %v1519_v40 = vrot.slane %v7936_v29, 5  ;;  %v1484_v53 = vld [vmem:[#allocation2] sm:$0xe] }
  0xcf   : > { %v1198_v41 = vpack.c.b16 %v1187_v25, %v1186_v3  ;;  %v533_v3 = vpack.c.bf16 %v372_v14, %v372_v14  ;;  %v7676_v14 = vld [vmem:[#allocation7 + $0x1e8] sm:$0xff] }
  0xd0   : > { %v850_v15 = vld [vmem:[#allocation2 + $0x78] sm:$0xf] }
  0xd5   : > { %1945 = vmatmul.bf16.gmra.mxu3 %v7623_v44  ;;  %v1136_v44 = vor.u32 %v1135_v50, %v1132_v58  ;;  %v7641_v50 = vld [vmem:[#allocation7 + $0x120] sm:$0xff] }
  0xd7   : > { %1740 = vmatmul.bf16.gmra.mxu2 %v1632_v32  ;;  %v7644_v32 = vld [vmem:[#allocation7 + $0x138] sm:$0xff]  ;;  %v1137_v33 = vrot.slane %v1136_v44, 4  ;;  %v1521_v44 = vrot.slane %v1519_v40, 4 }
  0xd8   : > { %2371 = vmatpush.bf16.msra.mxu0 %v7644_v32 }
  0xd9   : > { %v1142_v19 = vsel %vm8477_vm11, %v1137_v33, %v1141_v30  ;;  %v7652_v30 = vld [vmem:[#allocation7 + $0x178] sm:$0xff] }
  0xda   : > { %1301 = vmatmul.bf16.gmra.mxu0 %v1197_v35  ;;  %v1147_v35 = vrot.slane %v1146_v0, 4  ;;  %v1188_v62 = vunpack.c.l.b16 %v1142_v19  ;;  %v7937_v0 = vld [vmem:[#allocation2 + $0x8] sm:$0x1]  ;;  %2665 = vmatpush.bf16.msrb.mxu1 %v7652_v30  ;;  %v7677_v19 = vld [vmem:[#allocation7 + $0x1f0] sm:$0xff] }
  0xdb   : > { %v1522_v49 = vrot.slane %v7937_v0, 5 }
  0xdc   : > { %v1152_v61 = vsel %vm8477_vm11, %v1147_v35, %v1151_v54  ;;  %2372 = vmatpush.bf16.msra.mxu0 %v7643_v37  ;;  %v720_v54 = vshll.u32 %v533_v3, 16 }
  0xdd   : > { %v1189_v59 = vunpack.c.l.b16 %v1152_v61 }
  0xdf   : > { %v1199_v7 = vpack.c.b16 %v1189_v59, %v1188_v62 }
  0xe0   : > { %v1434_v24 = vpop.f32.mrf.mxu1  ;;  %2373 = vmatpush.bf16.msra.mxu0 %v7642_v1  ;;  %v7651_v1 = vld [vmem:[#allocation7 + $0x170] sm:$0xff] }
  0xe1   : > { %2666 = vmatpush.bf16.msrb.mxu1 %v7651_v1  ;;  %v7939_v1 = vld [vmem:[#allocation2 + $0x14] sm:$0x1] }
  0xe4   : > { %2374 = vmatpush.bf16.msra.mxu0 %v7641_v50  ;;  %v7675_v50 = vld [vmem:[#allocation7 + $0x1e0] sm:$0xff] }
  0xe5   : > { %1950 = vmatmul.bf16.gmra.mxu3 %v7624_v26  ;;  %v7678_v26 = vld [vmem:[#allocation7 + $0x1f8] sm:$0xff] }
  0xe6   : > { %3344 = vmatpush.bf16.msra.mxu3 %v7678_v26  ;;  %v7667_v26 = vld [vmem:[#allocation7 + $0x1a0] sm:$0xff] }
  0xe7   : > { %v1267_v43 = vpop.f32.mrf.mxu0  ;;  %1745 = vmatmul.bf16.gmra.mxu2 %v1633_v38 }
  0xe8   : > { %v8765_v39 = vadd.f32 %v1434_v24, %v1267_v43  ;;  %v8767_v22 = vpop.f32.mrf.mxu3  ;;  %v8769_v51 = vpop.f32.mrf.mxu1  ;;  %v532_v24 = vpack.c.bf16 %v371_v46, %v371_v46  ;;  %v6833_v43 = vrot.slane %v1484_v53, 9  ;;  %v7626_v46 = vld [vmem:[#allocation2 + $0x60] sm:$0xff] }
  0xea   : > { %1306 = vmatmul.bf16.gmra.mxu0 %v1198_v41  ;;  %v709_v38 = vshrl.u32 %v532_v24, 16  ;;  %v717_v41 = vshrl.u32 %v533_v3, 16  ;;  %v712_v33 = vshll.u32 %v532_v24, 16  ;;  %v1520_v59 = vsel %vm8643_vm14, %v6833_v43, %v1519_v40  ;;  %3345 = vmatpush.bf16.msra.mxu3 %v7677_v19  ;;  %v7640_v24 = vld [vmem:[#allocation7 + $0x118] sm:$0xff]  ;;  %v7650_v3 = vld [vmem:[#allocation7 + $0x168] sm:$0xff]  ;;  %v7649_v43 = vld [vmem:[#allocation7 + $0x160] sm:$0xff] }
  0xeb   : > { %v1604_v20 = vunpack.c.l.b16 %v1520_v59  ;;  %2375 = vmatpush.bf16.msra.mxu0 %v7640_v24  ;;  %2667 = vmatpush.bf16.msrb.mxu1 %v7650_v3  ;;  %v7627_v24 = vld [vmem:[#allocation2 + $0x6c] sm:$0xff] }
  0xec   : > { %v711_v32 = vrot.slane %v709_v38, 7  ;;  %v8789_v35 = vrot.slane %v717_v41, 7  ;;  %v7938_v38 = vld [vmem:[#allocation2 + $0x10] sm:$0xf] }
  0xed   : > { %v1526_v41 = vrot.slane %v7938_v38, 5  ;;  %v7672_v3 = vld [vmem:[#allocation7 + $0x1c8] sm:$0xff] }
  0xee   : > { %v714_v61 = vor.u32 %v712_v33, %v711_v32  ;;  %v715_v37 = vrot.slane %v711_v32, 4  ;;  %3346 = vmatpush.bf16.msra.mxu3 %v7676_v14  ;;  %v7639_v32 = vld [vmem:[#allocation7 + $0x110] sm:$0xff]  ;;  %v7646_v38 = vld [vmem:[#allocation7 + $0x148] sm:$0xff] }
  0xef   : > { %v8771_v52 = vpop.f32.mrf.mxu0  ;;  %2668 = vmatpush.bf16.msrb.mxu1 %v7649_v43  ;;  %2376 = vmatpush.bf16.msra.mxu0 %v7639_v32  ;;  %v7663_v43 = vld [vmem:[#allocation7 + $0x180] sm:$0xff] }
  0xf0   : > { %v8777_v55 = vpop.f32.mrf.mxu3  ;;  %v1439_v56 = vpop.f32.mrf.mxu1  ;;  %v851_v29 = vsel %vm8415_vm8, %v714_v61, %v850_v15  ;;  %v7648_v61 = vld [vmem:[#allocation7 + $0x158] sm:$0xff]  ;;  %v7638_v15 = vld [vmem:[#allocation7 + $0x108] sm:$0xff]  ;;  %v2450_v32 = vld [vmem:[#allocation2 + $0xc] sm:$0xe] }
  0xf1   : > { %852 = vst [vmem:[#allocation2 + $0x78] sm:$0xf] %v851_v29 }
  0xf2   : > { %3347 = vmatpush.bf16.msra.mxu3 %v7675_v50 }
  0xf3   : > { %2669 = vmatpush.bf16.msrb.mxu1 %v7648_v61  ;;  %2377 = vmatpush.bf16.msra.mxu0 %v7638_v15  ;;  %v7940_v61 = vld [vmem:[#allocation2 + $0x1c] sm:$0xf] }
  0xf5   : > { %1955 = vmatmul.bf16.gmra.mxu3 %v7625_v57  ;;  %v1523_v57 = vsel %vm8643_vm14, %v1521_v44, %v1522_v49  ;;  %v7666_v44 = vld [vmem:[#allocation7 + $0x198] sm:$0xff]  ;;  %v1485_v49 = vld [vmem:[#allocation2 + $0xc] sm:$0xe] }
  0xf6   : > { %v1605_v53 = vunpack.c.l.b16 %v1523_v57  ;;  %v6834_v59 = vrot.slane %v1485_v49, 9  ;;  %v1528_v57 = vrot.slane %v1526_v41, 4  ;;  %v8824_v49 = vld [vmem:[#allocation2 + $0x14] sm:$0x1] }
  0xf7   : > { %v1272_v12 = vpop.f32.mrf.mxu0 }
  0xf8   : > { %v8783_v45 = vadd.f32 %v1439_v56, %v1272_v12  ;;  %v8785_v25 = vpop.f32.mrf.mxu3  ;;  %v8787_v58 = vpop.f32.mrf.mxu1  ;;  %v722_v56 = vor.u32 %v720_v54, %v8789_v35  ;;  %v1624_v30 = vpack.c.b16 %v1605_v53, %v1604_v20  ;;  %v7674_v54 = vld [vmem:[#allocation7 + $0x1d8] sm:$0xff]  ;;  %v7664_v20 = vld [vmem:[#allocation7 + $0x188] sm:$0xff] }
  0xf9   : > { %3348 = vmatpush.bf16.msra.mxu3 %v7674_v54 }
  0xfa   : > { %1311 = vmatmul.bf16.gmra.mxu0 %v1199_v7  ;;  %v7668_v7 = vld [vmem:[#allocation7 + $0x1a8] sm:$0xff]  ;;  %v723_v12 = vsel %vm8405_vm7, %v715_v37, %v722_v56  ;;  %v7665_v37 = vld [vmem:[#allocation7 + $0x190] sm:$0xff] }
  0xfb   : > { %2892 = vmatpush.bf16.msrb.mxu2 %v7668_v7  ;;  %853 = vst [vmem:[#allocation2 + $0x7c] sm:$0xf] %v723_v12  ;;  %v1529_v7 = vrot.slane %v7939_v1, 5  ;;  %v7673_v12 = vld [vmem:[#allocation7 + $0x1d0] sm:$0xff]  ;;  %v6979_v1 = vrot.slane %v2450_v32, 9 }
  0xfd   : > { %v1530_v14 = vsel %vm8643_vm14, %v1528_v57, %v1529_v7  ;;  %3349 = vmatpush.bf16.msra.mxu3 %v7673_v12  ;;  %v1996_v57 = vld [vmem:[#allocation2 + $0xc] sm:$0xf]  ;;  %v2495_v7 = vrot.slane %v8824_v49, 5  ;;  %v1486_v12 = vld [vmem:[#allocation2 + $0x18] sm:$0xe] }
  0xff   : > { %v8792_v62 = vpop.f32.mrf.mxu0  ;;  %2893 = vmatpush.bf16.msrb.mxu2 %v7667_v26 }
 0x100   : > { %v8802_v13 = vpop.f32.mrf.mxu3  ;;  %v1444_v40 = vpop.f32.mrf.mxu1 }
 0x101   : > { %3350 = vmatpush.bf16.msra.mxu3 %v7672_v3 }
 0x103   : > { %2894 = vmatpush.bf16.msrb.mxu2 %v7666_v44  ;;  %v8822_v44 = vld [vmem:[#allocation2 + $0x10] sm:$0xf] }
 0x104   : > { %v2492_v54 = vrot.slane %v8822_v44, 5 }
 0x105   : > { %1960 = vmatmul.bf16.gmra.mxu3 %v7626_v46  ;;  %v1527_v46 = vsel %vm8643_vm14, %v6834_v59, %v1526_v41  ;;  %v7671_v59 = vld [vmem:[#allocation7 + $0x1c0] sm:$0xff] }
 0x106   : > { %v1606_v50 = vunpack.c.l.b16 %v1527_v46  ;;  %v7653_v46 = vld [vmem:[#allocation2 + $0x18] sm:$0xff]  ;;  %3351 = vmatpush.bf16.msra.mxu3 %v7671_v59  ;;  %v2493_v3 = vsel %vm8643_vm14, %v6979_v1, %v2492_v54  ;;  %v7686_v1 = vld [vmem:[#allocation7 + $0x238] sm:$0xff] }
 0x107   : > { %v1277_v31 = vpop.f32.mrf.mxu0  ;;  %2895 = vmatpush.bf16.msrb.mxu2 %v7665_v37  ;;  %v1533_v37 = vrot.slane %v7940_v61, 5  ;;  %v2577_v32 = vunpack.c.l.b16 %v2493_v3  ;;  %v3013_v3 = vshrl.u32 %v2970_v11, 16 }
 0x108   : > { %v8804_v0 = vadd.f32 %v1444_v40, %v1277_v31  ;;  %v8806_v33 = vpop.f32.mrf.mxu3  ;;  %v8808_v19 = vpop.f32.mrf.mxu1  ;;  %v7647_v40 = vld [vmem:[#allocation7 + $0x150] sm:$0xff]  ;;  %v7637_v31 = vld [vmem:[#allocation7 + $0x100] sm:$0xff] }
 0x109   : > { %10230 = vst [vmem:[#allocation40_spill] sm:$0xff] %v8808_v19  ;;  %2670 = vmatpush.bf16.msrb.mxu1 %v7647_v40  ;;  %2378 = vmatpush.bf16.msra.mxu0 %v7637_v31  ;;  %v7645_v40 = vld [vmem:[#allocation7 + $0x140] sm:$0xff]  ;;  %v2494_v31 = vrot.slane %v2492_v54, 4 }
 0x10a   : > { %10229 = vst [vmem:[#allocation39_spill] sm:$0xff] %v8804_v0  ;;  %1700 = vmatmul.bf16.vlgmr.msrb.gmra.mxu0 %v1624_v30  ;;  %v8810_v56 = vpop.f32.mrf.mxu2  ;;  %v1607_v30 = vunpack.c.l.b16 %v1530_v14 }
 0x10b   : > { %2896 = vmatpush.bf16.msrb.mxu2 %v7664_v20  ;;  %v2969_v20 = vld [vmem:[#allocation2 + $0x18] sm:$0xf]  ;;  %v2496_v59 = vsel %vm8643_vm14, %v2494_v31, %v2495_v7 }
 0x10c   : > { %v1625_v15 = vpack.c.b16 %v1607_v30, %v1606_v50  ;;  %v6835_v50 = vrot.slane %v1486_v12, 9  ;;  %v7941_v30 = vld [vmem:[#allocation2 + $0x20] sm:$0x1]  ;;  %v3000_v54 = vshrl.u32 %v2969_v20, 16  ;;  %v3009_v12 = vshll.u32 %v2970_v11, 16 }
 0x10d   : > { %2671 = vmatpush.bf16.msrb.mxu1 %v7646_v38  ;;  %v2027_v38 = vshrl.u32 %v1996_v57, 16  ;;  %v1536_v63 = vrot.slane %v7941_v30, 5  ;;  %3638 = vmatpush.bf16.msrb.mxu0 %v7686_v1  ;;  %v2971_v11 = vld [vmem:[#allocation2 + $0x20] sm:$0x1] }
 0x10e   : > { %v1534_v7 = vsel %vm8643_vm14, %v6835_v50, %v1533_v37  ;;  %v3002_v31 = vrot.slane %v3000_v54, 4  ;;  %v3019_v54 = vshll.u32 %v2971_v11, 16 }
 0x10f   : > { %v8812_v29 = vpop.f32.mrf.mxu0  ;;  %2897 = vmatpush.bf16.msrb.mxu2 %v7663_v43  ;;  %v2030_v43 = vshll.u32 %v1996_v57, 16  ;;  %v3003_v57 = vshll.u32 %v2969_v20, 16  ;;  %v2029_v17 = vrot.slane %v2027_v38, 4  ;;  %v2040_v20 = vshrl.u32 %v8822_v44, 16 }
 0x110   : > { %10231 = vst [vmem:[#allocation41_spill] sm:$0xff] %v8812_v29  ;;  %v8818_v53 = vpop.f32.mrf.mxu3  ;;  %v1449_v26 = vpop.f32.mrf.mxu1  ;;  %v8849_v38 = vrot.slane %v3009_v12, 5  ;;  %v3021_v11 = vrot.slane %v3019_v54, 5 }
 0x111   : > { %2672 = vmatpush.bf16.msrb.mxu1 %v7645_v40  ;;  %v2032_v30 = vrot.slane %v2030_v43, 5  ;;  %v3015_v43 = vrot.slane %v3013_v3, 4  ;;  %v2042_v16 = vrot.slane %v2040_v20, 4  ;;  %v1999_v3 = vld [vmem:[#allocation2 + $0x18] sm:$0xf] }
 0x112   : > { %v8820_v41 = vpop.f32.mrf.mxu2  ;;  %2898 = vmatmul.bf16.vlgmr.msrb.gmra.mxu2 %v7653_v46  ;;  %v2578_v46 = vunpack.c.l.b16 %v2496_v59  ;;  %v2054_v23 = vshll.u32 %v1999_v3, 16 }
 0x113   : > { %v3016_v9 = vor.u32 %v3015_v43, %v8849_v38  ;;  %v2973_v43 = vld [vmem:[#allocation2 + $0x28] sm:$0xf] }
 0x114   : > { %v2597_v40 = vpack.c.b16 %v2578_v46, %v2577_v32  ;;  %v2033_v32 = vor.u32 %v2032_v30, %v2029_v17  ;;  %v2046_v17 = vshll.u32 %v8824_v49, 16  ;;  %v2451_v30 = vld [vmem:[#allocation2 + $0x18] sm:$0xe]  ;;  %v2051_v49 = vshrl.u32 %v1999_v3, 16 }
 0x115   : > { %1965 = vmatmul.bf16.gmra.mxu3 %v7627_v24  ;;  %v1535_v24 = vrot.slane %v1533_v37, 4  ;;  %v1608_v37 = vunpack.c.l.b16 %v1534_v7  ;;  %v6980_v21 = vrot.slane %v2451_v30, 9  ;;  %v3017_v28 = vrot.slane %v3016_v9, 4 }
 0x116   : > { %2673 = vmatmul.bf16.vlgmr.msrb.gmra.mxu1 %v2597_v40  ;;  %v8858_v18 = vrot.slane %v2033_v32, 4  ;;  %v3037_v54 = vshrl.u32 %v2973_v43, 16 }
 0x117   : > { %v1282_v14 = vpop.f32.mrf.mxu0 }
 0x118   : > { %v1450_v61 = vadd.f32 %v1449_v26, %v1282_v14  ;;  %v8830_v10 = vpop.f32.mrf.mxu3  ;;  %v8837_v26 = vpop.f32.mrf.mxu1 }
 0x119   : > { %10232 = vst [vmem:[#allocation42_spill] sm:$0xff] %v8830_v10 }
 0x11a   : > { %v8835_v47 = vadd.f32 %v8810_v56, %v1450_v61  ;;  %1705 = vmatmul.bf16.gmra.mxu0 %v1625_v15  ;;  %v8839_v14 = vpop.f32.mrf.mxu2  ;;  %v1537_v56 = vsel %vm8643_vm14, %v1535_v24, %v1536_v63  ;;  %v2036_v15 = vshll.u32 %v8822_v44, 16  ;;  %v3005_v61 = vrot.slane %v3003_v57, 5  ;;  %v7628_v63 = vld [vmem:[#allocation2 + $0x78] sm:$0xff] }
 0x11b   : > { %v1609_v50 = vunpack.c.l.b16 %v1537_v56  ;;  %v2000_v57 = vld [vmem:[#allocation2 + $0x1c] sm:$0xf]  ;;  %v8861_v56 = vld [vmem:[#allocation2 + $0x20] sm:$0x1] }
 0x11c   : > { %v8853_v24 = vrot.slane %v2036_v15, 5  ;;  %v3006_v44 = vor.u32 %v3005_v61, %v3002_v31  ;;  %v2499_v12 = vrot.slane %v2000_v57, 5  ;;  %v2972_v15 = vld [vmem:[#allocation2 + $0x24] sm:$0xf]  ;;  %v2502_v32 = vrot.slane %v8861_v56, 5 }
 0x11d   : > { %v1626_v7 = vpack.c.b16 %v1609_v50, %v1608_v37  ;;  %v3024_v30 = vshrl.u32 %v2972_v15, 16  ;;  %v3027_v6 = vshll.u32 %v2972_v15, 16  ;;  %v3022_v15 = vsel %vm8477_vm11, %v3017_v28, %v3021_v11 }
 0x11e   : > { %v2501_v20 = vrot.slane %v2499_v12, 4  ;;  %v2043_v31 = vor.u32 %v2042_v16, %v8853_v24  ;;  %v3007_v61 = vrot.slane %v3006_v44, 4  ;;  %v2500_v37 = vsel %vm8643_vm14, %v6980_v21, %v2499_v12 }
 0x11f   : > { %v8847_v59 = vpop.f32.mrf.mxu0  ;;  %v3033_v44 = vshll.u32 %v2973_v43, 16  ;;  %v2579_v34 = vunpack.c.l.b16 %v2500_v37  ;;  %v2064_v43 = vshrl.u32 %v2000_v57, 16  ;;  %v2056_v37 = vrot.slane %v2054_v23, 5 }
 0x120   : > { %v8851_v1 = vpop.f32.mrf.mxu3  ;;  %v1454_v46 = vpop.f32.mrf.mxu1  ;;  %v2503_v16 = vsel %vm8643_vm14, %v2501_v20, %v2502_v32  ;;  %v2044_v21 = vrot.slane %v2043_v31, 4  ;;  %v2060_v20 = vshll.u32 %v2000_v57, 16  ;;  %v2974_v31 = vld [vmem:[#allocation2 + $0x2c] sm:$0x1]  ;;  %v2039_v28 = vsel %vm8477_vm11, %v8858_v18, %v8853_v24  ;;  %v2002_v18 = vld [vmem:[#allocation2 + $0x24] sm:$0xf] }
 0x121   : > { %10233 = vst [vmem:[#allocation43_spill] sm:$0xff] %v8851_v1  ;;  %v2580_v27 = vunpack.c.l.b16 %v2503_v16  ;;  %v3039_v16 = vrot.slane %v3037_v54, 4  ;;  %v2070_v57 = vshll.u32 %v8861_v56, 16  ;;  %v2003_v24 = vld [vmem:[#allocation2 + $0x28] sm:$0xf] }
 0x122   : > { %v8855_v40 = vpop.f32.mrf.mxu2  ;;  %2903 = vmatmul.bf16.gmra.mxu2 %v7654_v2  ;;  %v3012_v2 = vsel %vm8477_vm11, %v3007_v61, %v8849_v38  ;;  %v3257_v38 = vunpack.c.l.b16 %v3022_v15  ;;  %v2976_v1 = vld [vmem:[#allocation2 + $0x34] sm:$0xf]  ;;  %v2084_v19 = vshll.u32 %v2003_v24, 16 }
 0x123   : > { %v2598_v32 = vpack.c.b16 %v2580_v27, %v2579_v34  ;;  %v8893_v34 = vrot.slane %v2060_v20, 5 }
 0x125   : > { %1970 = vmatmul.bf16.gmra.mxu3 %v7628_v63 }
 0x126   : > { %2678 = vmatmul.bf16.gmra.mxu1 %v2598_v32 }
 0x127   : > { %v1287_v8 = vpop.f32.mrf.mxu0 }
 0x128   : > { %v1455_v50 = vadd.f32 %v1454_v46, %v1287_v8  ;;  %v8869_v63 = vpop.f32.mrf.mxu3  ;;  %v8874_v3 = vpop.f32.mrf.mxu1  ;;  %v2048_v8 = vrot.slane %v2046_v17, 5  ;;  %v7685_v46 = vld [vmem:[#allocation7 + $0x230] sm:$0xff]  ;;  %v8883_v17 = vrot.slane %v3033_v44, 5 }
 0x129   : > { %10234 = vst [vmem:[#allocation44_spill] sm:$0xff] %v8869_v63  ;;  %3639 = vmatpush.bf16.msrb.mxu0 %v7685_v46  ;;  %v3256_v63 = vunpack.c.l.b16 %v3012_v2  ;;  %v2283_v2 = vunpack.c.l.b16 %v2039_v28 }
 0x12a   : > { %v8872_v9 = vadd.f32 %v8839_v14, %v1455_v50  ;;  %1710 = vmatmul.bf16.gmra.mxu0 %v1626_v7  ;;  %v8879_v12 = vpop.f32.mrf.mxu2  ;;  %v2053_v14 = vrot.slane %v2051_v49, 4  ;;  %v3026_v7 = vrot.slane %v3024_v30, 4  ;;  %v3029_v50 = vrot.slane %v3027_v6, 5 }
 0x12b   : > { %v2049_v27 = vsel %vm8477_vm11, %v2044_v21, %v2048_v8  ;;  %v2066_v6 = vrot.slane %v2064_v43, 4  ;;  %v3043_v49 = vshll.u32 %v2974_v31, 16  ;;  %v3040_v44 = vor.u32 %v3039_v16, %v8883_v17  ;;  %v2975_v31 = vld [vmem:[#allocation2 + $0x30] sm:$0xf] }
 0x12c   : > { %v2057_v23 = vor.u32 %v2056_v37, %v2053_v14  ;;  %v3030_v11 = vor.u32 %v3029_v50, %v3026_v7  ;;  %v2284_v46 = vunpack.c.l.b16 %v2049_v27  ;;  %v3276_v15 = vpack.c.b16 %v3257_v38, %v3256_v63  ;;  %v2452_v37 = vld [vmem:[#allocation2 + $0x24] sm:$0xe]  ;;  %v7655_v63 = vld [vmem:[#allocation2 + $0x30] sm:$0xff]  ;;  %v2004_v38 = vld [vmem:[#allocation2 + $0x2c] sm:$0x1] }
 0x12d   : > { %v2067_v21 = vor.u32 %v2066_v6, %v8893_v34  ;;  %v2506_v8 = vrot.slane %v2003_v24, 5  ;;  %v2072_v43 = vrot.slane %v2070_v57, 5  ;;  %v3045_v14 = vrot.slane %v3043_v49, 5 }
 0x12e   : > { %v2058_v20 = vrot.slane %v2057_v23, 4  ;;  %v3031_v56 = vrot.slane %v3030_v11, 4  ;;  %v3041_v7 = vrot.slane %v3040_v44, 4  ;;  %v2075_v50 = vshrl.u32 %v2002_v18, 16 }
 0x12f   : > { %v8885_v61 = vpop.f32.mrf.mxu0  ;;  %v6981_v16 = vrot.slane %v2452_v37, 9  ;;  %v2303_v28 = vpack.c.b16 %v2284_v46, %v2283_v2  ;;  %v2078_v27 = vshll.u32 %v2002_v18, 16  ;;  %v2088_v6 = vshrl.u32 %v2003_v24, 16 }
 0x130   : > { %v8896_v30 = vpop.f32.mrf.mxu3  ;;  %v1459_v54 = vpop.f32.mrf.mxu1  ;;  %v2509_v57 = vrot.slane %v2004_v38, 5  ;;  %v3048_v49 = vshrl.u32 %v2975_v31, 16  ;;  %v3051_v44 = vshll.u32 %v2975_v31, 16  ;;  %v2068_v2 = vrot.slane %v2067_v21, 4 }
 0x131   : > { %10235 = vst [vmem:[#allocation45_spill] sm:$0xff] %v8896_v30  ;;  %v2508_v30 = vrot.slane %v2506_v8, 4  ;;  %v2507_v23 = vsel %vm8643_vm14, %v6981_v16, %v2506_v8  ;;  %v3057_v46 = vshll.u32 %v2976_v1, 16  ;;  %v2077_v21 = vrot.slane %v2075_v50, 4 }
 0x132   : > { %v8899_v32 = vpop.f32.mrf.mxu2  ;;  %2908 = vmatmul.bf16.gmra.mxu2 %v7655_v63  ;;  %v2581_v29 = vunpack.c.l.b16 %v2507_v23  ;;  %v8918_v16 = vrot.slane %v2084_v19, 5  ;;  %v3050_v63 = vrot.slane %v3048_v49, 4  ;;  %v2073_v19 = vsel %vm8477_vm11, %v2068_v2, %v2072_v43 }
 0x133   : > { %v2510_v18 = vsel %vm8643_vm14, %v2508_v30, %v2509_v57  ;;  %v2090_v30 = vrot.slane %v2088_v6, 4  ;;  %v8920_v57 = vrot.slane %v3057_v46, 5 }
 0x134   : > { %v2582_v24 = vunpack.c.l.b16 %v2510_v18 }
 0x135   : > { %3352 = vmatmul.bf16.vlgmr.msra.gmra.mxu3 %v3276_v15  ;;  %v3061_v15 = vshrl.u32 %v2976_v1, 16  ;;  %v2080_v1 = vrot.slane %v2078_v27, 5  ;;  %v2091_v27 = vor.u32 %v2090_v30, %v8918_v16  ;;  %v2453_v30 = vld [vmem:[#allocation2 + $0x30] sm:$0xe] }
 0x136   : > { %v2599_v23 = vpack.c.b16 %v2582_v24, %v2581_v29  ;;  %v2094_v29 = vshll.u32 %v2004_v38, 16  ;;  %v7684_v24 = vld [vmem:[#allocation7 + $0x228] sm:$0xff] }
 0x137   : > { %v1292_v10 = vpop.f32.mrf.mxu0  ;;  %v2081_v50 = vor.u32 %v2080_v1, %v2077_v21  ;;  %3640 = vmatpush.bf16.msrb.mxu0 %v7684_v24 }
 0x138   : > { %v1460_v11 = vadd.f32 %v1459_v54, %v1292_v10  ;;  %v8904_v37 = vpop.f32.mrf.mxu3  ;;  %v3036_v10 = vsel %vm8477_vm11, %v3031_v56, %v8883_v17  ;;  %v3046_v54 = vsel %vm8477_vm11, %v3041_v7, %v3045_v14  ;;  %v1461_v8 = vpop.f32.mrf.mxu1  ;;  %2683 = vmatmul.bf16.gmra.mxu1 %v2599_v23  ;;  %v2063_v7 = vsel %vm8477_vm11, %v2058_v20, %v8893_v34  ;;  %v2005_v34 = vld [vmem:[#allocation2 + $0x30] sm:$0xf]  ;;  %v2006_v20 = vld [vmem:[#allocation2 + $0x34] sm:$0xf] }
 0x139   : > { %10236 = vst [vmem:[#allocation46_spill] sm:$0xff] %v8904_v37  ;;  %v3258_v17 = vunpack.c.l.b16 %v3036_v10  ;;  %v3259_v56 = vunpack.c.l.b16 %v3046_v54  ;;  %v2285_v18 = vunpack.c.l.b16 %v2063_v7  ;;  %v2286_v10 = vunpack.c.l.b16 %v2073_v19  ;;  %v7656_v7 = vld [vmem:[#allocation2 + $0x3c] sm:$0xff]  ;;  %v2007_v19 = vld [vmem:[#allocation2 + $0x38] sm:$0x1] }
 0x13a   : > { %v8909_v0 = vadd.f32 %v8879_v12, %v1460_v11  ;;  %2379 = vmatmul.bf16.vlgmr.msra.gmra.mxu0 %v2303_v28  ;;  %v8916_v31 = vpop.f32.mrf.mxu2  ;;  %v3053_v12 = vrot.slane %v3051_v44, 5  ;;  %v2977_v28 = vld [vmem:[#allocation2 + $0x38] sm:$0x1]  ;;  %v3063_v11 = vrot.slane %v3061_v15, 4  ;;  %v8935_v43 = vrot.slane %v2081_v50, 4 }
 0x13b   : > { %v3067_v44 = vshll.u32 %v2977_v28, 16  ;;  %v3277_v54 = vpack.c.b16 %v3259_v56, %v3258_v17  ;;  %v2513_v2 = vrot.slane %v2006_v20, 5  ;;  %v8939_v38 = vrot.slane %v2094_v29, 5 }
 0x13c   : > { %v3054_v49 = vor.u32 %v3053_v12, %v3050_v63  ;;  %v3064_v15 = vor.u32 %v3063_v11, %v8920_v57  ;;  %v2099_v28 = vshrl.u32 %v2005_v34, 16  ;;  %v2978_v11 = vld [vmem:[#allocation2 + $0x3c] sm:$0xf]  ;;  %v6982_v17 = vrot.slane %v2453_v30, 9 }
 0x13d   : > { %v3069_v1 = vrot.slane %v3067_v44, 5  ;;  %v2515_v56 = vrot.slane %v2513_v2, 4  ;;  %v2102_v50 = vshll.u32 %v2005_v34, 16  ;;  %v2108_v37 = vshll.u32 %v2006_v20, 16 }
 0x13e   : > { %v3055_v21 = vrot.slane %v3054_v49, 4  ;;  %v3065_v12 = vrot.slane %v3064_v15, 4  ;;  %v2112_v29 = vshrl.u32 %v2006_v20, 16  ;;  %v2514_v49 = vsel %vm8643_vm14, %v6982_v17, %v2513_v2 }
 0x13f   : > { %v1294_v14 = vpop.f32.mrf.mxu0  ;;  %v2516_v44 = vrot.slane %v2007_v19, 5  ;;  %v3072_v15 = vshrl.u32 %v2978_v11, 16  ;;  %v3075_v36 = vshll.u32 %v2978_v11, 16  ;;  %v2583_v48 = vunpack.c.l.b16 %v2514_v49 }
 0x140   : > { %v8928_v6 = vadd.f32 %v1461_v8, %v1294_v14  ;;  %v8930_v46 = vpop.f32.mrf.mxu3  ;;  %v8937_v8 = vrot.slane %v2091_v27, 4  ;;  %v1464_v63 = vpop.f32.mrf.mxu1  ;;  %v2304_v14 = vpack.c.b16 %v2286_v10, %v2285_v18  ;;  %v3060_v18 = vsel %vm8477_vm11, %v3055_v21, %v8920_v57 }
 0x141   : > { %10237 = vst [vmem:[#allocation47_spill] sm:$0xff] %v8930_v46  ;;  %v2979_v46 = vld [vmem:[#allocation2 + $0x40] sm:$0xf]  ;;  %v2517_v34 = vsel %vm8643_vm14, %v2515_v56, %v2516_v44  ;;  %v2101_v17 = vrot.slane %v2099_v28, 4  ;;  %v2114_v57 = vrot.slane %v2112_v29, 4  ;;  %v3074_v21 = vrot.slane %v3072_v15, 4 }
 0x142   : > { %v8933_v23 = vpop.f32.mrf.mxu2  ;;  %2913 = vmatmul.bf16.gmra.mxu2 %v7656_v7  ;;  %v3081_v10 = vshll.u32 %v2979_v46, 16  ;;  %v2584_v11 = vunpack.c.l.b16 %v2517_v34  ;;  %v2104_v7 = vrot.slane %v2102_v50, 5  ;;  %v3077_v56 = vrot.slane %v3075_v36, 5  ;;  %v2008_v34 = vld [vmem:[#allocation2 + $0x3c] sm:$0xf] }
 0x143   : > { %v2097_v36 = vsel %vm8477_vm11, %v8937_v8, %v8939_v38  ;;  %v2009_v38 = vld [vmem:[#allocation2 + $0x40] sm:$0xf] }
 0x144   : > { %v8960_v44 = vrot.slane %v3081_v10, 5  ;;  %v3078_v28 = vor.u32 %v3077_v56, %v3074_v21  ;;  %v2126_v21 = vshll.u32 %v2008_v34, 16  ;;  %v2981_v56 = vld [vmem:[#allocation2 + $0x48] sm:$0xf] }
 0x145   : > { %3357 = vmatmul.bf16.gmra.mxu3 %v3277_v54  ;;  %v3085_v54 = vshrl.u32 %v2979_v46, 16  ;;  %v1452_v46 = vadd.f32 %v8837_v26, %v8847_v59 }
 0x147   : > { %v1297_v27 = vpop.f32.mrf.mxu0  ;;  %v1758_v59 = vadd.f32 %v8820_v41, %v1452_v46  ;;  %v3079_v41 = vrot.slane %v3078_v28, 4  ;;  %v2123_v46 = vshrl.u32 %v2008_v34, 16 }
 0x148   : > { %v1465_v24 = vadd.f32 %v1464_v63, %v1297_v27  ;;  %v1941_v30 = vpop.f32.mrf.mxu3  ;;  %v3070_v63 = vsel %vm8477_vm11, %v3065_v12, %v3069_v1  ;;  %v8956_v27 = vrot.slane %v2108_v37, 5  ;;  %v2087_v37 = vsel %vm8477_vm11, %v8935_v43, %v8918_v16 }
 0x149   : > { %v8952_v2 = vadd.f32 %v1941_v30, %v8835_v47  ;;  %v3087_v47 = vrot.slane %v3085_v54, 4  ;;  %v3261_v30 = vunpack.c.l.b16 %v3070_v63  ;;  %v2118_v12 = vshll.u32 %v2007_v19, 16  ;;  %v7683_v54 = vld [vmem:[#allocation7 + $0x220] sm:$0xff] }
 0x14a   : > { %v8949_v20 = vadd.f32 %v8916_v31, %v1465_v24  ;;  %2384 = vmatmul.bf16.gmra.mxu0 %v2304_v14  ;;  %v2600_v31 = vpack.c.b16 %v2584_v11, %v2583_v48  ;;  %v1736_v49 = vpop.f32.mrf.mxu2  ;;  %v2980_v14 = vld [vmem:[#allocation2 + $0x44] sm:$0x1]  ;;  %v3260_v24 = vunpack.c.l.b16 %v3060_v18  ;;  %v2105_v48 = vor.u32 %v2104_v7, %v2101_v17  ;;  %v2454_v17 = vld [vmem:[#allocation2 + $0x3c] sm:$0xe] }
 0x14b   : > { %v2115_v26 = vor.u32 %v2114_v57, %v8956_v27  ;;  %v3091_v50 = vshll.u32 %v2980_v14, 16  ;;  %v3088_v15 = vor.u32 %v3087_v47, %v8960_v44  ;;  %v2287_v10 = vunpack.c.l.b16 %v2087_v37  ;;  %3641 = vmatpush.bf16.msrb.mxu0 %v7683_v54  ;;  %v7657_v47 = vld [vmem:[#allocation2 + $0x48] sm:$0xff] }
 0x14c   : > { %2688 = vmatmul.bf16.gmra.mxu1 %v2600_v31  ;;  %v2288_v16 = vunpack.c.l.b16 %v2097_v36  ;;  %v3278_v43 = vpack.c.b16 %v3261_v30, %v3260_v24  ;;  %v8977_v63 = vrot.slane %v2105_v48, 4  ;;  %v8981_v11 = vrot.slane %v2118_v12, 5  ;;  %v2010_v24 = vld [vmem:[#allocation2 + $0x44] sm:$0x1]  ;;  %v2982_v37 = vld [vmem:[#allocation2 + $0x4c] sm:$0xf] }
 0x14d   : > { %v8979_v8 = vrot.slane %v2115_v26, 4  ;;  %v3093_v19 = vrot.slane %v3091_v50, 5  ;;  %v2520_v7 = vrot.slane %v2009_v38, 5  ;;  %v3089_v57 = vrot.slane %v3088_v15, 4 }
 0x14e   : > { %v6983_v31 = vrot.slane %v2454_v17, 9  ;;  %v2305_v14 = vpack.c.b16 %v2288_v16, %v2287_v10  ;;  %v2132_v30 = vshll.u32 %v2009_v38, 16  ;;  %v2136_v26 = vshrl.u32 %v2009_v38, 16 }
 0x14f   : > { %v8962_v1 = vpop.f32.mrf.mxu0  ;;  %v2522_v12 = vrot.slane %v2520_v7, 4  ;;  %v2523_v28 = vrot.slane %v2010_v24, 5  ;;  %v3099_v15 = vshll.u32 %v2981_v56, 16  ;;  %v3105_v54 = vshll.u32 %v2982_v37, 16 }
 0x150   : > { %v1943_v29 = vpop.f32.mrf.mxu3  ;;  %v3109_v34 = vshrl.u32 %v2982_v37, 16 }
 0x151   : > { %v8975_v18 = vadd.f32 %v1943_v29, %v1758_v59  ;;  %v2521_v59 = vsel %vm8643_vm14, %v6983_v31, %v2520_v7  ;;  %v3096_v29 = vshrl.u32 %v2981_v56, 16  ;;  %v2524_v38 = vsel %vm8643_vm14, %v2522_v12, %v2523_v28  ;;  %v2983_v12 = vld [vmem:[#allocation2 + $0x50] sm:$0x1] }
 0x152   : > { %v8983_v48 = vpop.f32.mrf.mxu2  ;;  %2918 = vmatmul.bf16.gmra.mxu2 %v7657_v47  ;;  %v2585_v10 = vunpack.c.l.b16 %v2521_v59  ;;  %v2586_v56 = vunpack.c.l.b16 %v2524_v38  ;;  %v2125_v31 = vrot.slane %v2123_v46, 4  ;;  %v2128_v47 = vrot.slane %v2126_v21, 5 }
 0x153   : > { %v3098_v37 = vrot.slane %v3096_v29, 4  ;;  %v3101_v59 = vrot.slane %v3099_v15, 5  ;;  %v3115_v29 = vshll.u32 %v2983_v12, 16  ;;  %v7658_v12 = vld [vmem:[#allocation2 + $0x54] sm:$0xff] }
 0x155   : > { %3362 = vmatmul.bf16.gmra.mxu3 %v3278_v43  ;;  %v3084_v43 = vsel %vm8477_vm11, %v3079_v41, %v8960_v44  ;;  %v2138_v44 = vrot.slane %v2136_v26, 4  ;;  %v1457_v41 = vadd.f32 %v8874_v3, %v8885_v61  ;;  %v2121_v3 = vsel %vm8477_vm11, %v8979_v8, %v8981_v11  ;;  %v2012_v11 = vld [vmem:[#allocation2 + $0x4c] sm:$0xf] }
 0x156   : > { %v3262_v28 = vunpack.c.l.b16 %v3084_v43  ;;  %v2129_v61 = vor.u32 %v2128_v47, %v2125_v31  ;;  %v3102_v26 = vor.u32 %v3101_v59, %v3098_v37  ;;  %v2527_v31 = vrot.slane %v2012_v11, 5  ;;  %v2984_v37 = vld [vmem:[#allocation2 + $0x54] sm:$0xf] }
 0x157   : > { %v1302_v36 = vpop.f32.mrf.mxu0  ;;  %v1760_v21 = vadd.f32 %v8855_v40, %v1457_v41 }
 0x158   : > { %v1470_v50 = vadd.f32 %v8767_v22, %v1302_v36  ;;  %v1946_v16 = vpop.f32.mrf.mxu3  ;;  %v3094_v22 = vsel %vm8477_vm11, %v3089_v57, %v3093_v19  ;;  %v9000_v36 = vrot.slane %v2132_v30, 5  ;;  %v2111_v57 = vsel %vm8477_vm11, %v8977_v63, %v8956_v27 }
 0x159   : > { %v8996_v7 = vadd.f32 %v1946_v16, %v8872_v9  ;;  %v3111_v9 = vrot.slane %v3109_v34, 4  ;;  %v2142_v30 = vshll.u32 %v2010_v24, 16  ;;  %v2289_v27 = vunpack.c.l.b16 %v2111_v57  ;;  %v2011_v34 = vld [vmem:[#allocation2 + $0x48] sm:$0xf] }
 0x15a   : > { %v8993_v17 = vadd.f32 %v1736_v49, %v1470_v50  ;;  %2389 = vmatmul.bf16.gmra.mxu0 %v2305_v14  ;;  %v2601_v49 = vpack.c.b16 %v2586_v56, %v2585_v10  ;;  %v9004_v14 = vrot.slane %v3105_v54, 5  ;;  %v3263_v50 = vunpack.c.l.b16 %v3094_v22  ;;  %v1741_v10 = vpop.f32.mrf.mxu2  ;;  %v2455_v56 = vld [vmem:[#allocation2 + $0x48] sm:$0xe] }
 0x15b   : > { %v2139_v46 = vor.u32 %v2138_v44, %v9000_v36  ;;  %v2290_v63 = vunpack.c.l.b16 %v2121_v3  ;;  %v9021_v38 = vrot.slane %v2129_v61, 4  ;;  %v9025_v22 = vrot.slane %v2142_v30, 5 }
 0x15c   : > { %2693 = vmatmul.bf16.gmra.mxu1 %v2601_v49  ;;  %v3112_v16 = vor.u32 %v3111_v9, %v9004_v14  ;;  %v3279_v54 = vpack.c.b16 %v3263_v50, %v3262_v28  ;;  %v3103_v40 = vrot.slane %v3102_v26, 4  ;;  %v3117_v24 = vrot.slane %v3115_v29, 5  ;;  %v2013_v9 = vld [vmem:[#allocation2 + $0x50] sm:$0x1]  ;;  %v9027_v50 = vld [vmem:[#allocation2 + $0x58] sm:$0xf] }
 0x15d   : > { %v9023_v8 = vrot.slane %v2139_v46, 4  ;;  %v2147_v44 = vshrl.u32 %v2011_v34, 16  ;;  %v2150_v41 = vshll.u32 %v2011_v34, 16  ;;  %v6984_v59 = vrot.slane %v2455_v56, 9  ;;  %10238 = vst [vmem:[#allocation48_spill] sm:$0xff] %v9027_v50 }
 0x15e   : > { %v3113_v47 = vrot.slane %v3112_v16, 4  ;;  %v2306_v49 = vpack.c.b16 %v2290_v63, %v2289_v27  ;;  %v2156_v28 = vshll.u32 %v2012_v11, 16  ;;  %v2160_v3 = vshrl.u32 %v2012_v11, 16 }
 0x15f   : > { %v9006_v19 = vpop.f32.mrf.mxu0  ;;  %v2528_v61 = vsel %vm8643_vm14, %v6984_v59, %v2527_v31  ;;  %v2529_v46 = vrot.slane %v2527_v31, 4  ;;  %v3120_v26 = vshrl.u32 %v2984_v37, 16  ;;  %v3123_v29 = vshll.u32 %v2984_v37, 16  ;;  %v7682_v31 = vld [vmem:[#allocation7 + $0x218] sm:$0xff] }
 0x160   : > { %v1948_v15 = vpop.f32.mrf.mxu3  ;;  %v3108_v27 = vsel %vm8477_vm11, %v3103_v40, %v9004_v14  ;;  %v3129_v63 = vshll.u32 %v9027_v50, 16  ;;  %v3118_v56 = vsel %vm8477_vm11, %v3113_v47, %v3117_v24  ;;  %v2149_v14 = vrot.slane %v2147_v44, 4  ;;  %3642 = vmatpush.bf16.msrb.mxu0 %v7682_v31 }
 0x161   : > { %v9019_v43 = vadd.f32 %v1948_v15, %v1760_v21  ;;  %v2530_v21 = vrot.slane %v2013_v9, 5  ;;  %v2587_v15 = vunpack.c.l.b16 %v2528_v61  ;;  %v2152_v40 = vrot.slane %v2150_v41, 5 }
 0x162   : > { %2923 = vmatmul.bf16.gmra.mxu2 %v7658_v12  ;;  %v1743_v59 = vpop.f32.mrf.mxu2  ;;  %v9046_v12 = vrot.slane %v2156_v28, 5  ;;  %v3122_v61 = vrot.slane %v3120_v26, 4  ;;  %v2135_v24 = vsel %vm8477_vm11, %v9021_v38, %v9000_v36  ;;  %v3264_v47 = vunpack.c.l.b16 %v3108_v27 }
 0x163   : > { %v2531_v34 = vsel %vm8643_vm14, %v2529_v46, %v2530_v21  ;;  %v9048_v46 = vld [vmem:[#allocation2 + $0x5c] sm:$0x1]  ;;  %v3265_v44 = vunpack.c.l.b16 %v3118_v56  ;;  %v1762_v41 = vadd.f32 %v8899_v32, %v8928_v6  ;;  %v2153_v21 = vor.u32 %v2152_v40, %v2149_v14 }
 0x164   : > { %v2588_v37 = vunpack.c.l.b16 %v2531_v34  ;;  %v3139_v36 = vshll.u32 %v9048_v46, 16 }
 0x165   : > { %3367 = vmatmul.bf16.gmra.mxu3 %v3279_v54  ;;  %v3133_v54 = vshrl.u32 %v9027_v50, 16  ;;  %v3125_v50 = vrot.slane %v3123_v29, 5  ;;  %v2166_v29 = vshll.u32 %v2013_v9, 16  ;;  %v2987_v9 = vld [vmem:[#allocation2 + $0x60] sm:$0xf] }
 0x166   : > { %v3141_v31 = vrot.slane %v3139_v36, 5 }
 0x167   : > { %v1307_v57 = vpop.f32.mrf.mxu0 }
 0x168   : > { %v1475_v30 = vadd.f32 %v8785_v25, %v1307_v57  ;;  %v1951_v16 = vpop.f32.mrf.mxu3  ;;  %v2162_v57 = vrot.slane %v2160_v3, 4  ;;  %v2145_v3 = vsel %vm8477_vm11, %v9023_v8, %v9025_v22  ;;  %v2014_v8 = vld [vmem:[#allocation2 + $0x54] sm:$0xf]  ;;  %v9070_v22 = vrot.slane %v2153_v21, 4 }
 0x169   : > { %v9042_v25 = vadd.f32 %v1951_v16, %v8909_v0  ;;  %v3135_v0 = vrot.slane %v3133_v54, 4  ;;  %v2291_v16 = vunpack.c.l.b16 %v2135_v24  ;;  %v3280_v54 = vpack.c.b16 %v3265_v44, %v3264_v47  ;;  %v7659_v47 = vld [vmem:[#allocation2 + $0x60] sm:$0xff]  ;;  %v9078_v44 = vld [vmem:[#allocation2 + $0x5c] sm:$0x1] }
 0x16a   : > { %v9039_v11 = vadd.f32 %v1741_v10, %v1475_v30  ;;  %2394 = vmatmul.bf16.gmra.mxu0 %v2306_v49  ;;  %v2602_v10 = vpack.c.b16 %v2588_v37, %v2587_v15  ;;  %v9050_v49 = vrot.slane %v3129_v63, 5  ;;  %v2163_v30 = vor.u32 %v2162_v57, %v9046_v12  ;;  %v2456_v37 = vld [vmem:[#allocation2 + $0x54] sm:$0xe]  ;;  %v1746_v40 = vpop.f32.mrf.mxu2 }
 0x16b   : > { %v3126_v15 = vor.u32 %v3125_v50, %v3122_v61  ;;  %v2292_v63 = vunpack.c.l.b16 %v2145_v3  ;;  %v9074_v50 = vrot.slane %v2166_v29, 5  ;;  %v2171_v57 = vshrl.u32 %v2014_v8, 16 }
 0x16c   : > { %2698 = vmatmul.bf16.gmra.mxu1 %v2602_v10  ;;  %v3136_v27 = vor.u32 %v3135_v0, %v9050_v49  ;;  %v9072_v34 = vrot.slane %v2163_v30, 4  ;;  %v2174_v61 = vshll.u32 %v2014_v8, 16  ;;  %v9076_v10 = vld [vmem:[#allocation2 + $0x64] sm:$0xf]  ;;  %v6985_v0 = vrot.slane %v2456_v37, 9 }
 0x16d   : > { %v3127_v56 = vrot.slane %v3126_v15, 4  ;;  %10239 = vst [vmem:[#allocation49_spill] sm:$0xff] %v9076_v10  ;;  %v2307_v24 = vpack.c.b16 %v2292_v63, %v2291_v16  ;;  %v3144_v3 = vshrl.u32 %v2987_v9, 16  ;;  %v3147_v30 = vshll.u32 %v2987_v9, 16  ;;  %v1466_v63 = vpop.f32.mrf.mxu1 }
 0x16e   : > { %v2537_v15 = vrot.slane %v9078_v44, 5  ;;  %v3157_v16 = vshrl.u32 %v9076_v10, 16  ;;  %v2173_v9 = vrot.slane %v2171_v57, 4 }
 0x16f   : > { %v1309_v28 = vpop.f32.mrf.mxu0  ;;  %v3132_v8 = vsel %vm8477_vm11, %v3127_v56, %v9050_v49  ;;  %v3146_v49 = vrot.slane %v3144_v3, 4  ;;  %v3149_v56 = vrot.slane %v3147_v30, 5 }
 0x170   : > { %v1477_v26 = vadd.f32 %v8802_v13, %v1309_v28  ;;  %v1953_v38 = vpop.f32.mrf.mxu3  ;;  %v2015_v13 = vld [vmem:[#allocation2 + $0x58] sm:$0xf] }
 0x171   : > { %v9068_v6 = vadd.f32 %v1953_v38, %v1762_v41  ;;  %v2534_v14 = vrot.slane %v2015_v13, 5  ;;  %v2180_v41 = vshll.u32 %v2015_v13, 16  ;;  %v2184_v28 = vshrl.u32 %v2015_v13, 16 }
 0x172   : > { %v9066_v32 = vadd.f32 %v1743_v59, %v1477_v26  ;;  %v3137_v59 = vrot.slane %v3136_v27, 4  ;;  %2928 = vmatmul.bf16.gmra.mxu2 %v7659_v47  ;;  %v3153_v38 = vshll.u32 %v9076_v10, 16  ;;  %v1748_v3 = vpop.f32.mrf.mxu2 }
 0x173   : > { %v2535_v26 = vsel %vm8643_vm14, %v6985_v0, %v2534_v14  ;;  %v2536_v29 = vrot.slane %v2534_v14, 4  ;;  %v2176_v0 = vrot.slane %v2174_v61, 5  ;;  %v2186_v10 = vrot.slane %v2184_v28, 4 }
 0x174   : > { %v2589_v27 = vunpack.c.l.b16 %v2535_v26  ;;  %v3142_v13 = vsel %vm8477_vm11, %v3137_v59, %v3141_v31  ;;  %v9098_v26 = vrot.slane %v2180_v41, 5  ;;  %v1467_v31 = vadd.f32 %v1466_v63, %v8962_v1  ;;  %v9101_v59 = vld [vmem:[#allocation2 + $0x68] sm:$0x1] }
 0x175   : > { %3372 = vmatmul.bf16.gmra.mxu3 %v3280_v54  ;;  %v2538_v37 = vsel %vm8643_vm14, %v2536_v29, %v2537_v15  ;;  %v9103_v57 = vrot.slane %v3153_v38, 5  ;;  %v2159_v61 = vsel %vm8477_vm11, %v9070_v22, %v9046_v12  ;;  %v2169_v41 = vsel %vm8477_vm11, %v9072_v34, %v9074_v50  ;;  %v2990_v38 = vld [vmem:[#allocation2 + $0x6c] sm:$0xf] }
 0x176   : > { %v2590_v47 = vunpack.c.l.b16 %v2538_v37  ;;  %v2177_v1 = vor.u32 %v2176_v0, %v2173_v9  ;;  %v2187_v30 = vor.u32 %v2186_v10, %v9098_v26  ;;  %v3150_v15 = vor.u32 %v3149_v56, %v3146_v49  ;;  %v446_v10 = vld [vmem:[#allocation2 + $0x80] sm:$0x1]  ;;  %v9128_v56 = vld [vmem:[#allocation2 + $0x70] sm:$0xf] }
 0x177   : > { %v1312_v21 = vpop.f32.mrf.mxu0  ;;  %v2293_v34 = vunpack.c.l.b16 %v2159_v61  ;;  %v2294_v50 = vunpack.c.l.b16 %v2169_v41 }
 0x178   : > { %v1480_v36 = vadd.f32 %v8806_v33, %v1312_v21  ;;  %v1956_v54 = vpop.f32.mrf.mxu3  ;;  %v7681_v21 = vld [vmem:[#allocation7 + $0x210] sm:$0xff]  ;;  %v2603_v29 = vpack.c.b16 %v2590_v47, %v2589_v27  ;;  %v1764_v27 = vadd.f32 %v8933_v23, %v1467_v31  ;;  %v9124_v0 = vrot.slane %v2177_v1, 4  ;;  %v2018_v47 = vld [vmem:[#allocation2 + $0x64] sm:$0xf] }
 0x179   : > { %v9096_v14 = vadd.f32 %v1956_v54, %v8949_v20  ;;  %3643 = vmatpush.bf16.msrb.mxu0 %v7681_v21  ;;  %v3267_v20 = vunpack.c.l.b16 %v3142_v13  ;;  %v2017_v13 = vld [vmem:[#allocation2 + $0x60] sm:$0xf]  ;;  %v3168_v23 = vshrl.u32 %v2990_v38, 16  ;;  %v9126_v21 = vrot.slane %v2187_v30, 4  ;;  %v7660_v30 = vld [vmem:[#allocation2 + $0x6c] sm:$0xff] }
 0x17a   : > { %v9093_v33 = vadd.f32 %v1746_v40, %v1480_v36  ;;  %2399 = vmatmul.bf16.gmra.mxu0 %v2307_v24  ;;  %v3159_v40 = vrot.slane %v3157_v16, 4  ;;  %v3266_v24 = vunpack.c.l.b16 %v3132_v8  ;;  %v3163_v36 = vshll.u32 %v9101_v59, 16 }
 0x17b   : > { %v724_v16 = vrot.slane %v8789_v35, 4  ;;  %v2190_v8 = vshll.u32 %v9078_v44, 16  ;;  %v3171_v31 = vshll.u32 %v2990_v38, 16  ;;  %v2457_v44 = vld [vmem:[#allocation2 + $0x60] sm:$0xe]  ;;  %v2198_v61 = vshll.u32 %v2017_v13, 16 }
 0x17c   : > { %2703 = vmatmul.bf16.gmra.mxu1 %v2603_v29  ;;  %v3160_v22 = vor.u32 %v3159_v40, %v9103_v57  ;;  %v3281_v54 = vpack.c.b16 %v3267_v20, %v3266_v24  ;;  %v3165_v49 = vrot.slane %v3163_v36, 5  ;;  %v2195_v29 = vshrl.u32 %v2017_v13, 16 }
 0x17d   : > { %v2541_v24 = vrot.slane %v2018_v47, 5  ;;  %v447_v20 = vsel %vm8377_vm4, 0, %v446_v10  ;;  %v2204_v41 = vshll.u32 %v2018_v47, 16  ;;  %v2208_v1 = vshrl.u32 %v2018_v47, 16 }
 0x17e   : > { %v3161_v40 = vrot.slane %v3160_v22, 4  ;;  %448 = vst [vmem:[#allocation2 + $0x80] sm:$0x1] %v447_v20  ;;  %v3170_v36 = vrot.slane %v3168_v23, 4  ;;  %v3181_v38 = vshrl.u32 %v9128_v56, 16  ;;  %v3173_v22 = vrot.slane %v3171_v31, 5 }
 0x17f   : > { %v1314_v28 = vpop.f32.mrf.mxu0  ;;  %v2543_v10 = vrot.slane %v2541_v24, 4  ;;  %v2197_v31 = vrot.slane %v2195_v29, 4  ;;  %v2200_v20 = vrot.slane %v2198_v61, 5  ;;  %v1472_v29 = vadd.f32 %v8777_v55, %v9006_v19  ;;  %v373_v19 = vld [vmem:[%s8369_s8 + $0xb0] sm:$0xff] }
 0x180   : > { %v1482_v12 = vadd.f32 %v8818_v53, %v1314_v28  ;;  %v1958_v63 = vpop.f32.mrf.mxu3  ;;  %v3151_v53 = vrot.slane %v3150_v15, 4  ;;  %v6986_v28 = vrot.slane %v2457_v44, 9  ;;  %v2019_v15 = vld [vmem:[#allocation2 + $0x68] sm:$0x1]  ;;  %v2192_v44 = vrot.slane %v2190_v8, 5 }
 0x181   : > { %v9122_v37 = vadd.f32 %v1958_v63, %v1764_v27  ;;  %v3177_v27 = vshll.u32 %v9128_v56, 16  ;;  %v2544_v13 = vrot.slane %v2019_v15, 5  ;;  %v3166_v23 = vsel %vm8477_vm11, %v3161_v40, %v3165_v49 }
 0x182   : > { %v9120_v9 = vadd.f32 %v1748_v3, %v1482_v12  ;;  %v2308_v3 = vpack.c.b16 %v2294_v50, %v2293_v34  ;;  %v2542_v63 = vsel %vm8643_vm14, %v6986_v28, %v2541_v24  ;;  %v3156_v34 = vsel %vm8477_vm11, %v3151_v53, %v9103_v57  ;;  %2933 = vmatmul.bf16.gmra.mxu2 %v7660_v30  ;;  %v411_v57 = vld [vmem:[#allocation2 + $0x84] sm:$0x1] }
 0x183   : > { %v2591_v50 = vunpack.c.l.b16 %v2542_v63  ;;  %v2545_v24 = vsel %vm8643_vm14, %v2543_v10, %v2544_v13  ;;  %v9149_v8 = vrot.slane %v2204_v41, 5  ;;  %v2210_v28 = vrot.slane %v2208_v1, 4 }
 0x184   : > { %v3174_v53 = vor.u32 %v3173_v22, %v3170_v36  ;;  %v3179_v30 = vrot.slane %v3177_v27, 5  ;;  %v3183_v63 = vrot.slane %v3181_v38, 4  ;;  %v412_v49 = vsel %vm8372_vm3, 0, %v411_v57  ;;  %v9187_v57 = vld [vmem:[#allocation2 + $0x70] sm:$0xf] }
 0x185   : > { %3377 = vmatmul.bf16.gmra.mxu3 %v3281_v54  ;;  %v1437_v40 = vadd.f32 %v8769_v51, %v8771_v52  ;;  %v854_v41 = vld [vmem:[#allocation2 + $0x80] sm:$0x1]  ;;  %v2183_v1 = vsel %vm8477_vm11, %v9124_v0, %v9098_v26  ;;  %v3268_v36 = vunpack.c.l.b16 %v3156_v34  ;;  %v3269_v27 = vunpack.c.l.b16 %v3166_v23  ;;  %413 = vst [vmem:[#allocation2 + $0x84] sm:$0x1] %v412_v49  ;;  %v2458_v49 = vld [vmem:[#allocation2 + $0x6c] sm:$0xe] }
 0x186   : > { %v2201_v38 = vor.u32 %v2200_v20, %v2197_v31  ;;  %v2211_v51 = vor.u32 %v2210_v28, %v9149_v8  ;;  %v2214_v52 = vshll.u32 %v2019_v15, 16  ;;  %v855_v55 = vsel %vm8372_vm3, %v724_v16, %v854_v41  ;;  %v7680_v15 = vld [vmem:[#allocation7 + $0x208] sm:$0xff] }
 0x187   : > { %v1701_v12 = vpop.f32.mrf.mxu0  ;;  %v3175_v26 = vrot.slane %v3174_v53, 4  ;;  %v3184_v0 = vor.u32 %v3183_v63, %v3179_v30  ;;  %856 = vst [vmem:[#allocation2 + $0x80] sm:$0x1] %v855_v55  ;;  %v1766_v10 = vadd.f32 %v8983_v48, %v1472_v29  ;;  %v2295_v34 = vunpack.c.l.b16 %v2183_v1  ;;  %3644 = vmatpush.bf16.msrb.mxu0 %v7680_v15  ;;  %v2993_v63 = vld [vmem:[#allocation2 + $0x78] sm:$0xf] }
 0x188   : > { %v9137_v47 = vadd.f32 %v1701_v12, %v8765_v39  ;;  %v1961_v54 = vpop.f32.mrf.mxu3  ;;  %v2592_v12 = vunpack.c.l.b16 %v2545_v24  ;;  %v9178_v23 = vrot.slane %v2201_v38, 4  ;;  %v9180_v31 = vrot.slane %v2211_v51, 4  ;;  %v374_v24 = vld [vmem:[%s8369_s8 + $0xb8] sm:$0xff] }
 0x189   : > { %v9147_v39 = vadd.f32 %v1961_v54, %v8993_v17  ;;  %v9157_v17 = vld [vmem:[#allocation2 + $0x74] sm:$0x1]  ;;  %v534_v54 = vpack.c.bf16 %v373_v19, %v373_v19  ;;  %v9182_v20 = vrot.slane %v2214_v52, 5  ;;  %v3180_v48 = vsel %vm8477_vm11, %v3175_v26, %v3179_v30 }
 0x18a   : > { %2404 = vmatmul.bf16.gmra.mxu0 %v2308_v3  ;;  %v2604_v61 = vpack.c.b16 %v2592_v12, %v2591_v50  ;;  %v2193_v3 = vsel %vm8477_vm11, %v9126_v21, %v2192_v44  ;;  %v3187_v21 = vshll.u32 %v9157_v17, 16  ;;  %v3282_v50 = vpack.c.b16 %v3269_v27, %v3268_v36  ;;  %v7661_v36 = vld [vmem:[#allocation2 + $0x78] sm:$0xff]  ;;  %v9208_v52 = vld [vmem:[#allocation2 + $0x74] sm:$0x1] }
 0x18b   : > { %v2296_v35 = vunpack.c.l.b16 %v2193_v3  ;;  %v3185_v28 = vrot.slane %v3184_v0, 4  ;;  %v9191_v53 = vadd.f32 %v8787_v58, %v8792_v62  ;;  %v6987_v41 = vrot.slane %v2458_v49, 9  ;;  %v2020_v0 = vld [vmem:[#allocation2 + $0x6c] sm:$0xf] }
 0x18c   : > { %2708 = vmatmul.bf16.gmra.mxu1 %v2604_v61  ;;  %v3189_v12 = vrot.slane %v3187_v21, 5  ;;  %v9194_v61 = vld [vmem:[#allocation2 + $0x7c] sm:$0xf]  ;;  %v535_v1 = vpack.c.bf16 %v374_v24, %v374_v24  ;;  %v726_v3 = vshrl.u32 %v534_v54, 16  ;;  %v2207_v30 = vsel %vm8477_vm11, %v9178_v23, %v9149_v8 }
 0x18d   : > { %v2309_v29 = vpack.c.b16 %v2296_v35, %v2295_v34  ;;  %v2217_v58 = vsel %vm8477_vm11, %v9180_v31, %v9182_v20  ;;  %v9204_v62 = vunpack.c.l.b16 %v3180_v48  ;;  %v3192_v55 = vshrl.u32 %v2993_v63, 16  ;;  %v857_v20 = vld [vmem:[#allocation2 + $0x84] sm:$0xf] }
 0x18e   : > { %v3190_v51 = vsel %vm8477_vm11, %v3185_v28, %v3189_v12  ;;  %v729_v8 = vshll.u32 %v534_v54, 16  ;;  %v3195_v21 = vshll.u32 %v2993_v63, 16  ;;  %v2551_v15 = vrot.slane %v9208_v52, 5 }
 0x18f   : > { %v1703_v22 = vpop.f32.mrf.mxu0  ;;  %v3205_v34 = vshrl.u32 %v9194_v61, 16  ;;  %v734_v23 = vshrl.u32 %v535_v1, 16  ;;  %v737_v31 = vshll.u32 %v535_v1, 16  ;;  %v3271_v48 = vunpack.c.l.b16 %v3190_v51 }
 0x190   : > { %v9174_v13 = vadd.f32 %v1703_v22, %v1437_v40  ;;  %v1963_v44 = vpop.f32.mrf.mxu3  ;;  %v2548_v40 = vrot.slane %v9187_v57, 5  ;;  %v449_v22 = vld [vmem:[#allocation2 + $0x8c] sm:$0x1]  ;;  %v2219_v28 = vshrl.u32 %v2020_v0, 16  ;;  %v2222_v49 = vshll.u32 %v2020_v0, 16 }
 0x191   : > { %v9176_v16 = vadd.f32 %v1963_v44, %v1766_v10  ;;  %v3201_v10 = vshll.u32 %v9194_v61, 16  ;;  %v450_v24 = vsel %vm8377_vm4, 0, %v449_v22  ;;  %v3207_v51 = vrot.slane %v3205_v34, 4 }
 0x192   : > { %v2550_v27 = vrot.slane %v2548_v40, 4  ;;  %v2549_v19 = vsel %vm8643_vm14, %v6987_v41, %v2548_v40  ;;  %2938 = vmatmul.bf16.gmra.mxu2 %v7661_v36  ;;  %451 = vst [vmem:[#allocation2 + $0x8c] sm:$0x1] %v450_v24  ;;  %v2228_v40 = vshll.u32 %v9187_v57, 16  ;;  %v736_v41 = vrot.slane %v734_v23, 7 }
 0x193   : > { %v2593_v35 = vunpack.c.l.b16 %v2549_v19  ;;  %v9229_v19 = vrot.slane %v3201_v10, 5  ;;  %v2298_v0 = vunpack.c.l.b16 %v2217_v58  ;;  %v3283_v34 = vpack.c.b16 %v3271_v48, %v9204_v62 }
 0x194   : > { %v739_v22 = vor.u32 %v737_v31, %v736_v41 }
 0x195   : > { %3382 = vmatmul.bf16.gmra.mxu3 %v3282_v50  ;;  %v728_v50 = vrot.slane %v726_v3, 7  ;;  %v3194_v3 = vrot.slane %v3192_v55, 4  ;;  %v2221_v55 = vrot.slane %v2219_v28, 4  ;;  %v9246_v28 = vld [vmem:[#allocation2 + $0x7c] sm:$0xf] }
 0x197   : > { %v1706_v38 = vpop.f32.mrf.mxu0  ;;  %v731_v63 = vor.u32 %v729_v8, %v728_v50 }
 0x198   : > { %v9213_v26 = vadd.f32 %v1706_v38, %v8783_v45  ;;  %v1966_v44 = vpop.f32.mrf.mxu3  ;;  %v2552_v45 = vsel %vm8643_vm14, %v2550_v27, %v2551_v15  ;;  %v3197_v38 = vrot.slane %v3195_v21, 5  ;;  %v2297_v15 = vunpack.c.l.b16 %v2207_v30 }
 0x199   : > { %v9219_v54 = vadd.f32 %v1966_v44, %v9039_v11  ;;  %v2594_v12 = vunpack.c.l.b16 %v2552_v45  ;;  %v2232_v11 = vshrl.u32 %v9187_v57, 16  ;;  %v858_v1 = vsel %vm8415_vm8, %v731_v63, %v857_v20  ;;  %v9231_v44 = vld [vmem:[#allocation2 + $0x80] sm:$0x1]  ;;  %v861_v24 = vld [vmem:[#allocation2 + $0x8c] sm:$0x1] }
 0x19a   : > { %2409 = vmatmul.bf16.gmra.mxu0 %v2309_v29  ;;  %v732_v29 = vrot.slane %v728_v50, 4  ;;  %859 = vst [vmem:[#allocation2 + $0x84] sm:$0xf] %v858_v1  ;;  %v741_v50 = vrot.slane %v736_v41, 4  ;;  %v9239_v45 = vrot.slane %v2228_v40, 5  ;;  %v3198_v58 = vor.u32 %v3197_v38, %v3194_v3  ;;  %v7679_v38 = vld [vmem:[#allocation7 + $0x200] sm:$0xff] }
 0x19b   : > { %v2605_v36 = vpack.c.b16 %v2594_v12, %v2593_v35  ;;  %v2224_v35 = vrot.slane %v2222_v49, 5  ;;  %v2234_v31 = vrot.slane %v2232_v11, 4  ;;  %v3208_v20 = vor.u32 %v3207_v51, %v9229_v19  ;;  %v9248_v12 = vld [vmem:[#allocation2 + $0x80] sm:$0x1]  ;;  %v2459_v49 = vld [vmem:[#allocation2 + $0x78] sm:$0xe]  ;;  %3645 = vmatpush.bf16.msrb.mxu0 %v7679_v38 }
 0x19c   : > { %v740_v21 = vsel %vm8405_vm7, %v732_v29, %v739_v22  ;;  %v862_v62 = vsel %vm8372_vm3, %v741_v50, %v861_v24  ;;  %v2310_v48 = vpack.c.b16 %v2298_v0, %v2297_v15  ;;  %v2238_v29 = vshll.u32 %v9208_v52, 16  ;;  %v10242_v15 = vld [vmem:[#allocation39_spill] sm:$0xff] }
 0x19d   : > { %2713 = vmatmul.bf16.gmra.mxu1 %v2605_v36  ;;  %860 = vst [vmem:[#allocation2 + $0x88] sm:$0xf] %v740_v21  ;;  %v2225_v63 = vor.u32 %v2224_v35, %v2221_v55  ;;  %v2235_v40 = vor.u32 %v2234_v31, %v9239_v45  ;;  %v6988_v41 = vrot.slane %v2459_v49, 9  ;;  %v2558_v11 = vrot.slane %v9248_v12, 5 }
 0x19e   : > { %863 = vst [vmem:[#allocation2 + $0x8c] sm:$0x1] %v862_v62  ;;  %v3199_v3 = vrot.slane %v3198_v58, 4  ;;  %v3209_v36 = vrot.slane %v3208_v20, 4 }
 0x19f   : > { %v1708_v8 = vpop.f32.mrf.mxu0  ;;  %v2226_v50 = vrot.slane %v2225_v63, 4  ;;  %v2023_v63 = vld [vmem:[#allocation2 + $0x78] sm:$0xf] }
 0x1a0   : > { %v9234_v57 = vadd.f32 %v1708_v8, %v9191_v53  ;;  %v1968_v10 = vpop.f32.mrf.mxu3  ;;  %v3211_v53 = vshll.u32 %v9231_v44, 16  ;;  %v2243_v38 = vshrl.u32 %v2023_v63, 16 }
 0x1a1   : > { %v9242_v30 = vadd.f32 %v1968_v10, %v9066_v32  ;;  %v2555_v32 = vrot.slane %v9246_v28, 5  ;;  %v2996_v52 = vld [vmem:[#allocation2 + $0x84] sm:$0xf]  ;;  %v2236_v10 = vrot.slane %v2235_v40, 4 }
 0x1a2   : > { %v3213_v1 = vrot.slane %v3211_v53, 5  ;;  %v3204_v53 = vsel %vm8477_vm11, %v3199_v3, %v9229_v19  ;;  %v3216_v49 = vshrl.u32 %v2996_v52, 16  ;;  %v2231_v19 = vsel %vm8477_vm11, %v2226_v50, %v9239_v45 }
 0x1a3   : > { %v2557_v51 = vrot.slane %v2555_v32, 4  ;;  %v2556_v8 = vsel %vm8643_vm14, %v6988_v41, %v2555_v32  ;;  %v3219_v32 = vshll.u32 %v2996_v52, 16  ;;  %v10244_v41 = vld [vmem:[#allocation40_spill] sm:$0xff] }
 0x1a4   : > { %v7662_v55 = vld [vmem:[#allocation2 + $0x84] sm:$0xff]  ;;  %v2595_v58 = vunpack.c.l.b16 %v2556_v8  ;;  %v3214_v24 = vsel %vm8477_vm11, %v3209_v36, %v3213_v1  ;;  %v3272_v36 = vunpack.c.l.b16 %v3204_v53  ;;  %v2256_v8 = vshrl.u32 %v9246_v28, 16 }
 0x1a5   : > { %3387 = vmatmul.bf16.gmra.mxu3 %v3283_v34  ;;  %v9261_v35 = vld [vmem:[#allocation2 + $0x88] sm:$0xf]  ;;  %v2240_v34 = vrot.slane %v2238_v29, 5  ;;  %v2559_v31 = vsel %vm8643_vm14, %v2557_v51, %v2558_v11  ;;  %2943 = vmatmul.bf16.gmra.mxu2 %v7662_v55  ;;  %v3273_v1 = vunpack.c.l.b16 %v3214_v24  ;;  %v2246_v51 = vshll.u32 %v2023_v63, 16  ;;  %v9286_v45 = vld [vmem:[#allocation2 + $0x8c] sm:$0x1] }
 0x1a6   : > { %v2596_v62 = vunpack.c.l.b16 %v2559_v31  ;;  %v3225_v40 = vshll.u32 %v9261_v35, 16  ;;  %v3229_v29 = vshrl.u32 %v9261_v35, 16  ;;  %v3218_v55 = vrot.slane %v3216_v49, 4 }
 0x1a7   : > { %v1711_v22 = vpop.f32.mrf.mxu0  ;;  %v2241_v3 = vsel %vm8477_vm11, %v2236_v10, %v2240_v34  ;;  %v3221_v52 = vrot.slane %v3219_v32, 5  ;;  %v2299_v10 = vunpack.c.l.b16 %v2231_v19  ;;  %v3284_v53 = vpack.c.b16 %v3273_v1, %v3272_v36 }
 0x1a8   : > { %v9259_v0 = vadd.f32 %v1711_v22, %v10242_v15  ;;  %v1971_v21 = vpop.f32.mrf.mxu3  ;;  %v2606_v11 = vpack.c.b16 %v2596_v62, %v2595_v58  ;;  %v2252_v22 = vshll.u32 %v9246_v28, 16  ;;  %v3231_v31 = vrot.slane %v3229_v29, 4  ;;  %v10245_v29 = vld [vmem:[#allocation42_spill] sm:$0xff] }
 0x1a9   : > { %v9266_v20 = vadd.f32 %v1971_v21, %v9093_v33  ;;  %v3227_v21 = vrot.slane %v3225_v40, 5  ;;  %v2300_v34 = vunpack.c.l.b16 %v2241_v3  ;;  %v2245_v62 = vrot.slane %v2243_v38, 4 }
 0x1aa   : > { %2414 = vmatmul.bf16.gmra.mxu0 %v2310_v48  ;;  %v10243_v48 = vld [vmem:[#allocation41_spill] sm:$0xff]  ;;  %v2248_v63 = vrot.slane %v2246_v51, 5  ;;  %v2254_v28 = vrot.slane %v2252_v22, 5  ;;  %v3222_v49 = vor.u32 %v3221_v52, %v3218_v55  ;;  %v3235_v40 = vshll.u32 %v9286_v45, 16  ;;  %v10246_v52 = vld [vmem:[#allocation43_spill] sm:$0xff] }
 0x1ab   : > { %v1447_v33 = vadd.f32 %v10244_v41, %v10243_v48  ;;  %v2258_v48 = vrot.slane %v2256_v8, 4  ;;  %v3232_v32 = vor.u32 %v3231_v31, %v3227_v21  ;;  %v1976_v41 = vadd.f32 %v10245_v29, %v9137_v47  ;;  %v7942_v29 = vld [vmem:[#allocation2 + $0x1c] sm:$0xf] }
 0x1ac   : > { %v2262_v19 = vshll.u32 %v9248_v12, 16  ;;  %v3237_v38 = vrot.slane %v3235_v40, 5  ;;  %v1977_v12 = vadd.f32 %v10246_v52, %v9174_v13 }
 0x1ad   : > { %2718 = vmatmul.bf16.gmra.mxu1 %v2606_v11  ;;  %v2249_v11 = vor.u32 %v2248_v63, %v2245_v62  ;;  %v2259_v36 = vor.u32 %v2258_v48, %v2254_v28  ;;  %v3233_v1 = vrot.slane %v3232_v32, 4 }
 0x1af   : > { %v1713_v15 = vpop.f32.mrf.mxu0  ;;  %v2250_v22 = vrot.slane %v2249_v11, 4  ;;  %v2260_v8 = vrot.slane %v2259_v36, 4  ;;  %v3238_v47 = vsel %vm8477_vm11, %v3233_v1, %v3237_v38  ;;  %v3423_v11 = vld [vmem:[#allocation2 + $0x18] sm:$0xe] }
 0x1b0   : > { %v9284_v58 = vadd.f32 %v1713_v15, %v1447_v33  ;;  %v1973_v50 = vpop.f32.mrf.mxu3  ;;  %v2311_v33 = vpack.c.b16 %v2300_v34, %v2299_v10  ;;  %v2264_v15 = vrot.slane %v2262_v19, 5 }
 0x1b1   : > { %v9289_v24 = vadd.f32 %v1973_v50, %v9120_v9  ;;  %v3223_v9 = vrot.slane %v3222_v49, 4  ;;  %v3275_v50 = vunpack.c.l.b16 %v3238_v47  ;;  %v2255_v34 = vsel %vm8477_vm11, %v2250_v22, %v2254_v28  ;;  %v10247_v49 = vld [vmem:[#allocation44_spill] sm:$0xff]  ;;  %v10249_v47 = vld [vmem:[#allocation46_spill] sm:$0xff] }
 0x1b2   : > { %v2301_v63 = vunpack.c.l.b16 %v2255_v34  ;;  %v1978_v32 = vadd.f32 %v10247_v49, %v9213_v26  ;;  %v7125_v28 = vrot.slane %v3423_v11, 9  ;;  %v1980_v52 = vadd.f32 %v10249_v47, %v9259_v0  ;;  %v10250_v49 = vld [vmem:[#allocation47_spill] sm:$0xff] }
 0x1b3   : > { %v3228_v55 = vsel %vm8477_vm11, %v3223_v9, %v3227_v21  ;;  %v10248_v9 = vld [vmem:[#allocation45_spill] sm:$0xff] }
 0x1b4   : > { %v3274_v31 = vunpack.c.l.b16 %v3228_v55  ;;  %v1979_v1 = vadd.f32 %v10248_v9, %v9234_v57  ;;  %v3424_v57 = vld [vmem:[#allocation2 + $0x24] sm:$0xe] }
 0x1b5   : > { %3392 = vmatmul.bf16.gmra.mxu3 %v3284_v53  ;;  %v2265_v53 = vsel %vm8477_vm11, %v2260_v8, %v2264_v15 }
 0x1b6   : > { %v2302_v48 = vunpack.c.l.b16 %v2265_v53  ;;  %v3285_v21 = vpack.c.b16 %v3275_v50, %v3274_v31  ;;  %v7944_v50 = vld [vmem:[#allocation2 + $0x28] sm:$0xf]  ;;  %v7126_v53 = vrot.slane %v3424_v57, 9 }
 0x1b7   : > { %v2380_v3 = vpop.f32.mrf.mxu0 }
 0x1b8   : > { %v9295_v51 = vadd.f32 %v2380_v3, %v1976_v41  ;;  %v2312_v40 = vpack.c.b16 %v2302_v48, %v2301_v63  ;;  %v3465_v41 = vrot.slane %v7942_v29, 5  ;;  %v7943_v3 = vld [vmem:[#allocation2 + $0x20] sm:$0x1]  ;;  %v7945_v48 = vld [vmem:[#allocation2 + $0x2c] sm:$0x1] }
 0x1b9   : > { %v3468_v36 = vrot.slane %v7943_v3, 5  ;;  %v7946_v3 = vld [vmem:[#allocation2 + $0x34] sm:$0xf] }
 0x1ba   : > { %2419 = vmatmul.bf16.gmra.mxu0 %v2311_v33  ;;  %v3467_v19 = vrot.slane %v3465_v41, 4  ;;  %v3466_v26 = vsel %vm8643_vm14, %v7125_v28, %v3465_v41 }
 0x1bb   : > { %v3550_v15 = vunpack.c.l.b16 %v3466_v26  ;;  %v7947_v26 = vld [vmem:[#allocation2 + $0x38] sm:$0x1] }
 0x1bc   : > { %v3469_v22 = vsel %vm8643_vm14, %v3467_v19, %v3468_v36  ;;  %v3479_v36 = vrot.slane %v7946_v3, 5 }
 0x1bd   : > { %v3551_v55 = vunpack.c.l.b16 %v3469_v22  ;;  %v3482_v22 = vrot.slane %v7947_v26, 5  ;;  %v7951_v26 = vld [vmem:[#allocation2 + $0x50] sm:$0x1] }
 0x1bf   : > { %v2382_v10 = vpop.f32.mrf.mxu0 }
 0x1c0   : > { %v9307_v62 = vadd.f32 %v2382_v10, %v1977_v12  ;;  %v3570_v12 = vpack.c.b16 %v3551_v55, %v3550_v15  ;;  %v3472_v10 = vrot.slane %v7944_v50, 5 }
 0x1c2   : > { %v3474_v63 = vrot.slane %v3472_v10, 4 }
 0x1c5   : > { %3397 = vmatmul.bf16.gmra.mxu3 %v3285_v21  ;;  %v3475_v21 = vrot.slane %v7945_v48, 5 }
 0x1c7   : > { %v2385_v13 = vpop.f32.mrf.mxu0  ;;  %v3476_v0 = vsel %vm8643_vm14, %v3474_v63, %v3475_v21  ;;  %v3426_v63 = vld [vmem:[#allocation2 + $0x3c] sm:$0xe] }
 0x1c8   : > { %v9311_v33 = vadd.f32 %v2385_v13, %v1978_v32  ;;  %v1981_v32 = vadd.f32 %v10250_v49, %v9284_v58  ;;  %v3473_v13 = vsel %vm8643_vm14, %v7126_v53, %v3472_v10  ;;  %v3553_v11 = vunpack.c.l.b16 %v3476_v0  ;;  %v7948_v10 = vld [vmem:[#allocation2 + $0x40] sm:$0xf]  ;;  %v7949_v49 = vld [vmem:[#allocation2 + $0x44] sm:$0x1] }
 0x1c9   : > { %v3552_v41 = vunpack.c.l.b16 %v3473_v13  ;;  %v3486_v57 = vrot.slane %v7948_v10, 5  ;;  %v7128_v48 = vrot.slane %v3426_v63, 9  ;;  %v3428_v63 = vld [vmem:[#allocation2 + $0x54] sm:$0xe] }
 0x1ca   : > { %2424 = vmatmul.bf16.gmra.mxu0 %v2312_v40 }
 0x1cb   : > { %v3571_v28 = vpack.c.b16 %v3553_v11, %v3552_v41  ;;  %v3488_v21 = vrot.slane %v3486_v57, 4 }
 0x1cf   : > { %v2387_v38 = vpop.f32.mrf.mxu0 }
 0x1d0   : > { %v9319_v8 = vadd.f32 %v2387_v38, %v1979_v1  ;;  %v3425_v1 = vld [vmem:[#allocation2 + $0x30] sm:$0xe]  ;;  %v3481_v38 = vrot.slane %v3479_v36, 4 }
 0x1d1   : > { %v7127_v58 = vrot.slane %v3425_v1, 9  ;;  %v3427_v1 = vld [vmem:[#allocation2 + $0x48] sm:$0xe] }
 0x1d2   : > { %v3483_v47 = vsel %vm8643_vm14, %v3481_v38, %v3482_v22  ;;  %v3496_v22 = vrot.slane %v7951_v26, 5  ;;  %v3510_v26 = vrot.slane %v9101_v59, 5  ;;  %v452_v59 = vld [vmem:[#allocation3] sm:$0x1] }
 0x1d3   : > { %v3480_v55 = vsel %vm8643_vm14, %v7127_v58, %v3479_v36  ;;  %v7129_v58 = vrot.slane %v3427_v1, 9  ;;  %v3429_v1 = vld [vmem:[#allocation2 + $0x60] sm:$0xe] }
 0x1d7   : > { %v2390_v31 = vpop.f32.mrf.mxu0 }
 0x1d8   : > { %v9323_v34 = vadd.f32 %v2390_v31, %v1980_v52  ;;  %v3555_v31 = vunpack.c.l.b16 %v3483_v47 }
 0x1da   : > { %3646 = vmatmul.bf16.vlgmr.msrb.gmra.mxu0 %v3570_v12  ;;  %v3554_v12 = vunpack.c.l.b16 %v3480_v55 }
 0x1df   : > { %v2392_v40 = vpop.f32.mrf.mxu0 }
 0x1e0   : > { %v9331_v29 = vadd.f32 %v2392_v40, %v1981_v32  ;;  %v3489_v32 = vrot.slane %v7949_v49, 5  ;;  %v3503_v49 = vrot.slane %v9048_v46, 5 }
 0x1e2   : > { %v3490_v13 = vsel %vm8643_vm14, %v3488_v21, %v3489_v32 }
 0x1e3   : > { %v3557_v11 = vunpack.c.l.b16 %v3490_v13 }
 0x1e7   : > { %v2395_v19 = vpop.f32.mrf.mxu0 }
 0x1e8   : > { %v9334_v9 = vadd.f32 %v2395_v19, %v8952_v2  ;;  %v3572_v2 = vpack.c.b16 %v3555_v31, %v3554_v12  ;;  %v7950_v19 = vld [vmem:[#allocation2 + $0x4c] sm:$0xf] }
 0x1e9   : > { %v3493_v3 = vrot.slane %v7950_v19, 5 }
 0x1ea   : > { %3651 = vmatmul.bf16.gmra.mxu0 %v3571_v28 }
 0x1eb   : > { %v3495_v38 = vrot.slane %v3493_v3, 4 }
 0x1ed   : > { %v3497_v55 = vsel %vm8643_vm14, %v3495_v38, %v3496_v22 }
 0x1ee   : > { %v3559_v31 = vunpack.c.l.b16 %v3497_v55 }
 0x1ef   : > { %v2397_v15 = vpop.f32.mrf.mxu0 }
 0x1f0   : > { %v9341_v52 = vadd.f32 %v2397_v15, %v8975_v18  ;;  %v3487_v18 = vsel %vm8643_vm14, %v7128_v48, %v3486_v57  ;;  %v7130_v48 = vrot.slane %v3428_v63, 9  ;;  %v3514_v63 = vrot.slane %v9128_v56, 5 }
 0x1f1   : > { %v3556_v41 = vunpack.c.l.b16 %v3487_v18 }
 0x1f7   : > { %v2400_v50 = vpop.f32.mrf.mxu0 }
 0x1f8   : > { %v9344_v53 = vadd.f32 %v2400_v50, %v8996_v7  ;;  %v3573_v7 = vpack.c.b16 %v3557_v11, %v3556_v41  ;;  %v10251_v50 = vld [vmem:[#allocation48_spill] sm:$0xff] }
 0x1f9   : > { %v3500_v10 = vrot.slane %v10251_v50, 5 }
 0x1fa   : > { %3656 = vmatmul.bf16.gmra.mxu0 %v3572_v2 }
 0x1fb   : > { %v3502_v21 = vrot.slane %v3500_v10, 4 }
 0x1ff   : > { %v2402_v40 = vpop.f32.mrf.mxu0 }
 0x200   : > { %v9351_v0 = vadd.f32 %v2402_v40, %v9019_v43  ;;  %v3494_v43 = vsel %vm8643_vm14, %v7129_v58, %v3493_v3  ;;  %v3504_v40 = vsel %vm8643_vm14, %v3502_v21, %v3503_v49  ;;  %v9376_v3 = vpop.f32.mrf.mxu2  ;;  %v7131_v58 = vrot.slane %v3429_v1, 9 }
 0x201   : > { %v3558_v12 = vunpack.c.l.b16 %v3494_v43  ;;  %v3561_v41 = vunpack.c.l.b16 %v3504_v40  ;;  %v3517_v40 = vrot.slane %v9157_v17, 5 }
 0x207   : > { %v2405_v28 = vpop.f32.mrf.mxu0 }
 0x208   : > { %v9354_v36 = vadd.f32 %v2405_v28, %v9042_v25  ;;  %v3574_v25 = vpack.c.b16 %v3559_v31, %v3558_v12  ;;  %v10252_v28 = vld [vmem:[#allocation49_spill] sm:$0xff] }
 0x209   : > { %v3507_v19 = vrot.slane %v10252_v28, 5 }
 0x20a   : > { %3661 = vmatmul.bf16.gmra.mxu0 %v3573_v7 }
 0x20b   : > { %v3509_v38 = vrot.slane %v3507_v19, 4  ;;  %v3508_v43 = vsel %vm8643_vm14, %v7131_v58, %v3507_v19 }
 0x20c   : > { %v3562_v31 = vunpack.c.l.b16 %v3508_v43 }
 0x20d   : > { %v3511_v55 = vsel %vm8643_vm14, %v3509_v38, %v3510_v26  ;;  %v3521_v26 = vrot.slane %v9194_v61, 5 }
 0x20f   : > { %v2407_v15 = vpop.f32.mrf.mxu0 }
 0x210   : > { %v9361_v47 = vadd.f32 %v2407_v15, %v9068_v6  ;;  %v3501_v6 = vsel %vm8643_vm14, %v7130_v48, %v3500_v10  ;;  %v453_v48 = vsel %vm8372_vm3, 0, %v452_v59  ;;  %v3524_v59 = vrot.slane %v9231_v44, 5 }
 0x211   : > { %v3560_v13 = vunpack.c.l.b16 %v3501_v6  ;;  %454 = vst [vmem:[#allocation3] sm:$0x1] %v453_v48  ;;  %v3516_v6 = vrot.slane %v3514_v63, 4 }
 0x213   : > { %v3575_v11 = vpack.c.b16 %v3561_v41, %v3560_v13 }
 0x217   : > { %v2410_v2 = vpop.f32.mrf.mxu0 }
 0x218   : > { %v9365_v57 = vadd.f32 %v2410_v2, %v9096_v14  ;;  %v2674_v14 = vpop.f32.mrf.mxu1 }
 0x219   : > { %v2724_v61 = vadd.f32 %v2674_v14, %v9295_v51 }
 0x21a   : > { %3666 = vmatmul.bf16.gmra.mxu0 %v3574_v25  ;;  %v3563_v25 = vunpack.c.l.b16 %v3511_v55  ;;  %v3431_v55 = vld [vmem:[#allocation2 + $0x78] sm:$0xe] }
 0x21c   : > { %v3576_v50 = vpack.c.b16 %v3563_v25, %v3562_v31  ;;  %v7133_v25 = vrot.slane %v3431_v55, 9 }
 0x21f   : > { %v2412_v32 = vpop.f32.mrf.mxu0 }
 0x220   : > { %v9373_v18 = vadd.f32 %v2412_v32, %v9122_v37  ;;  %v3353_v37 = vpop.f32.mrf.mxu3  ;;  %v2676_v22 = vpop.f32.mrf.mxu1 }
 0x227   : > { %v2415_v7 = vpop.f32.mrf.mxu0 }
 0x228   : > { %v9379_v46 = vadd.f32 %v2415_v7, %v9147_v39  ;;  %v9389_v39 = vpop.f32.mrf.mxu2  ;;  %v9391_v2 = vpop.f32.mrf.mxu3 }
 0x229   : > { %v9396_v21 = vpop.f32.mrf.mxu1 }
 0x22a   : > { %3671 = vmatmul.bf16.gmra.mxu0 %v3575_v11  ;;  %v3518_v11 = vsel %vm8643_vm14, %v3516_v6, %v3517_v40  ;;  %v2949_v40 = vadd.f32 %v9376_v3, %v2724_v61  ;;  %v2726_v61 = vadd.f32 %v9396_v21, %v9311_v33 }
 0x22b   : > { %v3565_v1 = vunpack.c.l.b16 %v3518_v11  ;;  %v2725_v11 = vadd.f32 %v2676_v22, %v9307_v62 }
 0x22d   : > { %v2950_v22 = vadd.f32 %v9389_v39, %v2725_v11 }
 0x22f   : > { %v2417_v15 = vpop.f32.mrf.mxu0 }
 0x230   : > { %v9387_v12 = vadd.f32 %v2417_v15, %v9176_v16  ;;  %v3430_v16 = vld [vmem:[#allocation2 + $0x6c] sm:$0xe]  ;;  %v9402_v13 = vpop.f32.mrf.mxu2  ;;  %v9408_v7 = vpop.f32.mrf.mxu3  ;;  %v482_v15 = vld [vmem:[#allocation3 + $0x8] sm:$0x1] }
 0x231   : > { %v7132_v32 = vrot.slane %v3430_v16, 9  ;;  %v9413_v28 = vpop.f32.mrf.mxu1  ;;  %v483_v31 = vsel %vm8377_vm4, 0, %v482_v15  ;;  %v455_v16 = vld [vmem:[#allocation3 + $0xc] sm:$0x1]  ;;  %v9455_v15 = vld [vmem:[%s10144_s3] ss:$0 sm:$0xff] }
 0x232   : > { %484 = vst [vmem:[#allocation3 + $0x8] sm:$0x1] %v483_v31  ;;  %v456_v44 = vsel %vm8372_vm3, 0, %v455_v16 }
 0x233   : > { %v3515_v56 = vsel %vm8643_vm14, %v7132_v32, %v3514_v63  ;;  %457 = vst [vmem:[#allocation3 + $0xc] sm:$0x1] %v456_v44 }
 0x234   : > { %v3564_v19 = vunpack.c.l.b16 %v3515_v56  ;;  %v3403_v56 = vadd.f32 %v3353_v37, %v2949_v40  ;;  %v3432_v37 = vld [vmem:[#allocation2 + $0x84] sm:$0xe]  ;;  %v458_v40 = vld [vmem:[#allocation3 + $0x18] sm:$0x1] }
 0x235   : > { %v459_v33 = vsel %vm8372_vm3, 0, %v458_v40 }
 0x236   : > { %v3577_v17 = vpack.c.b16 %v3565_v1, %v3564_v19  ;;  %460 = vst [vmem:[#allocation3 + $0x18] sm:$0x1] %v459_v33 }
 0x237   : > { %v2420_v10 = vpop.f32.mrf.mxu0 }
 0x238   : > { %v9399_v49 = vadd.f32 %v2420_v10, %v9219_v54  ;;  %v9415_v58 = vpop.f32.mrf.mxu2 }
 0x239   : > { %v9426_v10 = vpop.f32.mrf.mxu1 }
 0x23a   : > { %3676 = vmatmul.bf16.gmra.mxu0 %v3576_v50  ;;  %v3523_v50 = vrot.slane %v3521_v26, 4  ;;  %v2728_v33 = vadd.f32 %v9426_v10, %v9323_v34 }
 0x23c   : > { %v3525_v48 = vsel %vm8643_vm14, %v3523_v50, %v3524_v59  ;;  %v3531_v50 = vrot.slane %v9286_v45, 5 }
 0x23d   : > { %v3567_v14 = vunpack.c.l.b16 %v3525_v48 }
 0x23f   : > { %v2422_v41 = vpop.f32.mrf.mxu0 }
 0x240   : > { %v9411_v54 = vadd.f32 %v2422_v41, %v9242_v30  ;;  %v9423_v30 = vpop.f32.mrf.mxu3  ;;  %v9433_v32 = vpop.f32.mrf.mxu2 }
 0x241   : > { %v9444_v19 = vpop.f32.mrf.mxu1  ;;  %v2953_v10 = vadd.f32 %v9433_v32, %v2728_v33 }
 0x247   : > { %v2425_v38 = vpop.f32.mrf.mxu0 }
 0x248   : > { %v9419_v43 = vadd.f32 %v2425_v38, %v9266_v20  ;;  %v3522_v20 = vsel %vm8643_vm14, %v7133_v25, %v3521_v26  ;;  %v9441_v41 = vpop.f32.mrf.mxu3  ;;  %v3528_v38 = vrot.slane %v9261_v35, 5  ;;  %v485_v26 = vld [vmem:[#allocation3 + $0x14] sm:$0x1]  ;;  %v9460_v55 = vpop.f32.mrf.mxu2  ;;  %v7134_v35 = vrot.slane %v3432_v37, 9 }
 0x249   : > { %v3566_v51 = vunpack.c.l.b16 %v3522_v20  ;;  %v486_v62 = vsel %vm8377_vm4, 0, %v485_v26  ;;  %v2727_v37 = vadd.f32 %v9413_v28, %v9319_v8 }
 0x24a   : > { %3681 = vmatmul.bf16.gmra.mxu0 %v3577_v17  ;;  %487 = vst [vmem:[#allocation3 + $0x14] sm:$0x1] %v486_v62  ;;  %v3530_v25 = vrot.slane %v3528_v38, 4  ;;  %v3529_v16 = vsel %vm8643_vm14, %v7134_v35, %v3528_v38  ;;  %v4005_v62 = vld [vmem:[#allocation3] sm:$0xf] }
 0x24b   : > { %v3578_v1 = vpack.c.b16 %v3567_v14, %v3566_v51  ;;  %v9474_v51 = vpop.f32.mrf.mxu1  ;;  %v3568_v11 = vunpack.c.l.b16 %v3529_v16  ;;  %v2952_v8 = vadd.f32 %v9415_v58, %v2727_v37 }
 0x24c   : > { %v3532_v44 = vsel %vm8643_vm14, %v3530_v25, %v3531_v50  ;;  %v488_v50 = vld [vmem:[#allocation3 + $0x20] sm:$0x1] }
 0x24f   : > { %v2427_v63 = vpop.f32.mrf.mxu0 }
 0x250   : > { %v9436_v6 = vadd.f32 %v2427_v63, %v9289_v24  ;;  %v9449_v24 = vld [vmem:[%s10143_s2] ss:$0 sm:$0xff]  ;;  %v3404_v63 = vadd.f32 %v9391_v2, %v2950_v22  ;;  %v9468_v20 = vpop.f32.mrf.mxu3  ;;  %v2951_v2 = vadd.f32 %v9402_v13, %v2726_v61 }
 0x252   : > { %v3405_v22 = vadd.f32 %v9408_v7, %v2951_v2  ;;  %v4009_v2 = vld [vmem:[#allocation3 + $0x8] sm:$0x1] }
 0x253   : > { %v9493_v28 = vpop.f32.mrf.mxu1 }
 0x257   : > { %v3647_v17 = vpop.f32.mrf.mxu0 }
 0x258   : > { %v3697_v3 = vadd.f32 %v3647_v17, %v3403_v56  ;;  %v9480_v17 = vpop.f32.mrf.mxu2 }
 0x25a   : > { %v3721_v31 = vmul.f32 %v9449_v24, %v3697_v3  ;;  %3686 = vmatmul.bf16.gmra.mxu0 %v3578_v1  ;;  %v3569_v1 = vunpack.c.l.b16 %v3532_v44 }
 0x25c   : > { %v3745_v59 = vadd.f32 %v9455_v15, %v3721_v31  ;;  %v3579_v35 = vpack.c.b16 %v3569_v1, %v3568_v11 }
 0x25e   : > { %v3765_v48 = vmax.f32 %v3745_v59, 0.0  ;;  %v9486_v59 = vpop.f32.mrf.mxu3 }
 0x25f   : > { %v3649_v39 = vpop.f32.mrf.mxu0 }
 0x260   : > { %v3785_v45 = vpack.c.bf16 %v3765_v48, %v3765_v48  ;;  %v3698_v14 = vadd.f32 %v3649_v39, %v3404_v63  ;;  %v489_v39 = vsel %vm8377_vm4, 0, %v488_v50 }
 0x261   : > { %490 = vst [vmem:[#allocation3 + $0x20] sm:$0x1] %v489_v39  ;;  %v3407_v39 = vadd.f32 %v9441_v41, %v2953_v10  ;;  %v464_v10 = vld [vmem:[#allocation3 + $0x30] sm:$0x1] }
 0x262   : > { %v3806_v21 = vshrl.u32 %v3785_v45, 16  ;;  %v3722_v56 = vmul.f32 %v9449_v24, %v3698_v14  ;;  %v3809_v26 = vshll.u32 %v3785_v45, 16  ;;  %v3406_v14 = vadd.f32 %v9423_v30, %v2952_v8 }
 0x264   : > { %v3808_v38 = vrot.slane %v3806_v21, 7  ;;  %v3746_v3 = vadd.f32 %v9455_v15, %v3722_v56  ;;  %v9500_v21 = vpop.f32.mrf.mxu2 }
 0x266   : > { %v3811_v31 = vor.u32 %v3809_v26, %v3808_v38  ;;  %v3766_v13 = vmax.f32 %v3746_v3, 0.0  ;;  %v3812_v58 = vrot.slane %v3808_v38, 4  ;;  %v461_v3 = vld [vmem:[#allocation3 + $0x24] sm:$0x1]  ;;  %v9509_v38 = vpop.f32.mrf.mxu3 }
 0x267   : > { %v3652_v25 = vpop.f32.mrf.mxu0  ;;  %v462_v34 = vsel %vm8372_vm3, 0, %v461_v3  ;;  %v4016_v3 = vld [vmem:[#allocation3 + $0x14] sm:$0x1] }
 0x268   : > { %v4006_v61 = vsel %vm8415_vm8, %v3811_v31, %v4005_v62  ;;  %v3786_v63 = vpack.c.bf16 %v3766_v13, %v3766_v13  ;;  %v3699_v48 = vadd.f32 %v3652_v25, %v3405_v22  ;;  %463 = vst [vmem:[#allocation3 + $0x24] sm:$0x1] %v462_v34 }
 0x269   : > { %4007 = vst [vmem:[#allocation3] sm:$0xf] %v4006_v61 }
 0x26a   : > { %v3814_v7 = vshrl.u32 %v3786_v63, 16  ;;  %v3723_v16 = vmul.f32 %v9449_v24, %v3699_v48  ;;  %3691 = vmatmul.bf16.gmra.mxu0 %v3579_v35  ;;  %v3817_v40 = vshll.u32 %v3786_v63, 16  ;;  %v9512_v35 = vpop.f32.mrf.mxu1  ;;  %v2729_v63 = vadd.f32 %v9444_v19, %v9331_v29  ;;  %v4012_v48 = vld [vmem:[#allocation3 + $0xc] sm:$0xf] }
 0x26c   : > { %v3816_v44 = vrot.slane %v3814_v7, 7  ;;  %v3747_v45 = vadd.f32 %v9455_v15, %v3723_v16  ;;  %v491_v16 = vld [vmem:[#allocation3 + $0x2c] sm:$0x1] }
 0x26d   : > { %v492_v33 = vsel %vm8377_vm4, 0, %v491_v16 }
 0x26e   : > { %v3819_v56 = vor.u32 %v3817_v40, %v3816_v44  ;;  %v3821_v11 = vrot.slane %v3816_v44, 4  ;;  %v3767_v1 = vmax.f32 %v3747_v45, 0.0  ;;  %v9518_v44 = vpop.f32.mrf.mxu2  ;;  %493 = vst [vmem:[#allocation3 + $0x2c] sm:$0x1] %v492_v33  ;;  %v9526_v19 = vpop.f32.mrf.mxu3  ;;  %v494_v33 = vld [vmem:[#allocation3 + $0x38] sm:$0x1] }
 0x26f   : > { %v3654_v26 = vpop.f32.mrf.mxu0 }
 0x270   : > { %v3820_v37 = vsel %vm8405_vm7, %v3812_v58, %v3819_v56  ;;  %v4010_v62 = vsel %vm8372_vm3, %v3821_v11, %v4009_v2  ;;  %v3787_v22 = vpack.c.bf16 %v3767_v1, %v3767_v1  ;;  %v3700_v30 = vadd.f32 %v3654_v26, %v3406_v14 }
 0x271   : > { %4008 = vst [vmem:[#allocation3 + $0x4] sm:$0xf] %v3820_v37  ;;  %v2954_v2 = vadd.f32 %v9460_v55, %v2729_v63  ;;  %v2730_v26 = vadd.f32 %v9474_v51, %v9334_v9  ;;  %v465_v9 = vsel %vm8372_vm3, 0, %v464_v10 }
 0x272   : > { %4011 = vst [vmem:[#allocation3 + $0x8] sm:$0x1] %v4010_v62  ;;  %v3823_v31 = vshrl.u32 %v3787_v22, 16  ;;  %v3724_v13 = vmul.f32 %v9449_v24, %v3700_v30  ;;  %v3826_v50 = vshll.u32 %v3787_v22, 16  ;;  %v9532_v37 = vpop.f32.mrf.mxu1 }
 0x273   : > { %v3408_v1 = vadd.f32 %v9468_v20, %v2954_v2  ;;  %v2955_v51 = vadd.f32 %v9480_v17, %v2730_v26  ;;  %466 = vst [vmem:[#allocation3 + $0x30] sm:$0x1] %v465_v9 }
 0x274   : > { %v3825_v25 = vrot.slane %v3823_v31, 7  ;;  %v3748_v61 = vadd.f32 %v9455_v15, %v3724_v13 }
 0x275   : > { %v3409_v16 = vadd.f32 %v9486_v59, %v2955_v51 }
 0x276   : > { %v3828_v32 = vor.u32 %v3826_v50, %v3825_v25  ;;  %v3768_v8 = vmax.f32 %v3748_v61, 0.0  ;;  %v3829_v55 = vrot.slane %v3825_v25, 4  ;;  %v9541_v25 = vpop.f32.mrf.mxu2 }
 0x277   : > { %v3657_v7 = vpop.f32.mrf.mxu0 }
 0x278   : > { %v4013_v40 = vsel %vm8415_vm8, %v3828_v32, %v4012_v48  ;;  %v3788_v45 = vpack.c.bf16 %v3768_v8, %v3768_v8  ;;  %v3701_v14 = vadd.f32 %v3657_v7, %v3407_v39  ;;  %v2731_v8 = vadd.f32 %v9493_v28, %v9341_v52  ;;  %v4019_v7 = vld [vmem:[#allocation3 + $0x18] sm:$0xf] }
 0x279   : > { %4014 = vst [vmem:[#allocation3 + $0xc] sm:$0xf] %v4013_v40  ;;  %v9548_v40 = vpop.f32.mrf.mxu3 }
 0x27a   : > { %v3831_v29 = vshrl.u32 %v3788_v45, 16  ;;  %v3725_v41 = vmul.f32 %v9449_v24, %v3701_v14  ;;  %v3834_v56 = vshll.u32 %v3788_v45, 16  ;;  %v2699_v2 = vpop.f32.mrf.mxu1  ;;  %v2956_v52 = vadd.f32 %v9500_v21, %v2731_v8 }
 0x27c   : > { %v3833_v58 = vrot.slane %v3831_v29, 7  ;;  %v3749_v11 = vadd.f32 %v9455_v15, %v3725_v41 }
 0x27e   : > { %v3836_v62 = vor.u32 %v3834_v56, %v3833_v58  ;;  %v3838_v22 = vrot.slane %v3833_v58, 4  ;;  %v3769_v30 = vmax.f32 %v3749_v11, 0.0  ;;  %v495_v56 = vsel %vm8377_vm4, 0, %v494_v33  ;;  %v9556_v11 = vpop.f32.mrf.mxu2 }
 0x27f   : > { %v3659_v34 = vpop.f32.mrf.mxu0  ;;  %496 = vst [vmem:[#allocation3 + $0x38] sm:$0x1] %v495_v56 }
 0x280   : > { %v3837_v31 = vsel %vm8405_vm7, %v3829_v55, %v3836_v62  ;;  %v4017_v13 = vsel %vm8372_vm3, %v3838_v22, %v4016_v3  ;;  %v3789_v50 = vpack.c.bf16 %v3769_v30, %v3769_v30  ;;  %v3702_v20 = vadd.f32 %v3659_v34, %v3408_v1  ;;  %v4023_v22 = vld [vmem:[#allocation3 + $0x20] sm:$0x1] }
 0x281   : > { %4015 = vst [vmem:[#allocation3 + $0x10] sm:$0xf] %v3837_v31  ;;  %v3410_v55 = vadd.f32 %v9509_v38, %v2956_v52  ;;  %v2732_v62 = vadd.f32 %v9512_v35, %v9344_v53 }
 0x282   : > { %4018 = vst [vmem:[#allocation3 + $0x14] sm:$0x1] %v4017_v13  ;;  %v3840_v61 = vshrl.u32 %v3789_v50, 16  ;;  %v3726_v63 = vmul.f32 %v9449_v24, %v3702_v20  ;;  %v3843_v39 = vshll.u32 %v3789_v50, 16  ;;  %v467_v13 = vld [vmem:[#allocation3 + $0x3c] sm:$0x1]  ;;  %v9562_v50 = vpop.f32.mrf.mxu3 }
 0x283   : > { %v468_v53 = vsel %vm8372_vm3, 0, %v467_v13  ;;  %v2957_v35 = vadd.f32 %v9518_v44, %v2732_v62  ;;  %v2734_v62 = vadd.f32 %v2699_v2, %v9354_v36 }
 0x284   : > { %v3842_v48 = vrot.slane %v3840_v61, 7  ;;  %v3750_v32 = vadd.f32 %v9455_v15, %v3726_v63  ;;  %v2701_v61 = vpop.f32.mrf.mxu1  ;;  %469 = vst [vmem:[#allocation3 + $0x3c] sm:$0x1] %v468_v53 }
 0x286   : > { %v3845_v17 = vor.u32 %v3843_v39, %v3842_v48  ;;  %v3770_v45 = vmax.f32 %v3750_v32, 0.0  ;;  %v3846_v30 = vrot.slane %v3842_v48, 4 }
 0x287   : > { %v3662_v14 = vpop.f32.mrf.mxu0 }
 0x288   : > { %v4020_v29 = vsel %vm8415_vm8, %v3845_v17, %v4019_v7  ;;  %v3790_v41 = vpack.c.bf16 %v3770_v45, %v3770_v45  ;;  %v3703_v58 = vadd.f32 %v3662_v14, %v3409_v16  ;;  %v2733_v7 = vadd.f32 %v9532_v37, %v9351_v0  ;;  %v4026_v16 = vld [vmem:[#allocation3 + $0x24] sm:$0xf]  ;;  %v2926_v45 = vpop.f32.mrf.mxu2 }
 0x289   : > { %4021 = vst [vmem:[#allocation3 + $0x18] sm:$0xf] %v4020_v29  ;;  %v3411_v17 = vadd.f32 %v9526_v19, %v2957_v35  ;;  %v497_v29 = vld [vmem:[#allocation3 + $0x44] sm:$0x1] }
 0x28a   : > { %v3848_v28 = vshrl.u32 %v3790_v41, 16  ;;  %v3727_v59 = vmul.f32 %v9449_v24, %v3703_v58  ;;  %v3851_v26 = vshll.u32 %v3790_v41, 16  ;;  %v498_v52 = vsel %vm8377_vm4, 0, %v497_v29  ;;  %v3380_v0 = vpop.f32.mrf.mxu3 }
 0x28b   : > { %499 = vst [vmem:[#allocation3 + $0x44] sm:$0x1] %v498_v52 }
 0x28c   : > { %v3850_v1 = vrot.slane %v3848_v28, 7  ;;  %v3751_v3 = vadd.f32 %v9455_v15, %v3727_v59  ;;  %v2958_v28 = vadd.f32 %v9541_v25, %v2733_v7  ;;  %v2704_v59 = vpop.f32.mrf.mxu1 }
 0x28e   : > { %v3853_v34 = vor.u32 %v3851_v26, %v3850_v1  ;;  %v3855_v21 = vrot.slane %v3850_v1, 4  ;;  %v3771_v10 = vmax.f32 %v3751_v3, 0.0 }
 0x28f   : > { %v3664_v31 = vpop.f32.mrf.mxu0 }
 0x290   : > { %v3854_v20 = vsel %vm8405_vm7, %v3846_v30, %v3853_v34  ;;  %v4024_v9 = vsel %vm8372_vm3, %v3855_v21, %v4023_v22  ;;  %v3791_v51 = vpack.c.bf16 %v3771_v10, %v3771_v10  ;;  %v3704_v38 = vadd.f32 %v3664_v31, %v3410_v55  ;;  %v4030_v22 = vld [vmem:[#allocation3 + $0x2c] sm:$0x1]  ;;  %v470_v31 = vld [vmem:[#allocation3 + $0x48] sm:$0x1]  ;;  %v2929_v13 = vpop.f32.mrf.mxu2 }
 0x291   : > { %4022 = vst [vmem:[#allocation3 + $0x1c] sm:$0xf] %v3854_v20  ;;  %v3412_v55 = vadd.f32 %v9548_v40, %v2958_v28  ;;  %v471_v36 = vsel %vm8372_vm3, 0, %v470_v31  ;;  %v2959_v40 = vadd.f32 %v9556_v11, %v2734_v62  ;;  %v500_v11 = vld [vmem:[#allocation3 + $0x50] sm:$0x1] }
 0x292   : > { %4025 = vst [vmem:[#allocation3 + $0x20] sm:$0x1] %v4024_v9  ;;  %v3857_v63 = vshrl.u32 %v3791_v51, 16  ;;  %v3728_v48 = vmul.f32 %v9449_v24, %v3704_v38  ;;  %v3860_v32 = vshll.u32 %v3791_v51, 16  ;;  %v3383_v35 = vpop.f32.mrf.mxu3 }
 0x293   : > { %472 = vst [vmem:[#allocation3 + $0x48] sm:$0x1] %v471_v36  ;;  %v3413_v7 = vadd.f32 %v9562_v50, %v2959_v40 }
 0x294   : > { %v3859_v39 = vrot.slane %v3857_v63, 7  ;;  %v3752_v8 = vadd.f32 %v9455_v15, %v3728_v48 }
 0x296   : > { %v3862_v14 = vor.u32 %v3860_v32, %v3859_v39  ;;  %v3772_v33 = vmax.f32 %v3752_v8, 0.0  ;;  %v3863_v30 = vrot.slane %v3859_v39, 4  ;;  %v2735_v32 = vadd.f32 %v2701_v61, %v9361_v47  ;;  %v4033_v8 = vld [vmem:[#allocation3 + $0x30] sm:$0xf] }
 0x297   : > { %v3667_v44 = vpop.f32.mrf.mxu0 }
 0x298   : > { %v4027_v41 = vsel %vm8415_vm8, %v3862_v14, %v4026_v16  ;;  %v3792_v58 = vpack.c.bf16 %v3772_v33, %v3772_v33  ;;  %v3705_v56 = vadd.f32 %v3667_v44, %v3411_v17  ;;  %v2706_v16 = vpop.f32.mrf.mxu1  ;;  %v2931_v52 = vpop.f32.mrf.mxu2 }
 0x299   : > { %4028 = vst [vmem:[#allocation3 + $0x24] sm:$0xf] %v4027_v41 }
 0x29a   : > { %v3865_v37 = vshrl.u32 %v3792_v58, 16  ;;  %v3729_v19 = vmul.f32 %v9449_v24, %v3705_v56  ;;  %v3868_v26 = vshll.u32 %v3792_v58, 16  ;;  %v501_v58 = vsel %vm8377_vm4, 0, %v500_v11 }
 0x29b   : > { %v2960_v56 = vadd.f32 %v2926_v45, %v2735_v32  ;;  %502 = vst [vmem:[#allocation3 + $0x50] sm:$0x1] %v501_v58 }
 0x29c   : > { %v3867_v1 = vrot.slane %v3865_v37, 7  ;;  %v3753_v3 = vadd.f32 %v9455_v15, %v3729_v19 }
 0x29d   : > { %v3414_v19 = vadd.f32 %v3380_v0, %v2960_v56 }
 0x29e   : > { %v3870_v34 = vor.u32 %v3868_v26, %v3867_v1  ;;  %v3872_v21 = vrot.slane %v3867_v1, 4  ;;  %v3773_v25 = vmax.f32 %v3753_v3, 0.0  ;;  %v2736_v1 = vadd.f32 %v2704_v59, %v9365_v57  ;;  %v4037_v26 = vld [vmem:[#allocation3 + $0x38] sm:$0x1]  ;;  %v3385_v3 = vpop.f32.mrf.mxu3 }
 0x29f   : > { %v3669_v10 = vpop.f32.mrf.mxu0 }
 0x2a0   : > { %v3871_v20 = vsel %vm8405_vm7, %v3863_v30, %v3870_v34  ;;  %v4031_v9 = vsel %vm8372_vm3, %v3872_v21, %v4030_v22  ;;  %v3793_v51 = vpack.c.bf16 %v3773_v25, %v3773_v25  ;;  %v3706_v38 = vadd.f32 %v3669_v10, %v3412_v55  ;;  %v473_v34 = vld [vmem:[#allocation3 + $0x54] sm:$0x1]  ;;  %v2709_v21 = vpop.f32.mrf.mxu1 }
 0x2a1   : > { %4029 = vst [vmem:[#allocation3 + $0x28] sm:$0xf] %v3871_v20  ;;  %v474_v57 = vsel %vm8372_vm3, 0, %v473_v34  ;;  %v2961_v0 = vadd.f32 %v2929_v13, %v2736_v1  ;;  %v2738_v56 = vadd.f32 %v2709_v21, %v9379_v46  ;;  %v476_v1 = vld [vmem:[#allocation3 + $0x60] sm:$0x1] }
 0x2a2   : > { %4032 = vst [vmem:[#allocation3 + $0x2c] sm:$0x1] %v4031_v9  ;;  %v3874_v2 = vshrl.u32 %v3793_v51, 16  ;;  %v3730_v53 = vmul.f32 %v9449_v24, %v3706_v38  ;;  %v3877_v48 = vshll.u32 %v3793_v51, 16  ;;  %v2934_v51 = vpop.f32.mrf.mxu2  ;;  %v477_v46 = vsel %vm8372_vm3, 0, %v476_v1 }
 0x2a3   : > { %475 = vst [vmem:[#allocation3 + $0x54] sm:$0x1] %v474_v57  ;;  %v4047_v57 = vld [vmem:[#allocation3 + $0x48] sm:$0xf] }
 0x2a4   : > { %v3876_v63 = vrot.slane %v3874_v2, 7  ;;  %v3754_v39 = vadd.f32 %v9455_v15, %v3730_v53  ;;  %v2737_v2 = vadd.f32 %v2706_v16, %v9373_v18  ;;  %v4040_v53 = vld [vmem:[#allocation3 + $0x3c] sm:$0xf]  ;;  %478 = vst [vmem:[#allocation3 + $0x60] sm:$0x1] %v477_v46 }
 0x2a6   : > { %v3879_v17 = vor.u32 %v3877_v48, %v3876_v63  ;;  %v3774_v14 = vmax.f32 %v3754_v39, 0.0  ;;  %v3880_v55 = vrot.slane %v3876_v63, 4  ;;  %v3415_v63 = vadd.f32 %v3383_v35, %v2961_v0 }
 0x2a7   : > { %v3672_v33 = vpop.f32.mrf.mxu0  ;;  %v2962_v11 = vadd.f32 %v2931_v52, %v2737_v2 }
 0x2a8   : > { %v4034_v44 = vsel %vm8415_vm8, %v3879_v17, %v4033_v8  ;;  %v3794_v29 = vpack.c.bf16 %v3774_v14, %v3774_v14  ;;  %v3707_v41 = vadd.f32 %v3672_v33, %v3413_v7  ;;  %v503_v8 = vld [vmem:[#allocation3 + $0x5c] sm:$0x1]  ;;  %v3388_v7 = vpop.f32.mrf.mxu3 }
 0x2a9   : > { %4035 = vst [vmem:[#allocation3 + $0x30] sm:$0xf] %v4034_v44  ;;  %v504_v33 = vsel %vm8377_vm4, 0, %v503_v8  ;;  %v2711_v44 = vpop.f32.mrf.mxu1  ;;  %v3416_v58 = vadd.f32 %v3385_v3, %v2962_v11  ;;  %v2963_v3 = vadd.f32 %v2934_v51, %v2738_v56 }
 0x2aa   : > { %v3882_v47 = vshrl.u32 %v3794_v29, 16  ;;  %v3731_v61 = vmul.f32 %v9449_v24, %v3707_v41  ;;  %v3885_v28 = vshll.u32 %v3794_v29, 16  ;;  %505 = vst [vmem:[#allocation3 + $0x5c] sm:$0x1] %v504_v33  ;;  %v4051_v33 = vld [vmem:[#allocation3 + $0x50] sm:$0x1] }
 0x2ab   : > { %v3417_v0 = vadd.f32 %v3388_v7, %v2963_v3 }
 0x2ac   : > { %v3884_v50 = vrot.slane %v3882_v47, 7  ;;  %v3755_v37 = vadd.f32 %v9455_v15, %v3731_v61  ;;  %v4044_v47 = vld [vmem:[#allocation3 + $0x44] sm:$0x1]  ;;  %v2936_v61 = vpop.f32.mrf.mxu2 }
 0x2ae   : > { %v3887_v62 = vor.u32 %v3885_v28, %v3884_v50  ;;  %v3889_v22 = vrot.slane %v3884_v50, 4  ;;  %v3775_v30 = vmax.f32 %v3755_v37, 0.0 }
 0x2af   : > { %v3674_v45 = vpop.f32.mrf.mxu0 }
 0x2b0   : > { %v3888_v25 = vsel %vm8405_vm7, %v3880_v55, %v3887_v62  ;;  %v4038_v10 = vsel %vm8372_vm3, %v3889_v22, %v4037_v26  ;;  %v3795_v31 = vpack.c.bf16 %v3775_v30, %v3775_v30  ;;  %v3708_v20 = vadd.f32 %v3674_v45, %v3414_v19  ;;  %v3390_v30 = vpop.f32.mrf.mxu3 }
 0x2b1   : > { %4036 = vst [vmem:[#allocation3 + $0x34] sm:$0xf] %v3888_v25  ;;  %v2714_v21 = vpop.f32.mrf.mxu1 }
 0x2b2   : > { %4039 = vst [vmem:[#allocation3 + $0x38] sm:$0x1] %v4038_v10  ;;  %v3891_v59 = vshrl.u32 %v3795_v31, 16  ;;  %v3732_v9 = vmul.f32 %v9449_v24, %v3708_v20  ;;  %v3894_v36 = vshll.u32 %v3795_v31, 16  ;;  %v2739_v20 = vadd.f32 %v2711_v44, %v9387_v12 }
 0x2b4   : > { %v3893_v38 = vrot.slane %v3891_v59, 7  ;;  %v3756_v40 = vadd.f32 %v9455_v15, %v3732_v9  ;;  %v2939_v51 = vpop.f32.mrf.mxu2 }
 0x2b6   : > { %v3896_v48 = vor.u32 %v3894_v36, %v3893_v38  ;;  %v3776_v39 = vmax.f32 %v3756_v40, 0.0  ;;  %v3897_v50 = vrot.slane %v3893_v38, 4  ;;  %v506_v36 = vld [vmem:[#allocation3 + $0x68] sm:$0x1] }
 0x2b7   : > { %v3677_v32 = vpop.f32.mrf.mxu0 }
 0x2b8   : > { %v4041_v13 = vsel %vm8415_vm8, %v3896_v48, %v4040_v53  ;;  %v3796_v17 = vpack.c.bf16 %v3776_v39, %v3776_v39  ;;  %v3709_v14 = vadd.f32 %v3677_v32, %v3415_v63  ;;  %v507_v63 = vsel %vm8377_vm4, 0, %v506_v36  ;;  %v3393_v32 = vpop.f32.mrf.mxu3 }
 0x2b9   : > { %4042 = vst [vmem:[#allocation3 + $0x3c] sm:$0xf] %v4041_v13  ;;  %v2964_v48 = vadd.f32 %v2936_v61, %v2739_v20  ;;  %v2716_v11 = vpop.f32.mrf.mxu1 }
 0x2ba   : > { %v3899_v29 = vshrl.u32 %v3796_v17, 16  ;;  %v3733_v18 = vmul.f32 %v9449_v24, %v3709_v14  ;;  %v3902_v16 = vshll.u32 %v3796_v17, 16  ;;  %508 = vst [vmem:[#allocation3 + $0x68] sm:$0x1] %v507_v63  ;;  %v2740_v14 = vadd.f32 %v2714_v21, %v9399_v49 }
 0x2bb   : > { %v3418_v17 = vadd.f32 %v3390_v30, %v2964_v48 }
 0x2bc   : > { %v3901_v35 = vrot.slane %v3899_v29, 7  ;;  %v3757_v41 = vadd.f32 %v9455_v15, %v3733_v18 }
 0x2be   : > { %v3904_v28 = vor.u32 %v3902_v16, %v3901_v35  ;;  %v3906_v37 = vrot.slane %v3901_v35, 4  ;;  %v3777_v19 = vmax.f32 %v3757_v41, 0.0  ;;  %v479_v41 = vld [vmem:[#allocation3 + $0x6c] sm:$0x1] }
 0x2bf   : > { %v3679_v52 = vpop.f32.mrf.mxu0  ;;  %v480_v49 = vsel %vm8372_vm3, 0, %v479_v41 }
 0x2c0   : > { %v3905_v26 = vsel %vm8405_vm7, %v3897_v50, %v3904_v28  ;;  %v4045_v55 = vsel %vm8372_vm3, %v3906_v37, %v4044_v47  ;;  %v3797_v62 = vpack.c.bf16 %v3777_v19, %v3777_v19  ;;  %v3710_v22 = vadd.f32 %v3679_v52, %v3416_v58  ;;  %v2941_v28 = vpop.f32.mrf.mxu2  ;;  %481 = vst [vmem:[#allocation3 + $0x6c] sm:$0x1] %v480_v49  ;;  %v3395_v46 = vpop.f32.mrf.mxu3 }
 0x2c1   : > { %4043 = vst [vmem:[#allocation3 + $0x40] sm:$0xf] %v3905_v26  ;;  %v2965_v50 = vadd.f32 %v2939_v51, %v2740_v14  ;;  %v2719_v21 = vpop.f32.mrf.mxu1 }
 0x2c2   : > { %4046 = vst [vmem:[#allocation3 + $0x44] sm:$0x1] %v4045_v55  ;;  %v3908_v45 = vshrl.u32 %v3797_v62, 16  ;;  %v3734_v34 = vmul.f32 %v9449_v24, %v3710_v22  ;;  %v3911_v10 = vshll.u32 %v3797_v62, 16  ;;  %v2741_v55 = vadd.f32 %v2716_v11, %v9411_v54  ;;  %v4054_v62 = vld [vmem:[#allocation3 + $0x54] sm:$0xf] }
 0x2c3   : > { %v3419_v22 = vadd.f32 %v3393_v32, %v2965_v50 }
 0x2c4   : > { %v3910_v25 = vrot.slane %v3908_v45, 7  ;;  %v3758_v31 = vadd.f32 %v9455_v15, %v3734_v34  ;;  %v509_v34 = vld [vmem:[#allocation3 + $0x74] sm:$0x1] }
 0x2c5   : > { %v510_v20 = vsel %vm8377_vm4, 0, %v509_v34 }
 0x2c6   : > { %v3913_v59 = vor.u32 %v3911_v10, %v3910_v25  ;;  %v3778_v9 = vmax.f32 %v3758_v31, 0.0  ;;  %v3914_v44 = vrot.slane %v3910_v25, 4  ;;  %511 = vst [vmem:[#allocation3 + $0x74] sm:$0x1] %v510_v20 }
 0x2c7   : > { %v3682_v38 = vpop.f32.mrf.mxu0 }
 0x2c8   : > { %v4048_v40 = vsel %vm8415_vm8, %v3913_v59, %v4047_v57  ;;  %v3798_v2 = vpack.c.bf16 %v3778_v9, %v3778_v9  ;;  %v3711_v53 = vadd.f32 %v3682_v38, %v3417_v0  ;;  %v2966_v57 = vadd.f32 %v2941_v28, %v2741_v55  ;;  %v2944_v59 = vpop.f32.mrf.mxu2 }
 0x2c9   : > { %4049 = vst [vmem:[#allocation3 + $0x48] sm:$0xf] %v4048_v40  ;;  %v2742_v40 = vadd.f32 %v2719_v21, %v9419_v43  ;;  %v2721_v14 = vpop.f32.mrf.mxu1 }
 0x2ca   : > { %v3916_v39 = vshrl.u32 %v3798_v2, 16  ;;  %v3735_v12 = vmul.f32 %v9449_v24, %v3711_v53  ;;  %v3919_v7 = vshll.u32 %v3798_v2, 16  ;;  %v3420_v51 = vadd.f32 %v3395_v46, %v2966_v57  ;;  %v4058_v2 = vld [vmem:[#allocation3 + $0x5c] sm:$0x1] }
 0x2cc   : > { %v3918_v8 = vrot.slane %v3916_v39, 7  ;;  %v3759_v13 = vadd.f32 %v9455_v15, %v3735_v12  ;;  %v3398_v12 = vpop.f32.mrf.mxu3 }
 0x2ce   : > { %v3921_v29 = vor.u32 %v3919_v7, %v3918_v8  ;;  %v3923_v18 = vrot.slane %v3918_v8, 4  ;;  %v3779_v35 = vmax.f32 %v3759_v13, 0.0 }
 0x2cf   : > { %v3684_v16 = vpop.f32.mrf.mxu0 }
 0x2d0   : > { %v3922_v58 = vsel %vm8405_vm7, %v3914_v44, %v3921_v29  ;;  %v4052_v56 = vsel %vm8372_vm3, %v3923_v18, %v4051_v33  ;;  %v3799_v47 = vpack.c.bf16 %v3779_v35, %v3779_v35  ;;  %v3712_v61 = vadd.f32 %v3684_v16, %v3418_v17  ;;  %v4061_v35 = vld [vmem:[#allocation3 + $0x60] sm:$0xf]  ;;  %v2946_v41 = vpop.f32.mrf.mxu2 }
 0x2d1   : > { %4050 = vst [vmem:[#allocation3 + $0x4c] sm:$0xf] %v3922_v58  ;;  %v2967_v17 = vadd.f32 %v2944_v59, %v2742_v40  ;;  %v2743_v18 = vadd.f32 %v2721_v14, %v9436_v6  ;;  %v4068_v59 = vld [vmem:[#allocation3 + $0x6c] sm:$0xf] }
 0x2d2   : > { %4053 = vst [vmem:[#allocation3 + $0x50] sm:$0x1] %v4052_v56  ;;  %v3925_v37 = vshrl.u32 %v3799_v47, 16  ;;  %v3736_v19 = vmul.f32 %v9449_v24, %v3712_v61  ;;  %v3928_v1 = vshll.u32 %v3799_v47, 16 }
 0x2d3   : > { %v3421_v16 = vadd.f32 %v3398_v12, %v2967_v17  ;;  %v2968_v28 = vadd.f32 %v2946_v41, %v2743_v18 }
 0x2d4   : > { %v3927_v52 = vrot.slane %v3925_v37, 7  ;;  %v3760_v26 = vadd.f32 %v9455_v15, %v3736_v19  ;;  %v3400_v37 = vpop.f32.mrf.mxu3 }
 0x2d5   : > { %v3422_v55 = vadd.f32 %v3400_v37, %v2968_v28 }
 0x2d6   : > { %v3930_v3 = vor.u32 %v3928_v1, %v3927_v52  ;;  %v3780_v30 = vmax.f32 %v3760_v26, 0.0  ;;  %v3931_v53 = vrot.slane %v3927_v52, 4 }
 0x2d7   : > { %v3687_v45 = vpop.f32.mrf.mxu0 }
 0x2d8   : > { %v4055_v25 = vsel %vm8415_vm8, %v3930_v3, %v4054_v62  ;;  %v3800_v10 = vpack.c.bf16 %v3780_v30, %v3780_v30  ;;  %v3713_v31 = vadd.f32 %v3687_v45, %v3419_v22  ;;  %v4065_v62 = vld [vmem:[#allocation3 + $0x68] sm:$0x1] }
 0x2d9   : > { %4056 = vst [vmem:[#allocation3 + $0x54] sm:$0xf] %v4055_v25 }
 0x2da   : > { %v3933_v0 = vshrl.u32 %v3800_v10, 16  ;;  %v3737_v54 = vmul.f32 %v9449_v24, %v3713_v31  ;;  %v3936_v38 = vshll.u32 %v3800_v10, 16 }
 0x2dc   : > { %v3935_v9 = vrot.slane %v3933_v0, 7  ;;  %v3761_v36 = vadd.f32 %v9455_v15, %v3737_v54 }
 0x2de   : > { %v3938_v63 = vor.u32 %v3936_v38, %v3935_v9  ;;  %v3940_v48 = vrot.slane %v3935_v9, 4  ;;  %v3781_v5 = vmax.f32 %v3761_v36, 0.0 }
 0x2df   : > { %v3689_v39 = vpop.f32.mrf.mxu0 }
 0x2e0   : > { %v3939_v32 = vsel %vm8405_vm7, %v3931_v53, %v3938_v63  ;;  %v4059_v8 = vsel %vm8372_vm3, %v3940_v48, %v4058_v2  ;;  %v3801_v7 = vpack.c.bf16 %v3781_v5, %v3781_v5  ;;  %v3714_v13 = vadd.f32 %v3689_v39, %v3420_v51  ;;  %v4072_v63 = vld [vmem:[#allocation3 + $0x74] sm:$0x1] }
 0x2e1   : > { %4057 = vst [vmem:[#allocation3 + $0x58] sm:$0xf] %v3939_v32 }
 0x2e2   : > { %4060 = vst [vmem:[#allocation3 + $0x5c] sm:$0x1] %v4059_v8  ;;  %v3942_v43 = vshrl.u32 %v3801_v7, 16  ;;  %v3738_v33 = vmul.f32 %v9449_v24, %v3714_v13  ;;  %v3945_v44 = vshll.u32 %v3801_v7, 16 }
 0x2e4   : > { %v3944_v11 = vrot.slane %v3942_v43, 7  ;;  %v3762_v29 = vadd.f32 %v9455_v15, %v3738_v33 }
 0x2e6   : > { %v3947_v58 = vor.u32 %v3945_v44, %v3944_v11  ;;  %v3782_v56 = vmax.f32 %v3762_v29, 0.0  ;;  %v3948_v22 = vrot.slane %v3944_v11, 4 }
 0x2e7   : > { %v3692_v47 = vpop.f32.mrf.mxu0 }
 0x2e8   : > { %v4062_v61 = vsel %vm8415_vm8, %v3947_v58, %v4061_v35  ;;  %v3802_v49 = vpack.c.bf16 %v3782_v56, %v3782_v56  ;;  %v3715_v50 = vadd.f32 %v3692_v47, %v3421_v16 }
 0x2e9   : > { %4063 = vst [vmem:[#allocation3 + $0x60] sm:$0xf] %v4062_v61 }
 0x2ea   : > { %v3950_v19 = vshrl.u32 %v3802_v49, 16  ;;  %v3739_v52 = vmul.f32 %v9449_v24, %v3715_v50  ;;  %v3953_v26 = vshll.u32 %v3802_v49, 16 }
 0x2ec   : > { %v3952_v1 = vrot.slane %v3950_v19, 7  ;;  %v3763_v6 = vadd.f32 %v9455_v15, %v3739_v52 }
 0x2ee   : > { %v3955_v46 = vor.u32 %v3953_v26, %v3952_v1  ;;  %v3957_v3 = vrot.slane %v3952_v1, 4  ;;  %v3783_v30 = vmax.f32 %v3763_v6, 0.0 }
 0x2ef   : > { %v3694_v45 = vpop.f32.mrf.mxu0 }
 0x2f0   : > { %v3956_v34 = vsel %vm8405_vm7, %v3948_v22, %v3955_v46  ;;  %v4066_v21 = vsel %vm8372_vm3, %v3957_v3, %v4065_v62  ;;  %v3803_v25 = vpack.c.bf16 %v3783_v30, %v3783_v30  ;;  %v3716_v10 = vadd.f32 %v3694_v45, %v3422_v55 }
 0x2f1   : > { %4064 = vst [vmem:[#allocation3 + $0x64] sm:$0xf] %v3956_v34 }
 0x2f2   : > { %4067 = vst [vmem:[#allocation3 + $0x68] sm:$0x1] %v4066_v21  ;;  %v3959_v31 = vshrl.u32 %v3803_v25, 16  ;;  %v3740_v20 = vmul.f32 %v9449_v24, %v3716_v10  ;;  %v3962_v0 = vshll.u32 %v3803_v25, 16 }
 0x2f4   : > { %v3961_v57 = vrot.slane %v3959_v31, 7  ;;  %v3764_v54 = vadd.f32 %v9455_v15, %v3740_v20 }
 0x2f6   : > { %v3964_v9 = vor.u32 %v3962_v0, %v3961_v57  ;;  %v3784_v38 = vmax.f32 %v3764_v54, 0.0  ;;  %v3965_v48 = vrot.slane %v3961_v57, 4 }
 0x2f8   : > { %v4069_v36 = vsel %vm8415_vm8, %v3964_v9, %v4068_v59  ;;  %v3804_v51 = vpack.c.bf16 %v3784_v38, %v3784_v38 }
 0x2f9   : > { %4070 = vst [vmem:[#allocation3 + $0x6c] sm:$0xf] %v4069_v36 }
 0x2fa   : > { %v3967_v40 = vshrl.u32 %v3804_v51, 16  ;;  %v3970_v53 = vshll.u32 %v3804_v51, 16 }
 0x2fc   : > { %v3969_v2 = vrot.slane %v3967_v40, 7 }
 0x2fe   : > { %v3972_v5 = vor.u32 %v3970_v53, %v3969_v2  ;;  %v3974_v24 = vrot.slane %v3969_v2, 4  ;;  %4078 = sbr.rel (%p7167_p1) target bundleno = 775 (0x307), region = 64 }
 0x300   : > { %v3973_v39 = vsel %vm8405_vm7, %v3965_v48, %v3972_v5  ;;  %v4073_v15 = vsel %vm8372_vm3, %v3974_v24, %v4072_v63 }
 0x301   : > { %4071 = vst [vmem:[#allocation3 + $0x70] sm:$0xf] %v3973_v39 }
 0x302   : > { %4074 = vst [vmem:[#allocation3 + $0x74] sm:$0x1] %v4073_v15 }
 0x303   : > { %v8178_v27 = vmov 0  }
 0x304   : > { %4079 = vst [vmem:[#allocation3] sm:$0xf] %v8178_v27 }
 0x305   : > { %4080 = vst [vmem:[#allocation3 + $0x4] sm:$0xf] %v8178_v27 }
 0x306   : > { %4081 = vst [vmem:[#allocation3 + $0x8] sm:$0x1] %v8178_v27 }
 0x307 PF: > { %p7168_p4 = scmp.ne.s32.totalorder %s8154_s30, 1 }
 0x309   : > { %4085 = sbr.rel (%p7168_p4) target bundleno = 786 (0x312), region = 68 }
 0x30e   : > { %v8179_v23 = vmov 0  }
 0x30f   : > { %4087 = vst [vmem:[#allocation3 + $0x6c] sm:$0xf] %v8179_v23 }
 0x310   : > { %4088 = vst [vmem:[#allocation3 + $0x70] sm:$0xf] %v8179_v23 }
 0x311   : > { %4089 = vst [vmem:[#allocation3 + $0x74] sm:$0x1] %v8179_v23 }
 0x312 PF: > { %v7710_v4 = vld [vmem:[#allocation9 + $0x78] sm:$0xff]  ;;  %v7709_v8 = vld [vmem:[#allocation9 + $0x70] sm:$0xff]  ;;  %v7708_v17 = vld [vmem:[#allocation9 + $0x68] sm:$0xff]  ;;  %s10253_s19 = sld [smem:[#allocation52_spill]]  ;;  %s7783_s24 = sshll.u32 %s8154_s30, 4 }
 0x313   : > { %v7702_v12 = vld [vmem:[#allocation9 + $0x38] sm:$0xff]  ;;  %4419 = vmatpush.bf16.msra.mxu1 %v7710_v4  ;;  %v7701_v7 = vld [vmem:[#allocation9 + $0x30] sm:$0xff]  ;;  %v7700_v14 = vld [vmem:[#allocation9 + $0x28] sm:$0xff]  ;;  %s10254_s20 = sld [smem:[#allocation53_spill]]  ;;  %s6605_s27 = sshll.u32 %s9675_s1, 4  ;;  %s6606_s27 = int_to_ptr.vmem [resolvable:$true] %s6605_s27 }
 0x314   : > { %v7718_v32 = vld [vmem:[#allocation9 + $0xb8] sm:$0xff]  ;;  %4564 = vmatpush.bf16.msra.mxu2 %v7702_v12  ;;  %v7717_v13 = vld [vmem:[#allocation9 + $0xb0] sm:$0xff]  ;;  %v7716_v43 = vld [vmem:[#allocation9 + $0xa8] sm:$0xff]  ;;  %s10268_s12 = sld [smem:[#allocation15_spill]]  ;;  %s6590_s13 = scalar_lea.sflag [#allocation6], %s343_s4 }
 0x315   : > { %4790 = vmatpush.bf16.msrb.mxu3 %v7718_v32  ;;  %v4090_v33 = vld [vmem:[#allocation3] sm:$0xf]  ;;  %v4091_v11 = vld [vmem:[#allocation3 + $0x4] sm:$0xf]  ;;  %v7707_v16 = vld [vmem:[#allocation9 + $0x60] sm:$0xff]  ;;  %s10271_s8 = sld [smem:[#allocation54_spill]] }
 0x316   : > { %v4131_v44 = vshrl.u32 %v4090_v33, 16  ;;  %v4134_v29 = vshll.u32 %v4090_v33, 16  ;;  %v4140_v18 = vshll.u32 %v4091_v11, 16  ;;  %v4144_v35 = vshrl.u32 %v4091_v11, 16  ;;  %v7699_v41 = vld [vmem:[#allocation9 + $0x20] sm:$0xff]  ;;  %v7706_v28 = vld [vmem:[#allocation9 + $0x58] sm:$0xff] }
 0x317   : > { %4420 = vmatpush.bf16.msra.mxu1 %v7709_v8  ;;  %v7715_v58 = vld [vmem:[#allocation9 + $0xa0] sm:$0xff]  ;;  %v4122_v56 = vld [vmem:[#allocation3 + $0x8] sm:$0x1]  ;;  %v7698_v37 = vld [vmem:[#allocation9 + $0x18] sm:$0xff]  ;;  %v4639_v55 = vrot.slane %v4091_v11, 5 }
 0x318   : > { %4565 = vmatpush.bf16.msra.mxu2 %v7701_v7  ;;  %v4133_v47 = vrot.slane %v4131_v44, 4  ;;  %v4136_v61 = vrot.slane %v4134_v29, 5  ;;  %v4142_v49 = vrot.slane %v4140_v18, 5  ;;  %v4146_v50 = vrot.slane %v4144_v35, 4  ;;  %v7714_v26 = vld [vmem:[#allocation9 + $0x98] sm:$0xff]  ;;  %v7705_v62 = vld [vmem:[#allocation9 + $0x50] sm:$0xff] }
 0x319   : > { %4791 = vmatpush.bf16.msrb.mxu3 %v7717_v13  ;;  %v4150_v1 = vshll.u32 %v4122_v56, 16  ;;  %v4613_v6 = vld [vmem:[#allocation3] sm:$0xe]  ;;  %v7697_v22 = vld [vmem:[#allocation9 + $0x10] sm:$0xff]  ;;  %v9679_v21 = vld [vmem:[#allocation3 + $0x10] sm:$0xf] }
 0x31a   : > { %v4137_v19 = vor.u32 %v4136_v61, %v4133_v47  ;;  %v4147_v52 = vor.u32 %v4146_v50, %v4142_v49  ;;  %v4092_v46 = vld [vmem:[#allocation3 + $0xc] sm:$0xf]  ;;  %v7265_v34 = vrot.slane %v4613_v6, 9  ;;  %v4641_v10 = vrot.slane %v4639_v55, 4  ;;  %v7704_v54 = vld [vmem:[#allocation9 + $0x48] sm:$0xff]  ;;  %v7703_v24 = vld [vmem:[#allocation9 + $0x40] sm:$0xff] }
 0x31b   : > { %4421 = vmatpush.bf16.msra.mxu1 %v7708_v17  ;;  %v4152_v45 = vrot.slane %v4150_v1, 5  ;;  %v7713_v25 = vld [vmem:[#allocation9 + $0x90] sm:$0xff]  ;;  %v4642_v31 = vrot.slane %v4122_v56, 5  ;;  %v4155_v20 = vshrl.u32 %v4092_v46, 16  ;;  %v4158_v57 = vshll.u32 %v4092_v46, 16  ;;  %v7696_v59 = vld [vmem:[#allocation9 + $0x8] sm:$0xff]  ;;  %s10272_s14 = smov %s10271_s8 }
 0x31c   : > { %4566 = vmatpush.bf16.msra.mxu2 %v7700_v14  ;;  %v4138_v3 = vrot.slane %v4137_v19, 4  ;;  %v4148_v30 = vrot.slane %v4147_v52, 4  ;;  %v4164_v0 = vshll.u32 %v9679_v21, 16  ;;  %v4640_v36 = vsel %vm8643_vm14, %v7265_v34, %v4639_v55  ;;  %v7712_v40 = vld [vmem:[#allocation9 + $0x88] sm:$0xff]  ;;  %v7695_v39 = vld [vmem:[#allocation9] sm:$0xff]  ;;  %v7742_v32 = vld [vmem:[#allocation9 + $0x138] sm:$0xff] }
 0x31d   : > { %4792 = vmatpush.bf16.msrb.mxu3 %v7716_v43  ;;  %v4168_v51 = vshrl.u32 %v9679_v21, 16  ;;  %v4643_v2 = vsel %vm8643_vm14, %v4641_v10, %v4642_v31  ;;  %v4710_v48 = vunpack.c.l.b16 %v4640_v36  ;;  %v4157_v5 = vrot.slane %v4155_v20, 4  ;;  %v7711_v12 = vld [vmem:[#allocation9 + $0x80] sm:$0xff]  ;;  %v4123_v8 = vld [vmem:[#allocation3 + $0x14] sm:$0x1]  ;;  %v7687_v17 = vld [vmem:[#allocation3] sm:$0xff] }
 0x31e   : > { %v4143_v9 = vsel %vm8477_vm11, %v4138_v3, %v4142_v49  ;;  %v4153_v38 = vsel %vm8477_vm11, %v4148_v30, %v4152_v45  ;;  %v4711_v15 = vunpack.c.l.b16 %v4643_v2  ;;  %v4160_v27 = vrot.slane %v4158_v57, 5  ;;  %v7734_v7 = vld [vmem:[#allocation9 + $0xf8] sm:$0xff]  ;;  %v7741_v44 = vld [vmem:[#allocation9 + $0x130] sm:$0xff]  ;;  %v4095_v47 = vld [vmem:[#allocation3 + $0x1c] sm:$0xf]  ;;  %s7580_s16 = sshll.u32 %s10268_s12, 5 }
 0x31f   : > { %4422 = vmatpush.bf16.msra.mxu1 %v7707_v16  ;;  %v4339_v53 = vunpack.c.l.b16 %v4143_v9  ;;  %v4340_v63 = vunpack.c.l.b16 %v4153_v38  ;;  %v4166_v23 = vrot.slane %v4164_v0, 5  ;;  %v4170_v4 = vrot.slane %v4168_v51, 4  ;;  %v4614_v18 = vld [vmem:[#allocation3 + $0xc] sm:$0xe]  ;;  %v4094_v16 = vld [vmem:[#allocation3 + $0x18] sm:$0xf]  ;;  %s6602_s7 = sadd.s32 %s7783_s24, %s7580_s16 }
 0x320   : > { %4567 = vmatpush.bf16.msra.mxu2 %v7699_v41  ;;  %v4726_v14 = vpack.c.b16 %v4711_v15, %v4710_v48  ;;  %v4161_v43 = vor.u32 %v4160_v27, %v4157_v5  ;;  %v4174_v11 = vshll.u32 %v4123_v8, 16  ;;  %v4646_v29 = vrot.slane %v9679_v21, 5  ;;  %v7733_v35 = vld [vmem:[#allocation9 + $0xf0] sm:$0xff]  ;;  %v7732_v52 = vld [vmem:[#allocation9 + $0xe8] sm:$0xff]  ;;  %v4615_v36 = vld [vmem:[#allocation3 + $0x18] sm:$0xe] }
 0x321   : > { %4793 = vmatpush.bf16.msrb.mxu3 %v7715_v58  ;;  %v4355_v13 = vpack.c.b16 %v4340_v63, %v4339_v53  ;;  %v4171_v33 = vor.u32 %v4170_v4, %v4166_v23  ;;  %v7266_v61 = vrot.slane %v4614_v18, 9  ;;  %v4649_v50 = vrot.slane %v4123_v8, 5  ;;  %v4124_v34 = vld [vmem:[#allocation3 + $0x20] sm:$0x1]  ;;  %v7739_v5 = vld [vmem:[#allocation9 + $0x120] sm:$0xff]  ;;  %s7581_s5 = sshll.u32 %s6602_s7, 3 }
 0x322   : > { %v4162_v41 = vrot.slane %v4161_v43, 4  ;;  %v4176_v56 = vrot.slane %v4174_v11, 5  ;;  %v4648_v49 = vrot.slane %v4646_v29, 4  ;;  %v4182_v19 = vshll.u32 %v4094_v16, 16  ;;  %v4097_v15 = vld [vmem:[#allocation3 + $0x28] sm:$0xf]  ;;  %s6604_s15 = scalar_lea.hbm %s10271_s8, %s7581_s5 }
 0x323   : > { %4423 = vmatpush.bf16.msra.mxu1 %v7706_v28  ;;  %v4172_v58 = vrot.slane %v4171_v33, 4  ;;  %v7740_v28 = vld [vmem:[#allocation9 + $0x128] sm:$0xff]  ;;  %v4188_v1 = vshll.u32 %v4095_v47, 16  ;;  %v4198_v57 = vshll.u32 %v4124_v34, 16  ;;  %v4653_v9 = vrot.slane %v4095_v47, 5  ;;  %s6607_s23 = sshll.u32 %s6604_s15, 4  ;;  %s6608_s23 = int_to_ptr.hbm [resolvable:$true] %s6607_s23 }
 0x324   : > { %4568 = vmatpush.bf16.msra.mxu2 %v7698_v37  ;;  %v4179_v37 = vshrl.u32 %v4094_v16, 16  ;;  %v4167_v6 = vsel %vm8477_vm11, %v4162_v41, %v4166_v23  ;;  %v4184_v3 = vrot.slane %v4182_v19, 5  ;;  %v7267_v53 = vrot.slane %v4615_v36, 9  ;;  %v7689_v41 = vld [vmem:[#allocation3 + $0x18] sm:$0xff]  ;;  %s8064_s12 = scalar_lea.hbm %s10272_s14, 512 }
 0x325   : > { %4794 = vmatpush.bf16.msrb.mxu3 %v7714_v26  ;;  %v4192_v26 = vshrl.u32 %v4095_v47, 16  ;;  %v4177_v55 = vsel %vm8477_vm11, %v4172_v58, %v4176_v56  ;;  %v4341_v30 = vunpack.c.l.b16 %v4167_v6  ;;  %v4190_v21 = vrot.slane %v4188_v1, 5  ;;  %v7730_v6 = vld [vmem:[#allocation9 + $0xd8] sm:$0xff] }
 0x326   : > { %v4181_v46 = vrot.slane %v4179_v37, 4  ;;  %v4342_v45 = vunpack.c.l.b16 %v4177_v55  ;;  %v4655_v63 = vrot.slane %v4653_v9, 4  ;;  %v4656_v48 = vrot.slane %v4124_v34, 5  ;;  %v7738_v37 = vld [vmem:[#allocation9 + $0x118] sm:$0xff] }
 0x327   : > { %4424 = vmatpush.bf16.msra.mxu1 %v7705_v62  ;;  %v4647_v62 = vsel %vm8643_vm14, %v7266_v61, %v4646_v29  ;;  %v4654_v4 = vsel %vm8643_vm14, %v7267_v53, %v4653_v9  ;;  %v7690_v53 = vld [vmem:[#allocation3 + $0x24] sm:$0xff] }
 0x328   : > { %4569 = vmatpush.bf16.msra.mxu2 %v7697_v22  ;;  %v4650_v22 = vsel %vm8643_vm14, %v4648_v49, %v4649_v50  ;;  %v4712_v10 = vunpack.c.l.b16 %v4647_v62  ;;  %v4185_v20 = vor.u32 %v4184_v3, %v4181_v46  ;;  %v4356_v0 = vpack.c.b16 %v4342_v45, %v4341_v30  ;;  %v4616_v50 = vld [vmem:[#allocation3 + $0x24] sm:$0xe] }
 0x329   : > { %4795 = vmatpush.bf16.msrb.mxu3 %v7713_v25  ;;  %v4194_v25 = vrot.slane %v4192_v26, 4  ;;  %v4713_v31 = vunpack.c.l.b16 %v4650_v22  ;;  %v4714_v43 = vunpack.c.l.b16 %v4654_v4  ;;  %v4660_v49 = vrot.slane %v4097_v15, 5  ;;  %v4099_v26 = vld [vmem:[#allocation3 + $0x34] sm:$0xf] }
 0x32a   : > { %v4186_v51 = vrot.slane %v4185_v20, 4  ;;  %v7268_v55 = vrot.slane %v4616_v50, 9  ;;  %v4236_v30 = vshll.u32 %v4099_v26, 16  ;;  %v4240_v45 = vshrl.u32 %v4099_v26, 16 }
 0x32b   : > { %4425 = vmatpush.bf16.msra.mxu1 %v7704_v54  ;;  %v7688_v54 = vld [vmem:[#allocation3 + $0xc] sm:$0xff]  ;;  %v4727_v38 = vpack.c.b16 %v4713_v31, %v4712_v10  ;;  %v4662_v62 = vrot.slane %v4660_v49, 4 }
 0x32c   : > { %4570 = vmatpush.bf16.msra.mxu2 %v7696_v59  ;;  %v4195_v59 = vor.u32 %v4194_v25, %v4190_v21  ;;  %v4191_v27 = vsel %vm8477_vm11, %v4186_v51, %v4190_v21  ;;  %v4661_v25 = vsel %vm8643_vm14, %v7268_v55, %v4660_v49  ;;  %v4242_v9 = vrot.slane %v4240_v45, 4  ;;  %v4618_v55 = vld [vmem:[#allocation3 + $0x3c] sm:$0xe]  ;;  %v9724_v45 = vld [vmem:[#allocation3 + $0x4c] sm:$0xf] }
 0x32d   : > { %4796 = vmatpush.bf16.msrb.mxu3 %v7712_v40  ;;  %v4200_v40 = vrot.slane %v4198_v57, 5 }
 0x32e   : > { %v4196_v2 = vrot.slane %v4195_v59, 4  ;;  %v4238_v59 = vrot.slane %v4236_v30, 5 }
 0x32f   : > { %4426 = vmatpush.bf16.msra.mxu1 %v7703_v24  ;;  %v7731_v24 = vld [vmem:[#allocation9 + $0xe0] sm:$0xff] }
 0x330   : > { %4571 = vmatpush.bf16.msra.mxu2 %v7695_v39  ;;  %v4096_v39 = vld [vmem:[#allocation3 + $0x24] sm:$0xf]  ;;  %v4201_v23 = vsel %vm8477_vm11, %v4196_v2, %v4200_v40 }
 0x331   : > { %4797 = vmatpush.bf16.msrb.mxu3 %v7711_v12  ;;  %v4657_v12 = vsel %vm8643_vm14, %v4655_v63, %v4656_v48  ;;  %v4206_v8 = vshll.u32 %v4096_v39, 16  ;;  %v4243_v63 = vor.u32 %v4242_v9, %v4238_v59  ;;  %v4667_v48 = vrot.slane %v4099_v26, 5 }
 0x332   : > { %4427 = vmatmul.bf16.vlgmr.msra.gmra.mxu1 %v4355_v13  ;;  %v4216_v13 = vshrl.u32 %v4097_v15, 16  ;;  %v4715_v33 = vunpack.c.l.b16 %v4657_v12  ;;  %v4288_v9 = vshrl.u32 %v9724_v45, 16 }
 0x333   : > { %4985 = vmatpush.bf16.msrb.mxu1 %v7734_v7  ;;  %4572 = vmatmul.bf16.vlgmr.msra.gmra.mxu2 %v7687_v17  ;;  %v4212_v7 = vshll.u32 %v4097_v15, 16  ;;  %v4343_v17 = vunpack.c.l.b16 %v4191_v27  ;;  %v4244_v27 = vrot.slane %v4243_v63, 4  ;;  %v4669_v4 = vrot.slane %v4667_v48, 4 }
 0x334   : > { %5363 = vmatpush.bf16.msrb.mxu2 %v7742_v32  ;;  %4798 = vmatmul.bf16.vlgmr.msrb.gmra.mxu3 %v4726_v14  ;;  %v4203_v32 = vshrl.u32 %v4096_v39, 16  ;;  %v4344_v14 = vunpack.c.l.b16 %v4201_v23  ;;  %v4218_v18 = vrot.slane %v4216_v13, 4  ;;  %v4728_v58 = vpack.c.b16 %v4715_v33, %v4714_v43  ;;  %v4101_v13 = vld [vmem:[#allocation3 + $0x40] sm:$0xf] }
 0x335   : > { %v4214_v29 = vrot.slane %v4212_v7, 5  ;;  %v4100_v7 = vld [vmem:[#allocation3 + $0x3c] sm:$0xf] }
 0x336   : > { %v4205_v11 = vrot.slane %v4203_v32, 4  ;;  %v4357_v16 = vpack.c.b16 %v4344_v14, %v4343_v17  ;;  %v7737_v32 = vld [vmem:[#allocation9 + $0x110] sm:$0xff] }
 0x337   : > { %4986 = vmatpush.bf16.msrb.mxu1 %v7733_v35  ;;  %v4125_v35 = vld [vmem:[#allocation3 + $0x2c] sm:$0x1]  ;;  %v4219_v47 = vor.u32 %v4218_v18, %v4214_v29  ;;  %v4264_v18 = vshrl.u32 %v4101_v13, 16 }
 0x338   : > { %5364 = vmatpush.bf16.msrb.mxu2 %v7741_v44  ;;  %v4208_v44 = vrot.slane %v4206_v8, 5  ;;  %v4222_v61 = vshll.u32 %v4125_v35, 16  ;;  %v4663_v22 = vrot.slane %v4125_v35, 5  ;;  %v7729_v8 = vld [vmem:[#allocation9 + $0xd0] sm:$0xff] }
 0x339   : > { %v4266_v50 = vrot.slane %v4264_v18, 4 }
 0x33a   : > { %v4209_v56 = vor.u32 %v4208_v44, %v4205_v11  ;;  %v4224_v1 = vrot.slane %v4222_v61, 5  ;;  %v4664_v10 = vsel %vm8643_vm14, %v4662_v62, %v4663_v22  ;;  %v4251_v11 = vshrl.u32 %v4100_v7, 16  ;;  %v4102_v22 = vld [vmem:[#allocation3 + $0x48] sm:$0xf] }
 0x33b   : > { %4987 = vmatpush.bf16.msrb.mxu1 %v7732_v52  ;;  %v4220_v52 = vrot.slane %v4219_v47, 4  ;;  %v4717_v36 = vunpack.c.l.b16 %v4664_v10  ;;  %v4254_v44 = vshll.u32 %v4100_v7, 16 }
 0x33c   : > { %5365 = vmatpush.bf16.msrb.mxu2 %v7740_v28  ;;  %v4098_v28 = vld [vmem:[#allocation3 + $0x30] sm:$0xf]  ;;  %v4210_v19 = vrot.slane %v4209_v56, 4  ;;  %v4127_v56 = vld [vmem:[#allocation3 + $0x44] sm:$0x1]  ;;  %v4253_v47 = vrot.slane %v4251_v11, 4 }
 0x33d   : > { %v4227_v46 = vshrl.u32 %v4098_v28, 16  ;;  %v4230_v3 = vshll.u32 %v4098_v28, 16  ;;  %v4225_v21 = vsel %vm8477_vm11, %v4220_v52, %v4224_v1  ;;  %v4256_v61 = vrot.slane %v4254_v44, 5 }
 0x33e   : > { %v4215_v34 = vsel %vm8477_vm11, %v4210_v19, %v4214_v29  ;;  %v4260_v29 = vshll.u32 %v4101_v13, 16  ;;  %v4270_v19 = vshll.u32 %v4127_v56, 16 }
 0x33f   : > { %4988 = vmatpush.bf16.msrb.mxu1 %v7731_v24  ;;  %v4229_v31 = vrot.slane %v4227_v46, 4  ;;  %v4232_v20 = vrot.slane %v4230_v3, 5  ;;  %v4345_v57 = vunpack.c.l.b16 %v4215_v34  ;;  %v4617_v24 = vld [vmem:[#allocation3 + $0x30] sm:$0xe]  ;;  %v4257_v1 = vor.u32 %v4256_v61, %v4253_v47  ;;  %v7736_v46 = vld [vmem:[#allocation9 + $0x108] sm:$0xff]  ;;  %v7727_v47 = vld [vmem:[#allocation9 + $0xc0] sm:$0xff] }
 0x340   : > { %5366 = vmatpush.bf16.msrb.mxu2 %v7739_v5  ;;  %v7269_v23 = vrot.slane %v4617_v24, 9  ;;  %v4262_v49 = vrot.slane %v4260_v29, 5  ;;  %v4272_v62 = vrot.slane %v4270_v19, 5  ;;  %v7750_v34 = vld [vmem:[#allocation9 + $0x178] sm:$0xff] }
 0x341   : > { %v4233_v51 = vor.u32 %v4232_v20, %v4229_v31  ;;  %v4258_v3 = vrot.slane %v4257_v1, 4  ;;  %v4677_v31 = vrot.slane %v4127_v56, 5  ;;  %v7766_v20 = vld [vmem:[#allocation9 + $0x1b8] sm:$0xff]  ;;  %5613 = vmatpush.bf16.msra.mxu3 %v7750_v34  ;;  %v7764_v56 = vld [vmem:[#allocation9 + $0x1a8] sm:$0xff] }
 0x342   : > { %4432 = vmatmul.bf16.gmra.mxu1 %v4356_v0  ;;  %v4346_v0 = vunpack.c.l.b16 %v4225_v21  ;;  %v4668_v43 = vsel %vm8643_vm14, %v7269_v23, %v4667_v48  ;;  %v4267_v26 = vor.u32 %v4266_v50, %v4262_v49  ;;  %v7728_v21 = vld [vmem:[#allocation9 + $0xc8] sm:$0xff]  ;;  %5808 = vmatpush.bf16.msra.mxu0 %v7766_v20  ;;  %v4104_v61 = vld [vmem:[#allocation3 + $0x54] sm:$0xf]  ;;  %v7745_v50 = vld [vmem:[#allocation9 + $0x150] sm:$0xff] }
 0x343   : > { %4577 = vmatmul.bf16.gmra.mxu2 %v7688_v54  ;;  %4989 = vmatpush.bf16.msrb.mxu1 %v7730_v6  ;;  %v4126_v54 = vld [vmem:[#allocation3 + $0x38] sm:$0x1]  ;;  %v4234_v39 = vrot.slane %v4233_v51, 4  ;;  %v4674_v6 = vrot.slane %v4101_v13, 5  ;;  %v7748_v48 = vld [vmem:[#allocation9 + $0x168] sm:$0xff] }
 0x344   : > { %4803 = vmatmul.bf16.gmra.mxu3 %v4727_v38  ;;  %5367 = vmatpush.bf16.msrb.mxu2 %v7738_v37  ;;  %v4716_v38 = vunpack.c.l.b16 %v4661_v25  ;;  %v4246_v40 = vshll.u32 %v4126_v54, 16  ;;  %v4358_v2 = vpack.c.b16 %v4346_v0, %v4345_v57  ;;  %v4670_v12 = vrot.slane %v4126_v54, 5  ;;  %v7691_v37 = vld [vmem:[#allocation3 + $0x30] sm:$0xff]  ;;  %v7749_v54 = vld [vmem:[#allocation9 + $0x170] sm:$0xff]  ;;  %v7692_v13 = vld [vmem:[#allocation3 + $0x3c] sm:$0xff] }
 0x345   : > { %v4239_v17 = vsel %vm8477_vm11, %v4234_v39, %v4238_v59  ;;  %v4268_v30 = vrot.slane %v4267_v26, 4  ;;  %v7270_v25 = vrot.slane %v4618_v55, 9  ;;  %v4676_v10 = vrot.slane %v4674_v6, 4  ;;  %5614 = vmatpush.bf16.msra.mxu3 %v7749_v54  ;;  %v4128_v39 = vld [vmem:[#allocation3 + $0x50] sm:$0x1] }
 0x346   : > { %v4729_v5 = vpack.c.b16 %v4717_v36, %v4716_v38  ;;  %v4248_v15 = vrot.slane %v4246_v40, 5  ;;  %v4671_v33 = vsel %vm8643_vm14, %v4669_v4, %v4670_v12  ;;  %v4347_v35 = vunpack.c.l.b16 %v4239_v17  ;;  %v7765_v38 = vld [vmem:[#allocation9 + $0x1b0] sm:$0xff]  ;;  %v4129_v20 = vld [vmem:[#allocation3 + $0x5c] sm:$0x1] }
 0x347   : > { %4990 = vmatpush.bf16.msrb.mxu1 %v7729_v8  ;;  %v4275_v57 = vshrl.u32 %v4102_v22, 16  ;;  %v4278_v0 = vshll.u32 %v4102_v22, 16  ;;  %v4284_v59 = vshll.u32 %v9724_v45, 16  ;;  %v4263_v36 = vsel %vm8477_vm11, %v4258_v3, %v4262_v49  ;;  %5809 = vmatpush.bf16.msra.mxu0 %v7765_v38  ;;  %v7747_v8 = vld [vmem:[#allocation9 + $0x160] sm:$0xff]  ;;  %v7744_v22 = vld [vmem:[#allocation9 + $0x148] sm:$0xff] }
 0x348   : > { %5368 = vmatpush.bf16.msrb.mxu2 %v7737_v32  ;;  %v4249_v14 = vsel %vm8477_vm11, %v4244_v27, %v4248_v15  ;;  %v4273_v51 = vsel %vm8477_vm11, %v4268_v30, %v4272_v62  ;;  %v4675_v40 = vsel %vm8643_vm14, %v7270_v25, %v4674_v6  ;;  %v4290_v27 = vrot.slane %v4288_v9, 4  ;;  %v9737_v49 = vld [vmem:[#allocation3 + $0x58] sm:$0xf] }
 0x349   : > { %v4280_v63 = vrot.slane %v4278_v0, 5  ;;  %v4350_v24 = vunpack.c.l.b16 %v4273_v51  ;;  %v4286_v15 = vrot.slane %v4284_v59, 5  ;;  %v4720_v23 = vunpack.c.l.b16 %v4675_v40  ;;  %5615 = vmatpush.bf16.msra.mxu3 %v7748_v48  ;;  %v7693_v0 = vld [vmem:[#allocation3 + $0x48] sm:$0xff] }
 0x34a   : > { %v4294_v32 = vshll.u32 %v4128_v39, 16  ;;  %v4299_v26 = vshrl.u32 %v4104_v61, 16  ;;  %v4302_v6 = vshll.u32 %v4104_v61, 16  ;;  %v4308_v55 = vshll.u32 %v9737_v49, 16  ;;  %v7761_v51 = vld [vmem:[#allocation9 + $0x190] sm:$0xff] }
 0x34b   : > { %4991 = vmatpush.bf16.msrb.mxu1 %v7728_v21  ;;  %v4291_v17 = vor.u32 %v4290_v27, %v4286_v15  ;;  %5810 = vmatpush.bf16.msra.mxu0 %v7764_v56  ;;  %v4312_v62 = vshrl.u32 %v9737_v49, 16  ;;  %v4318_v38 = vshll.u32 %v4129_v20, 16  ;;  %v4688_v40 = vrot.slane %v9737_v49, 5 }
 0x34c   : > { %5369 = vmatpush.bf16.msrb.mxu2 %v7736_v46  ;;  %v4296_v44 = vrot.slane %v4294_v32, 5  ;;  %v7762_v46 = vld [vmem:[#allocation9 + $0x198] sm:$0xff]  ;;  %v4301_v21 = vrot.slane %v4299_v26, 4  ;;  %v4304_v25 = vrot.slane %v4302_v6, 5  ;;  %v5428_v26 = vld [vmem:[#allocation3 + $0xc] sm:$0xe] }
 0x34d   : > { %5616 = vmatpush.bf16.msra.mxu3 %v7747_v8  ;;  %v4292_v29 = vrot.slane %v4291_v17, 4 }
 0x34e   : > { %v4305_v59 = vor.u32 %v4304_v25, %v4301_v21 }
 0x34f   : > { %v4297_v19 = vsel %vm8477_vm11, %v4292_v29, %v4296_v44  ;;  %4992 = vmatpush.bf16.msrb.mxu1 %v7727_v47  ;;  %v7751_v44 = vld [vmem:[#allocation3 + $0x18] sm:$0xff] }
 0x350   : > { %v4352_v30 = vunpack.c.l.b16 %v4297_v19  ;;  %v4306_v48 = vrot.slane %v4305_v59, 4 }
 0x352   : > { %4437 = vmatmul.bf16.gmra.mxu1 %v4357_v16  ;;  %v4348_v16 = vunpack.c.l.b16 %v4249_v14  ;;  %v4681_v14 = vrot.slane %v9724_v45, 5 }
 0x353   : > { %4582 = vmatmul.bf16.gmra.mxu2 %v7689_v41  ;;  %v4718_v41 = vunpack.c.l.b16 %v4668_v43 }
 0x354   : > { %4808 = vmatmul.bf16.gmra.mxu3 %v4728_v58  ;;  %v4719_v58 = vunpack.c.l.b16 %v4671_v33  ;;  %v4359_v28 = vpack.c.b16 %v4348_v16, %v4347_v35  ;;  %v4619_v33 = vld [vmem:[#allocation3 + $0x48] sm:$0xe]  ;;  %v4683_v35 = vrot.slane %v4681_v14, 4  ;;  %v4684_v16 = vrot.slane %v4128_v39, 5  ;;  %v5051_v39 = vld [vmem:[#allocation3 + $0x10] sm:$0xf] }
 0x355   : > { %v7271_v18 = vrot.slane %v4619_v33, 9  ;;  %v5084_v8 = vshll.u32 %v5051_v39, 16 }
 0x356   : > { %v4730_v52 = vpack.c.b16 %v4719_v58, %v4718_v41  ;;  %v7735_v41 = vld [vmem:[#allocation9 + $0x100] sm:$0xff]  ;;  %v7746_v58 = vld [vmem:[#allocation9 + $0x158] sm:$0xff]  ;;  %v4685_v1 = vsel %vm8643_vm14, %v4683_v35, %v4684_v16 }
 0x357   : > { %5370 = vmatpush.bf16.msrb.mxu2 %v7735_v41  ;;  %5617 = vmatpush.bf16.msra.mxu3 %v7746_v58  ;;  %v4723_v34 = vunpack.c.l.b16 %v4685_v1  ;;  %v5052_v41 = vld [vmem:[#allocation3 + $0x14] sm:$0x1]  ;;  %v5086_v58 = vrot.slane %v5084_v8, 5  ;;  %v5429_v8 = vld [vmem:[#allocation3 + $0x18] sm:$0xe] }
 0x35b   : > { %5618 = vmatpush.bf16.msra.mxu3 %v7745_v50  ;;  %v5094_v50 = vshll.u32 %v5052_v41, 16 }
 0x35f   : > { %5619 = vmatpush.bf16.msra.mxu3 %v7744_v22  ;;  %v7401_v22 = vrot.slane %v5428_v26, 9 }
 0x362   : > { %4442 = vmatmul.bf16.gmra.mxu1 %v4358_v2  ;;  %v4678_v2 = vsel %vm8643_vm14, %v4676_v10, %v4677_v31  ;;  %v4310_v10 = vrot.slane %v4308_v55, 5  ;;  %v4314_v31 = vrot.slane %v4312_v62, 4  ;;  %v5096_v55 = vrot.slane %v5094_v50, 5 }
 0x363   : > { %4587 = vmatmul.bf16.gmra.mxu2 %v7690_v53  ;;  %v4277_v53 = vrot.slane %v4275_v57, 4  ;;  %v4721_v4 = vunpack.c.l.b16 %v4678_v2  ;;  %v4620_v2 = vld [vmem:[#allocation3 + $0x54] sm:$0xe] }
 0x364   : > { %4813 = vmatmul.bf16.gmra.mxu3 %v4729_v5  ;;  %v4349_v5 = vunpack.c.l.b16 %v4263_v36  ;;  %v4315_v9 = vor.u32 %v4314_v31, %v4310_v10  ;;  %v7743_v36 = vld [vmem:[#allocation9 + $0x140] sm:$0xff]  ;;  %v7272_v27 = vrot.slane %v4620_v2, 9  ;;  %v4311_v17 = vsel %vm8477_vm11, %v4306_v48, %v4310_v10 }
 0x365   : > { %v4281_v12 = vor.u32 %v4280_v63, %v4277_v53  ;;  %v4731_v43 = vpack.c.b16 %v4721_v4, %v4720_v23  ;;  %5620 = vmatpush.bf16.msra.mxu3 %v7743_v36  ;;  %v5050_v53 = vld [vmem:[#allocation3 + $0xc] sm:$0xf]  ;;  %v7782_v63 = vld [vmem:[#allocation9 + $0x238] sm:$0xff]  ;;  %v4690_v23 = vrot.slane %v4688_v40, 4  ;;  %v4691_v4 = vrot.slane %v4129_v20, 5 }
 0x366   : > { %v4360_v7 = vpack.c.b16 %v4350_v24, %v4349_v5  ;;  %v4316_v5 = vrot.slane %v4315_v9, 4  ;;  %v4320_v24 = vrot.slane %v4318_v38, 5  ;;  %6436 = vmatpush.bf16.msra.mxu2 %v7782_v63  ;;  %v5078_v32 = vshll.u32 %v5050_v53, 16  ;;  %v7773_v20 = vld [vmem:[#allocation9 + $0x1f0] sm:$0xff] }
 0x367   : > { %v4282_v11 = vrot.slane %v4281_v12, 4  ;;  %v5075_v12 = vshrl.u32 %v5050_v53, 16  ;;  %v4689_v33 = vsel %vm8643_vm14, %v7272_v27, %v4688_v40  ;;  %v4353_v35 = vunpack.c.l.b16 %v4311_v17  ;;  %v7752_v9 = vld [vmem:[#allocation3 + $0x24] sm:$0xff] }
 0x368   : > { %v4724_v47 = vunpack.c.l.b16 %v4689_v33  ;;  %v7780_v17 = vld [vmem:[#allocation9 + $0x228] sm:$0xff] }
 0x369   : > { %v5077_v29 = vrot.slane %v5075_v12, 4 }
 0x372   : > { %4447 = vmatmul.bf16.gmra.mxu1 %v4359_v28  ;;  %v7763_v28 = vld [vmem:[#allocation9 + $0x1a0] sm:$0xff] }
 0x373   : > { %4592 = vmatmul.bf16.gmra.mxu2 %v7691_v37  ;;  %v4287_v37 = vsel %vm8477_vm11, %v4282_v11, %v4286_v15  ;;  %5811 = vmatpush.bf16.msra.mxu0 %v7763_v28  ;;  %v7760_v15 = vld [vmem:[#allocation9 + $0x188] sm:$0xff]  ;;  %v4692_v11 = vsel %vm8643_vm14, %v4690_v23, %v4691_v4 }
 0x374   : > { %4818 = vmatmul.bf16.gmra.mxu3 %v4730_v52  ;;  %v4682_v52 = vsel %vm8643_vm14, %v7271_v18, %v4681_v14  ;;  %v4351_v3 = vunpack.c.l.b16 %v4287_v37  ;;  %v4321_v14 = vsel %vm8477_vm11, %v4316_v5, %v4320_v24  ;;  %v5080_v18 = vrot.slane %v5078_v32, 5  ;;  %v7694_v37 = vld [vmem:[#allocation3 + $0x54] sm:$0xff]  ;;  %v5055_v5 = vld [vmem:[#allocation3 + $0x20] sm:$0x1]  ;;  %v7719_v24 = vld [vmem:[#allocation3 + $0xc] sm:$0xff] }
 0x375   : > { %v4722_v45 = vunpack.c.l.b16 %v4682_v52  ;;  %v4354_v16 = vunpack.c.l.b16 %v4321_v14  ;;  %v4725_v61 = vunpack.c.l.b16 %v4692_v11  ;;  %v5462_v52 = vrot.slane %v5051_v39, 5 }
 0x376   : > { %v4361_v57 = vpack.c.b16 %v4352_v30, %v4351_v3  ;;  %v5081_v49 = vor.u32 %v5080_v18, %v5077_v29  ;;  %v5465_v3 = vrot.slane %v5052_v41, 5  ;;  %v7781_v30 = vld [vmem:[#allocation9 + $0x230] sm:$0xff]  ;;  %v5118_v12 = vshll.u32 %v5055_v5, 16 }
 0x377   : > { %5812 = vmatpush.bf16.msra.mxu0 %v7762_v46  ;;  %v4732_v54 = vpack.c.b16 %v4723_v34, %v4722_v45  ;;  %v4362_v28 = vpack.c.b16 %v4354_v16, %v4353_v35  ;;  %v4733_v1 = vpack.c.b16 %v4725_v61, %v4724_v47  ;;  %v5464_v46 = vrot.slane %v5462_v52, 4  ;;  %v5053_v45 = vld [vmem:[#allocation3 + $0x18] sm:$0xf]  ;;  %v5054_v34 = vld [vmem:[#allocation3 + $0x1c] sm:$0xf]  ;;  %6437 = vmatpush.bf16.msra.mxu2 %v7781_v30  ;;  %v7772_v61 = vld [vmem:[#allocation9 + $0x1e8] sm:$0xff] }
 0x378   : > { %v5082_v6 = vrot.slane %v5081_v49, 4  ;;  %v5463_v10 = vsel %vm8643_vm14, %v7401_v22, %v5462_v52  ;;  %v5112_v59 = vshrl.u32 %v5054_v34, 16  ;;  %v5469_v32 = vrot.slane %v5054_v34, 5 }
 0x379   : > { %v5466_v31 = vsel %vm8643_vm14, %v5464_v46, %v5465_v3  ;;  %v5120_v33 = vrot.slane %v5118_v12, 5  ;;  %v7402_v11 = vrot.slane %v5429_v8, 9  ;;  %v5472_v29 = vrot.slane %v5055_v5, 5  ;;  %v7779_v5 = vld [vmem:[#allocation9 + $0x220] sm:$0xff] }
 0x37a   : > { %v5087_v21 = vsel %vm8477_vm11, %v5082_v6, %v5086_v58  ;;  %v5534_v40 = vunpack.c.l.b16 %v5466_v31  ;;  %v5114_v48 = vrot.slane %v5112_v59, 4 }
 0x37b   : > { %5813 = vmatpush.bf16.msra.mxu0 %v7761_v51  ;;  %v5283_v38 = vunpack.c.l.b16 %v5087_v21  ;;  %v5533_v51 = vunpack.c.l.b16 %v5463_v10  ;;  %6438 = vmatpush.bf16.msra.mxu2 %v7780_v17 }
 0x37d   : > { %v5549_v27 = vpack.c.b16 %v5534_v40, %v5533_v51 }
 0x37f   : > { %5814 = vmatpush.bf16.msra.mxu0 %v7760_v15  ;;  %6439 = vmatpush.bf16.msra.mxu2 %v7779_v5 }
 0x382   : > { %4452 = vmatmul.bf16.gmra.mxu1 %v4360_v7  ;;  %v5088_v7 = vshrl.u32 %v5051_v39, 16 }
 0x383   : > { %4597 = vmatmul.bf16.gmra.mxu2 %v7692_v13  ;;  %v7774_v13 = vld [vmem:[#allocation9 + $0x1f8] sm:$0xff] }
 0x384   : > { %4823 = vmatmul.bf16.gmra.mxu3 %v4731_v43  ;;  %v7759_v43 = vld [vmem:[#allocation9 + $0x180] sm:$0xff]  ;;  %6186 = vmatpush.bf16.msra.mxu1 %v7774_v13  ;;  %v5090_v56 = vrot.slane %v5088_v7, 4  ;;  %v5056_v7 = vld [vmem:[#allocation3 + $0x24] sm:$0xf]  ;;  %v9766_v13 = vld [vmem:[#allocation3 + $0x28] sm:$0xf] }
 0x385   : > { %5815 = vmatpush.bf16.msra.mxu0 %v7759_v43  ;;  %v5123_v35 = vshrl.u32 %v5056_v7, 16  ;;  %v5126_v16 = vshll.u32 %v5056_v7, 16  ;;  %v5132_v41 = vshll.u32 %v9766_v13, 16  ;;  %v7771_v7 = vld [vmem:[#allocation9 + $0x1e0] sm:$0xff] }
 0x386   : > { %v5091_v19 = vor.u32 %v5090_v56, %v5086_v58  ;;  %v5136_v58 = vshrl.u32 %v9766_v13, 16 }
 0x387   : > { %v5125_v26 = vrot.slane %v5123_v35, 4  ;;  %v5128_v6 = vrot.slane %v5126_v16, 5 }
 0x388   : > { %5816 = vmatmul.bf16.vlgmr.msra.gmra.mxu0 %v7751_v44  ;;  %v5092_v62 = vrot.slane %v5091_v19, 4  ;;  %6187 = vmatpush.bf16.msra.mxu1 %v7773_v20  ;;  %v5471_v44 = vrot.slane %v5469_v32, 4  ;;  %v5470_v19 = vsel %vm8643_vm14, %v7402_v11, %v5469_v32  ;;  %v7720_v20 = vld [vmem:[#allocation3 + $0x18] sm:$0xff] }
 0x389   : > { %v5535_v3 = vunpack.c.l.b16 %v5470_v19  ;;  %v5129_v21 = vor.u32 %v5128_v6, %v5125_v26  ;;  %v7721_v19 = vld [vmem:[#allocation3 + $0x24] sm:$0xff] }
 0x38a   : > { %v5097_v25 = vsel %vm8477_vm11, %v5092_v62, %v5096_v55  ;;  %v5473_v52 = vsel %vm8643_vm14, %v5471_v44, %v5472_v29  ;;  %v5134_v55 = vrot.slane %v5132_v41, 5  ;;  %v5138_v62 = vrot.slane %v5136_v58, 4  ;;  %v7754_v44 = vld [vmem:[#allocation3 + $0x3c] sm:$0xff] }
 0x38b   : > { %v5284_v36 = vunpack.c.l.b16 %v5097_v25  ;;  %v5536_v30 = vunpack.c.l.b16 %v5473_v52  ;;  %v5130_v51 = vrot.slane %v5129_v21, 4 }
 0x38c   : > { %6188 = vmatpush.bf16.msra.mxu1 %v7772_v61  ;;  %v5139_v25 = vor.u32 %v5138_v62, %v5134_v55  ;;  %v5061_v61 = vld [vmem:[#allocation3 + $0x38] sm:$0x1] }
 0x38d   : > { %v5299_v39 = vpack.c.b16 %v5284_v36, %v5283_v38  ;;  %v5430_v38 = vld [vmem:[#allocation3 + $0x24] sm:$0xe]  ;;  %v5166_v62 = vshll.u32 %v5061_v61, 16 }
 0x38e   : > { %v5140_v40 = vrot.slane %v5139_v25, 4 }
 0x390   : > { %6189 = vmatpush.bf16.msra.mxu1 %v7771_v7 }
 0x392   : > { %4457 = vmatmul.bf16.gmra.mxu1 %v4361_v57  ;;  %v5099_v57 = vshrl.u32 %v5053_v45, 16 }
 0x393   : > { %4602 = vmatmul.bf16.gmra.mxu2 %v7693_v0  ;;  %v5102_v0 = vshll.u32 %v5053_v45, 16  ;;  %v5058_v45 = vld [vmem:[#allocation3 + $0x2c] sm:$0x1] }
 0x394   : > { %4828 = vmatmul.bf16.gmra.mxu3 %v4732_v54  ;;  %v5108_v54 = vshll.u32 %v5054_v34, 16  ;;  %v5101_v2 = vrot.slane %v5099_v57, 4 }
 0x395   : > { %v5104_v53 = vrot.slane %v5102_v0, 5  ;;  %v5142_v0 = vshll.u32 %v5058_v45, 16 }
 0x396   : > { %v5110_v63 = vrot.slane %v5108_v54, 5  ;;  %v5476_v54 = vrot.slane %v9766_v13, 5 }
 0x397   : > { %v5105_v23 = vor.u32 %v5104_v53, %v5101_v2  ;;  %v5144_v2 = vrot.slane %v5142_v0, 5  ;;  %v7403_v53 = vrot.slane %v5430_v38, 9 }
 0x398   : > { %5821 = vmatmul.bf16.gmra.mxu0 %v7752_v9  ;;  %v5115_v4 = vor.u32 %v5114_v48, %v5110_v63  ;;  %v5550_v9 = vpack.c.b16 %v5536_v30, %v5535_v3  ;;  %v5479_v48 = vrot.slane %v5058_v45, 5  ;;  %v5431_v3 = vld [vmem:[#allocation3 + $0x30] sm:$0xe]  ;;  %v5062_v30 = vld [vmem:[#allocation3 + $0x3c] sm:$0xf] }
 0x399   : > { %v5106_v14 = vrot.slane %v5105_v23, 4  ;;  %v5145_v12 = vsel %vm8477_vm11, %v5140_v40, %v5144_v2  ;;  %v5477_v32 = vsel %vm8643_vm14, %v7403_v53, %v5476_v54  ;;  %v9800_v45 = vld [vmem:[#allocation3 + $0x40] sm:$0xf]  ;;  %v7770_v2 = vld [vmem:[#allocation9 + $0x1d8] sm:$0xff] }
 0x39a   : > { %v5116_v43 = vrot.slane %v5115_v4, 4  ;;  %v5537_v35 = vunpack.c.l.b16 %v5477_v32  ;;  %v5184_v38 = vshrl.u32 %v9800_v45, 16  ;;  %6190 = vmatpush.bf16.msra.mxu1 %v7770_v2 }
 0x39b   : > { %v5111_v50 = vsel %vm8477_vm11, %v5106_v14, %v5110_v63  ;;  %v5478_v63 = vrot.slane %v5476_v54, 4  ;;  %v5171_v54 = vshrl.u32 %v5062_v30, 16 }
 0x39c   : > { %v5285_v22 = vunpack.c.l.b16 %v5111_v50 }
 0x39d   : > { %v5480_v8 = vsel %vm8643_vm14, %v5478_v63, %v5479_v48 }
 0x39e   : > { %v5538_v16 = vunpack.c.l.b16 %v5480_v8 }
 0x3a0   : > { %v5551_v26 = vpack.c.b16 %v5538_v16, %v5537_v35 }
 0x3a2   : > { %4462 = vmatmul.bf16.gmra.mxu1 %v4362_v28  ;;  %v5121_v28 = vsel %vm8477_vm11, %v5116_v43, %v5120_v33 }
 0x3a3   : > { %4607 = vmatmul.bf16.gmra.mxu2 %v7694_v37  ;;  %v5286_v46 = vunpack.c.l.b16 %v5121_v28 }
 0x3a4   : > { %4833 = vmatmul.bf16.gmra.mxu3 %v4733_v1  ;;  %v7753_v1 = vld [vmem:[#allocation3 + $0x30] sm:$0xff] }
 0x3a5   : > { %v5300_v57 = vpack.c.b16 %v5286_v46, %v5285_v22 }
 0x3a8   : > { %5826 = vmatmul.bf16.gmra.mxu0 %v7753_v1 }
 0x3af   : > { %v4428_v15 = vpop.f32.mrf.mxu1 }
 0x3b2   : > { %4993 = vmatmul.bf16.vlgmr.msrb.gmra.mxu1 %v7719_v24  ;;  %v5059_v24 = vld [vmem:[#allocation3 + $0x30] sm:$0xf] }
 0x3b3   : > { %5371 = vmatmul.bf16.vlgmr.msrb.gmra.mxu2 %v5299_v39  ;;  %v9783_v39 = vld [vmem:[#allocation3 + $0x34] sm:$0xf]  ;;  %v5147_v17 = vshrl.u32 %v5059_v24, 16  ;;  %v5150_v14 = vshll.u32 %v5059_v24, 16 }
 0x3b4   : > { %5621 = vmatmul.bf16.vlgmr.msra.gmra.mxu3 %v5549_v27  ;;  %v5135_v27 = vsel %vm8477_vm11, %v5130_v51, %v5134_v55  ;;  %v5156_v43 = vshll.u32 %v9783_v39, 16  ;;  %v5160_v33 = vshrl.u32 %v9783_v39, 16  ;;  %v5483_v46 = vrot.slane %v9783_v39, 5 }
 0x3b5   : > { %v5287_v29 = vunpack.c.l.b16 %v5135_v27  ;;  %v5149_v41 = vrot.slane %v5147_v17, 4  ;;  %v5152_v58 = vrot.slane %v5150_v14, 5  ;;  %v5173_v27 = vrot.slane %v5171_v54, 4  ;;  %v5064_v17 = vld [vmem:[#allocation3 + $0x44] sm:$0x1] }
 0x3b6   : > { %v4573_v18 = vpop.f32.mrf.mxu2  ;;  %v5190_v16 = vshll.u32 %v5064_v17, 16 }
 0x3b7   : > { %v4574_v56 = vadd.f32 %v4573_v18, %v4428_v15  ;;  %v4799_v47 = vpop.f32.mrf.mxu3  ;;  %v4430_v49 = vpop.f32.mrf.mxu1  ;;  %v5288_v18 = vunpack.c.l.b16 %v5145_v12  ;;  %v5153_v6 = vor.u32 %v5152_v58, %v5149_v41  ;;  %v5186_v12 = vrot.slane %v5184_v38, 4 }
 0x3b8   : > { %5831 = vmatmul.bf16.gmra.mxu0 %v7754_v44  ;;  %v5490_v41 = vrot.slane %v9800_v45, 5 }
 0x3b9   : > { %v9774_v37 = vadd.f32 %v4799_v47, %v4574_v56  ;;  %v5158_v56 = vrot.slane %v5156_v43, 5  ;;  %v5162_v47 = vrot.slane %v5160_v33, 4  ;;  %v5301_v52 = vpack.c.b16 %v5288_v18, %v5287_v29  ;;  %v7722_v18 = vld [vmem:[#allocation3 + $0x30] sm:$0xff] }
 0x3ba   : > { %v5154_v21 = vrot.slane %v5153_v6, 4  ;;  %v5065_v6 = vld [vmem:[#allocation3 + $0x48] sm:$0xf] }
 0x3bb   : > { %v5163_v55 = vor.u32 %v5162_v47, %v5158_v56  ;;  %v5432_v47 = vld [vmem:[#allocation3 + $0x3c] sm:$0xe] }
 0x3bc   : > { %v5159_v63 = vsel %vm8477_vm11, %v5154_v21, %v5158_v56 }
 0x3bd   : > { %v5164_v25 = vrot.slane %v5163_v55, 4  ;;  %v5289_v32 = vunpack.c.l.b16 %v5159_v63  ;;  %v9817_v55 = vld [vmem:[#allocation3 + $0x4c] sm:$0xf] }
 0x3be   : > { %v4575_v34 = vpop.f32.mrf.mxu2 }
 0x3bf   : > { %v4576_v10 = vadd.f32 %v4575_v34, %v4430_v49  ;;  %v4801_v31 = vpop.f32.mrf.mxu3  ;;  %v4433_v59 = vpop.f32.mrf.mxu1  ;;  %v7778_v34 = vld [vmem:[#allocation9 + $0x218] sm:$0xff] }
 0x3c0   : > { %6440 = vmatpush.bf16.msra.mxu2 %v7778_v34 }
 0x3c1   : > { %v9781_v36 = vadd.f32 %v4801_v31, %v4576_v10  ;;  %v5168_v10 = vrot.slane %v5166_v62, 5  ;;  %v7404_v31 = vrot.slane %v5431_v3, 9 }
 0x3c2   : > { %4998 = vmatmul.bf16.gmra.mxu1 %v7720_v20  ;;  %v5485_v20 = vrot.slane %v5483_v46, 4 }
 0x3c3   : > { %5376 = vmatmul.bf16.gmra.mxu2 %v5300_v57  ;;  %v5486_v57 = vrot.slane %v5061_v61, 5  ;;  %v5169_v48 = vsel %vm8477_vm11, %v5164_v25, %v5168_v10  ;;  %v5484_v24 = vsel %vm8643_vm14, %v7404_v31, %v5483_v46  ;;  %v7769_v25 = vld [vmem:[#allocation9 + $0x1d0] sm:$0xff]  ;;  %v5195_v31 = vshrl.u32 %v5065_v6, 16 }
 0x3c4   : > { %5626 = vmatmul.bf16.gmra.mxu3 %v5550_v9  ;;  %v5180_v9 = vshll.u32 %v9800_v45, 16  ;;  %v5290_v8 = vunpack.c.l.b16 %v5169_v48  ;;  %v5539_v7 = vunpack.c.l.b16 %v5484_v24  ;;  %6191 = vmatpush.bf16.msra.mxu1 %v7769_v25  ;;  %v5067_v24 = vld [vmem:[#allocation3 + $0x50] sm:$0x1] }
 0x3c5   : > { %v5487_v39 = vsel %vm8643_vm14, %v5485_v20, %v5486_v57  ;;  %v5198_v20 = vshll.u32 %v5065_v6, 16  ;;  %v5204_v57 = vshll.u32 %v9817_v55, 16  ;;  %v5197_v2 = vrot.slane %v5195_v31, 4 }
 0x3c6   : > { %v4578_v15 = vpop.f32.mrf.mxu2  ;;  %v5302_v35 = vpack.c.b16 %v5290_v8, %v5289_v32 }
 0x3c7   : > { %v4579_v23 = vadd.f32 %v4578_v15, %v4433_v59  ;;  %v4804_v4 = vpop.f32.mrf.mxu3  ;;  %v4435_v13 = vpop.f32.mrf.mxu1  ;;  %v5174_v59 = vshll.u32 %v5062_v30, 16  ;;  %v7755_v15 = vld [vmem:[#allocation3 + $0x48] sm:$0xff]  ;;  %v5206_v63 = vrot.slane %v5204_v57, 5  ;;  %v5070_v57 = vld [vmem:[#allocation3 + $0x5c] sm:$0x1] }
 0x3c8   : > { %5836 = vmatmul.bf16.gmra.mxu0 %v7755_v15 }
 0x3c9   : > { %v9795_v11 = vadd.f32 %v4804_v4, %v4579_v23  ;;  %v5176_v23 = vrot.slane %v5174_v59, 5  ;;  %v5182_v4 = vrot.slane %v5180_v9, 5  ;;  %v7756_v59 = vld [vmem:[#allocation3 + $0x54] sm:$0xff] }
 0x3cb   : > { %v5177_v43 = vor.u32 %v5176_v23, %v5173_v27  ;;  %v5187_v33 = vor.u32 %v5186_v12, %v5182_v4  ;;  %v7723_v23 = vld [vmem:[#allocation3 + $0x3c] sm:$0xff] }
 0x3ce   : > { %v4580_v49 = vpop.f32.mrf.mxu2 }
 0x3cf   : > { %v4581_v50 = vadd.f32 %v4580_v49, %v4435_v13  ;;  %v4806_v28 = vpop.f32.mrf.mxu3  ;;  %v4438_v1 = vpop.f32.mrf.mxu1  ;;  %v5540_v13 = vunpack.c.l.b16 %v5487_v39  ;;  %v5178_v49 = vrot.slane %v5177_v43, 4  ;;  %v5433_v43 = vld [vmem:[#allocation3 + $0x48] sm:$0xe] }
 0x3d1   : > { %v9797_v22 = vadd.f32 %v4806_v28, %v4581_v50  ;;  %v5552_v56 = vpack.c.b16 %v5540_v13, %v5539_v7  ;;  %v5188_v50 = vrot.slane %v5187_v33, 4  ;;  %v5192_v28 = vrot.slane %v5190_v16, 5  ;;  %v5068_v33 = vld [vmem:[#allocation3 + $0x54] sm:$0xf] }
 0x3d2   : > { %5003 = vmatmul.bf16.gmra.mxu1 %v7721_v19  ;;  %v7405_v19 = vrot.slane %v5432_v47, 9  ;;  %v5183_v46 = vsel %vm8477_vm11, %v5178_v49, %v5182_v4  ;;  %v5214_v13 = vshll.u32 %v5067_v24, 16  ;;  %v5219_v49 = vshrl.u32 %v5068_v33, 16 }
 0x3d3   : > { %5381 = vmatmul.bf16.gmra.mxu2 %v5301_v52  ;;  %v5492_v52 = vrot.slane %v5490_v41, 4  ;;  %v5193_v45 = vsel %vm8477_vm11, %v5188_v50, %v5192_v28  ;;  %v5291_v9 = vunpack.c.l.b16 %v5183_v46  ;;  %v5222_v50 = vshll.u32 %v5068_v33, 16 }
 0x3d4   : > { %5631 = vmatmul.bf16.gmra.mxu3 %v5551_v26  ;;  %v7777_v26 = vld [vmem:[#allocation9 + $0x210] sm:$0xff]  ;;  %v5491_v34 = vsel %vm8643_vm14, %v7405_v19, %v5490_v41  ;;  %v5292_v38 = vunpack.c.l.b16 %v5193_v45  ;;  %v5216_v16 = vrot.slane %v5214_v13, 5  ;;  %v7406_v41 = vrot.slane %v5433_v43, 9  ;;  %v7757_v45 = vld [vmem:[#allocation3 + $0x60] sm:$0xff] }
 0x3d5   : > { %6441 = vmatpush.bf16.msra.mxu2 %v7777_v26  ;;  %v7768_v26 = vld [vmem:[#allocation9 + $0x1c8] sm:$0xff]  ;;  %v5507_v33 = vrot.slane %v5070_v57, 5 }
 0x3d6   : > { %v4583_v0 = vpop.f32.mrf.mxu2  ;;  %v5303_v4 = vpack.c.b16 %v5292_v38, %v5291_v9  ;;  %6192 = vmatpush.bf16.msra.mxu1 %v7768_v26  ;;  %v9851_v13 = vld [vmem:[#allocation3 + $0x64] sm:$0xf] }
 0x3d7   : > { %v4584_v51 = vadd.f32 %v4583_v0, %v4438_v1  ;;  %v4809_v40 = vpop.f32.mrf.mxu3  ;;  %v4440_v53 = vpop.f32.mrf.mxu1  ;;  %v5493_v1 = vrot.slane %v5064_v17, 5  ;;  %v5208_v0 = vshrl.u32 %v9817_v55, 16 }
 0x3d8   : > { %5841 = vmatmul.bf16.gmra.mxu0 %v7756_v59 }
 0x3d9   : > { %v9808_v5 = vadd.f32 %v4809_v40, %v4584_v51  ;;  %v5494_v21 = vsel %vm8643_vm14, %v5492_v52, %v5493_v1  ;;  %v5541_v51 = vunpack.c.l.b16 %v5491_v34  ;;  %v5210_v48 = vrot.slane %v5208_v0, 4 }
 0x3da   : > { %v5542_v40 = vunpack.c.l.b16 %v5494_v21  ;;  %v5221_v34 = vrot.slane %v5219_v49, 4  ;;  %v5224_v21 = vrot.slane %v5222_v50, 5  ;;  %v7767_v49 = vld [vmem:[#allocation9 + $0x1c0] sm:$0xff] }
 0x3db   : > { %v5211_v7 = vor.u32 %v5210_v48, %v5206_v63  ;;  %6193 = vmatpush.bf16.msra.mxu1 %v7767_v49 }
 0x3dc   : > { %v5553_v32 = vpack.c.b16 %v5542_v40, %v5541_v51  ;;  %v5225_v38 = vor.u32 %v5224_v21, %v5221_v34  ;;  %v5238_v40 = vshll.u32 %v5070_v57, 16  ;;  %v5073_v21 = vld [vmem:[#allocation3 + $0x68] sm:$0x1]  ;;  %v7725_v57 = vld [vmem:[#allocation3 + $0x54] sm:$0xff] }
 0x3de   : > { %v4585_v14 = vpop.f32.mrf.mxu2 }
 0x3df   : > { %v4586_v44 = vadd.f32 %v4585_v14, %v4440_v53  ;;  %v4811_v29 = vpop.f32.mrf.mxu3  ;;  %v4443_v58 = vpop.f32.mrf.mxu1  ;;  %v5200_v53 = vrot.slane %v5198_v20, 5  ;;  %v5497_v14 = vrot.slane %v9817_v55, 5 }
 0x3e1   : > { %v9815_v61 = vadd.f32 %v4811_v29, %v4586_v44  ;;  %v5201_v8 = vor.u32 %v5200_v53, %v5197_v2  ;;  %v9834_v44 = vld [vmem:[#allocation3 + $0x58] sm:$0xf]  ;;  %v7776_v29 = vld [vmem:[#allocation9 + $0x208] sm:$0xff] }
 0x3e2   : > { %5008 = vmatmul.bf16.gmra.mxu1 %v7722_v18  ;;  %6442 = vmatpush.bf16.msra.mxu2 %v7776_v29  ;;  %v5228_v28 = vshll.u32 %v9834_v44, 16  ;;  %v5232_v19 = vshrl.u32 %v9834_v44, 16 }
 0x3e3   : > { %5386 = vmatmul.bf16.gmra.mxu2 %v5302_v35  ;;  %v5202_v18 = vrot.slane %v5201_v8, 4  ;;  %v5212_v35 = vrot.slane %v5211_v7, 4  ;;  %v5071_v8 = vld [vmem:[#allocation3 + $0x60] sm:$0xf]  ;;  %v7775_v7 = vld [vmem:[#allocation9 + $0x200] sm:$0xff] }
 0x3e4   : > { %5636 = vmatmul.bf16.gmra.mxu3 %v5552_v56  ;;  %v5500_v56 = vrot.slane %v5067_v24, 5  ;;  %v5230_v25 = vrot.slane %v5228_v28, 5 }
 0x3e5   : > { %v5207_v55 = vsel %vm8477_vm11, %v5202_v18, %v5206_v63  ;;  %v7724_v63 = vld [vmem:[#allocation3 + $0x48] sm:$0xff] }
 0x3e6   : > { %v4588_v62 = vpop.f32.mrf.mxu2  ;;  %v5293_v31 = vunpack.c.l.b16 %v5207_v55  ;;  %6443 = vmatpush.bf16.msra.mxu2 %v7775_v7 }
 0x3e7   : > { %v4589_v3 = vadd.f32 %v4588_v62, %v4443_v58  ;;  %v4814_v30 = vpop.f32.mrf.mxu3  ;;  %v4445_v10 = vpop.f32.mrf.mxu1  ;;  %v5499_v58 = vrot.slane %v5497_v14, 4  ;;  %v5217_v62 = vsel %vm8477_vm11, %v5212_v35, %v5216_v16  ;;  %v5243_v35 = vshrl.u32 %v5071_v8, 16 }
 0x3e8   : > { %v5294_v20 = vunpack.c.l.b16 %v5217_v62  ;;  %5846 = vmatmul.bf16.gmra.mxu0 %v7757_v45 }
 0x3e9   : > { %v9829_v54 = vadd.f32 %v4814_v30, %v4589_v3  ;;  %v5498_v3 = vsel %vm8643_vm14, %v7406_v41, %v5497_v14  ;;  %v5501_v30 = vsel %vm8643_vm14, %v5499_v58, %v5500_v56  ;;  %v5246_v58 = vshll.u32 %v5071_v8, 16 }
 0x3ea   : > { %v5543_v0 = vunpack.c.l.b16 %v5498_v3  ;;  %v5544_v59 = vunpack.c.l.b16 %v5501_v30  ;;  %v5304_v48 = vpack.c.b16 %v5294_v20, %v5293_v31  ;;  %v5252_v56 = vshll.u32 %v9851_v13, 16 }
 0x3eb   : > { %v5245_v55 = vrot.slane %v5243_v35, 4  ;;  %v5248_v62 = vrot.slane %v5246_v58, 5 }
 0x3ec   : > { %v5254_v3 = vrot.slane %v5252_v56, 5 }
 0x3ee   : > { %v4590_v39 = vpop.f32.mrf.mxu2 }
 0x3ef   : > { %v4591_v15 = vadd.f32 %v4590_v39, %v4445_v10  ;;  %v4816_v27 = vpop.f32.mrf.mxu3  ;;  %v4448_v12 = vpop.f32.mrf.mxu1  ;;  %v5234_v10 = vrot.slane %v5232_v19, 4  ;;  %v5554_v39 = vpack.c.b16 %v5544_v59, %v5543_v0  ;;  %v5249_v0 = vor.u32 %v5248_v62, %v5245_v55 }
 0x3f1   : > { %v9831_v17 = vadd.f32 %v4816_v27, %v4591_v15  ;;  %v5235_v51 = vor.u32 %v5234_v10, %v5230_v25  ;;  %v5504_v27 = vrot.slane %v9834_v44, 5 }
 0x3f2   : > { %5013 = vmatmul.bf16.gmra.mxu1 %v7723_v23  ;;  %v5226_v23 = vrot.slane %v5225_v38, 4 }
 0x3f3   : > { %5391 = vmatmul.bf16.gmra.mxu2 %v5303_v4  ;;  %v5236_v4 = vrot.slane %v5235_v51, 4  ;;  %v5506_v43 = vrot.slane %v5504_v27, 4 }
 0x3f4   : > { %5641 = vmatmul.bf16.gmra.mxu3 %v5553_v32  ;;  %v5434_v32 = vld [vmem:[#allocation3 + $0x54] sm:$0xe]  ;;  %v5231_v18 = vsel %vm8477_vm11, %v5226_v23, %v5230_v25 }
 0x3f5   : > { %v7407_v14 = vrot.slane %v5434_v32, 9  ;;  %v5295_v26 = vunpack.c.l.b16 %v5231_v18 }
 0x3f6   : > { %v4593_v47 = vpop.f32.mrf.mxu2 }
 0x3f7   : > { %v4594_v52 = vadd.f32 %v4593_v47, %v4448_v12  ;;  %v4819_v1 = vpop.f32.mrf.mxu3  ;;  %v4450_v6 = vpop.f32.mrf.mxu1  ;;  %v5240_v12 = vrot.slane %v5238_v40, 5  ;;  %v5256_v47 = vshrl.u32 %v9851_v13, 16  ;;  %v5505_v19 = vsel %vm8643_vm14, %v7407_v14, %v5504_v27 }
 0x3f8   : > { %v5545_v45 = vunpack.c.l.b16 %v5505_v19  ;;  %v5511_v40 = vrot.slane %v9851_v13, 5 }
 0x3f9   : > { %v9842_v46 = vadd.f32 %v4819_v1, %v4594_v52  ;;  %v5241_v44 = vsel %vm8477_vm11, %v5236_v4, %v5240_v12  ;;  %v5508_v52 = vsel %vm8643_vm14, %v5506_v43, %v5507_v33  ;;  %v7758_v1 = vld [vmem:[#allocation3 + $0x6c] sm:$0xff]  ;;  %v5258_v30 = vrot.slane %v5256_v47, 4 }
 0x3fa   : > { %v5546_v34 = vunpack.c.l.b16 %v5508_v52  ;;  %5851 = vmatmul.bf16.gmra.mxu0 %v7758_v1  ;;  %v5513_v4 = vrot.slane %v5511_v40, 4  ;;  %v5514_v12 = vrot.slane %v5073_v21, 5  ;;  %v5875_v52 = vld [vmem:[#allocation3 + $0x20] sm:$0x1] }
 0x3fb   : > { %v5259_v59 = vor.u32 %v5258_v30, %v5254_v3 }
 0x3fc   : > { %v5555_v51 = vpack.c.b16 %v5546_v34, %v5545_v45 }
 0x3fe   : > { %v4595_v9 = vpop.f32.mrf.mxu2 }
 0x3ff   : > { %v4596_v2 = vadd.f32 %v4595_v9, %v4450_v6  ;;  %v4821_v53 = vpop.f32.mrf.mxu3  ;;  %v4453_v24 = vpop.f32.mrf.mxu1  ;;  %v5296_v6 = vunpack.c.l.b16 %v5241_v44  ;;  %v5262_v9 = vshll.u32 %v5073_v21, 16  ;;  %v7726_v21 = vld [vmem:[#allocation3 + $0x60] sm:$0xff] }
 0x401   : > { %v9848_v15 = vadd.f32 %v4821_v53, %v4596_v2  ;;  %v5305_v10 = vpack.c.b16 %v5296_v6, %v5295_v26  ;;  %v5435_v53 = vld [vmem:[#allocation3 + $0x60] sm:$0xe]  ;;  %v5264_v27 = vrot.slane %v5262_v9, 5 }
 0x402   : > { %5018 = vmatmul.bf16.gmra.mxu1 %v7724_v63  ;;  %v5873_v63 = vld [vmem:[#allocation3 + $0x18] sm:$0xf]  ;;  %v7408_v23 = vrot.slane %v5435_v53, 9  ;;  %v5876_v53 = vld [vmem:[#allocation3 + $0x24] sm:$0xf] }
 0x403   : > { %5396 = vmatmul.bf16.gmra.mxu2 %v5304_v48  ;;  %v5874_v48 = vld [vmem:[#allocation3 + $0x1c] sm:$0xf]  ;;  %v5898_v32 = vshrl.u32 %v5873_v63, 16  ;;  %v5901_v8 = vshll.u32 %v5873_v63, 16  ;;  %v5877_v63 = vld [vmem:[#allocation3 + $0x28] sm:$0xf] }
 0x404   : > { %5646 = vmatmul.bf16.gmra.mxu3 %v5554_v39  ;;  %v5260_v39 = vrot.slane %v5259_v59, 4  ;;  %v5907_v7 = vshll.u32 %v5874_v48, 16  ;;  %v5911_v14 = vshrl.u32 %v5874_v48, 16  ;;  %v5512_v35 = vsel %vm8643_vm14, %v7408_v23, %v5511_v40 }
 0x405   : > { %v5903_v56 = vrot.slane %v5901_v8, 5  ;;  %v5547_v1 = vunpack.c.l.b16 %v5512_v35  ;;  %v6285_v30 = vrot.slane %v5874_v48, 5  ;;  %v6288_v40 = vrot.slane %v5875_v52, 5 }
 0x406   : > { %v4598_v29 = vpop.f32.mrf.mxu2  ;;  %v5265_v44 = vsel %vm8477_vm11, %v5260_v39, %v5264_v27  ;;  %v5909_v47 = vrot.slane %v5907_v7, 5  ;;  %v5913_v49 = vrot.slane %v5911_v14, 4  ;;  %v5925_v8 = vshll.u32 %v5876_v53, 16 }
 0x407   : > { %v4599_v16 = vadd.f32 %v4598_v29, %v4453_v24  ;;  %v4824_v41 = vpop.f32.mrf.mxu3  ;;  %v4455_v50 = vpop.f32.mrf.mxu1  ;;  %v5250_v24 = vrot.slane %v5249_v0, 4  ;;  %v5298_v19 = vunpack.c.l.b16 %v5265_v44  ;;  %v5931_v7 = vshll.u32 %v5877_v63, 16 }
 0x408   : > { %v5914_v55 = vor.u32 %v5913_v49, %v5909_v47  ;;  %v5935_v14 = vshrl.u32 %v5877_v63, 16 }
 0x409   : > { %v9859_v28 = vadd.f32 %v4824_v41, %v4599_v16  ;;  %v5255_v29 = vsel %vm8477_vm11, %v5250_v24, %v5254_v3  ;;  %v5515_v16 = vsel %vm8643_vm14, %v5513_v4, %v5514_v12  ;;  %v5900_v41 = vrot.slane %v5898_v32, 4 }
 0x40a   : > { %v5548_v26 = vunpack.c.l.b16 %v5515_v16  ;;  %v5917_v3 = vshll.u32 %v5875_v52, 16  ;;  %v5915_v59 = vrot.slane %v5914_v55, 4  ;;  %v5922_v4 = vshrl.u32 %v5876_v53, 16 }
 0x40b   : > { %v5904_v6 = vor.u32 %v5903_v56, %v5900_v41  ;;  %v5927_v16 = vrot.slane %v5925_v8, 5  ;;  %v5933_v41 = vrot.slane %v5931_v7, 5  ;;  %v5937_v56 = vrot.slane %v5935_v14, 4 }
 0x40c   : > { %v5919_v9 = vrot.slane %v5917_v3, 5  ;;  %v5924_v35 = vrot.slane %v5922_v4, 4  ;;  %v6292_v3 = vrot.slane %v5877_v63, 5 }
 0x40d   : > { %v5905_v0 = vrot.slane %v5904_v6, 4  ;;  %v5938_v6 = vor.u32 %v5937_v56, %v5933_v41 }
 0x40e   : > { %v4600_v25 = vpop.f32.mrf.mxu2  ;;  %v5920_v39 = vsel %vm8477_vm11, %v5915_v59, %v5919_v9  ;;  %v6294_v59 = vrot.slane %v6292_v3, 4 }
 0x40f   : > { %v4601_v31 = vadd.f32 %v4600_v25, %v4455_v50  ;;  %v4826_v20 = vpop.f32.mrf.mxu3  ;;  %v4458_v38 = vpop.f32.mrf.mxu1  ;;  %v5297_v50 = vunpack.c.l.b16 %v5255_v29  ;;  %v5910_v48 = vsel %vm8477_vm11, %v5905_v0, %v5909_v47  ;;  %v6107_v29 = vunpack.c.l.b16 %v5920_v39  ;;  %v5878_v47 = vld [vmem:[#allocation3 + $0x2c] sm:$0x1] }
 0x410   : > { %v5941_v55 = vshll.u32 %v5878_v47, 16  ;;  %v6295_v9 = vrot.slane %v5878_v47, 5 }
 0x411   : > { %v9866_v2 = vadd.f32 %v4826_v20, %v4601_v31  ;;  %v5306_v25 = vpack.c.b16 %v5298_v19, %v5297_v50  ;;  %v5556_v20 = vpack.c.b16 %v5548_v26, %v5547_v1  ;;  %v5928_v26 = vor.u32 %v5927_v16, %v5924_v35 }
 0x412   : > { %5023 = vmatmul.bf16.gmra.mxu1 %v7725_v57 }
 0x413   : > { %5401 = vmatmul.bf16.gmra.mxu2 %v5305_v10  ;;  %v6251_v10 = vld [vmem:[#allocation3 + $0x18] sm:$0xe] }
 0x414   : > { %5651 = vmatmul.bf16.gmra.mxu3 %v5555_v51  ;;  %v6287_v51 = vrot.slane %v6285_v30, 4 }
 0x416   : > { %v4603_v43 = vpop.f32.mrf.mxu2  ;;  %v6289_v23 = vsel %vm8643_vm14, %v6287_v51, %v6288_v40 }
 0x417   : > { %v4604_v13 = vadd.f32 %v4603_v43, %v4458_v38  ;;  %v4829_v33 = vpop.f32.mrf.mxu3  ;;  %v4460_v18 = vpop.f32.mrf.mxu1  ;;  %v7537_v38 = vrot.slane %v6251_v10, 9  ;;  %v6357_v44 = vunpack.c.l.b16 %v6289_v23  ;;  %v5929_v10 = vrot.slane %v5928_v26, 4 }
 0x418   : > { %v6296_v23 = vsel %vm8643_vm14, %v6294_v59, %v6295_v9 }
 0x419   : > { %v9876_v58 = vadd.f32 %v4829_v33, %v4604_v13  ;;  %v6286_v27 = vsel %vm8643_vm14, %v7537_v38, %v6285_v30  ;;  %v6106_v33 = vunpack.c.l.b16 %v5910_v48 }
 0x41b   : > { %v6122_v50 = vpack.c.b16 %v6107_v29, %v6106_v33  ;;  %v6359_v29 = vunpack.c.l.b16 %v6296_v23 }
 0x41e   : > { %v4605_v62 = vpop.f32.mrf.mxu2 }
 0x41f   : > { %v4606_v45 = vadd.f32 %v4605_v62, %v4460_v18  ;;  %v4831_v34 = vpop.f32.mrf.mxu3  ;;  %v4463_v31 = vpop.f32.mrf.mxu1  ;;  %v6356_v18 = vunpack.c.l.b16 %v6286_v27 }
 0x421   : > { %v9878_v57 = vadd.f32 %v4831_v34, %v4606_v45  ;;  %v6372_v19 = vpack.c.b16 %v6357_v44, %v6356_v18  ;;  %v6252_v34 = vld [vmem:[#allocation3 + $0x24] sm:$0xe]  ;;  %v5881_v18 = vld [vmem:[#allocation3 + $0x38] sm:$0x1] }
 0x422   : > { %5028 = vmatmul.bf16.gmra.mxu1 %v7726_v21  ;;  %v5879_v21 = vld [vmem:[#allocation3 + $0x30] sm:$0xf]  ;;  %v7538_v0 = vrot.slane %v6252_v34, 9  ;;  %v5883_v34 = vld [vmem:[#allocation3 + $0x40] sm:$0xf] }
 0x423   : > { %5406 = vmatmul.bf16.gmra.mxu2 %v5306_v25  ;;  %v5880_v25 = vld [vmem:[#allocation3 + $0x34] sm:$0xf]  ;;  %v5946_v38 = vshrl.u32 %v5879_v21, 16  ;;  %v5949_v51 = vshll.u32 %v5879_v21, 16  ;;  %v5979_v9 = vshll.u32 %v5883_v34, 16 }
 0x424   : > { %5656 = vmatmul.bf16.gmra.mxu3 %v5556_v20  ;;  %v5943_v20 = vrot.slane %v5941_v55, 5  ;;  %v5955_v40 = vshll.u32 %v5880_v25, 16  ;;  %v5959_v53 = vshrl.u32 %v5880_v25, 16  ;;  %v6293_v27 = vsel %vm8643_vm14, %v7538_v0, %v6292_v3 }
 0x425   : > { %v5948_v4 = vrot.slane %v5946_v38, 4  ;;  %v6358_v33 = vunpack.c.l.b16 %v6293_v27  ;;  %v6299_v56 = vrot.slane %v5880_v25, 5  ;;  %v6302_v3 = vrot.slane %v5881_v18, 5 }
 0x426   : > { %v4608_v24 = vpop.f32.mrf.mxu2  ;;  %v5957_v8 = vrot.slane %v5955_v40, 5  ;;  %v5961_v7 = vrot.slane %v5959_v53, 4  ;;  %v5983_v38 = vshrl.u32 %v5883_v34, 16  ;;  %v5981_v23 = vrot.slane %v5979_v9, 5 }
 0x427   : > { %v4609_v12 = vadd.f32 %v4608_v24, %v4463_v31  ;;  %v4834_v32 = vpop.f32.mrf.mxu3  ;;  %v4465_v43 = vpop.f32.mrf.mxu1  ;;  %v5939_v31 = vrot.slane %v5938_v6, 4 }
 0x428   : > { %v5962_v35 = vor.u32 %v5961_v7, %v5957_v8 }
 0x429   : > { %v9888_v13 = vadd.f32 %v4834_v32, %v4609_v12  ;;  %v5944_v39 = vsel %vm8477_vm11, %v5939_v31, %v5943_v20  ;;  %v5951_v32 = vrot.slane %v5949_v51, 5 }
 0x42a   : > { %v5963_v26 = vrot.slane %v5962_v35, 4  ;;  %v6254_v35 = vld [vmem:[#allocation3 + $0x3c] sm:$0xe] }
 0x42b   : > { %v5952_v44 = vor.u32 %v5951_v32, %v5948_v4  ;;  %v5985_v4 = vrot.slane %v5983_v38, 4 }
 0x42e   : > { %v4610_v49 = vpop.f32.mrf.mxu2 }
 0x42f   : > { %v4611_v52 = vadd.f32 %v4610_v49, %v4465_v43  ;;  %v4836_v1 = vpop.f32.mrf.mxu3  ;;  %v4994_v62 = vpop.f32.mrf.mxu1  ;;  %v6109_v43 = vunpack.c.l.b16 %v5944_v39 }
 0x430   : > { %v5034_v45 = vadd.f32 %v4994_v62, %v9774_v37  ;;  %v5934_v37 = vsel %vm8477_vm11, %v5929_v10, %v5933_v41  ;;  %v5965_v41 = vshll.u32 %v5881_v18, 16  ;;  %v6301_v62 = vrot.slane %v6299_v56, 4 }
 0x431   : > { %v9890_v30 = vadd.f32 %v4836_v1, %v4611_v52  ;;  %v6108_v14 = vunpack.c.l.b16 %v5934_v37  ;;  %v5953_v1 = vrot.slane %v5952_v44, 4  ;;  %v6306_v44 = vrot.slane %v5883_v34, 5 }
 0x432   : > { %6194 = vmatmul.bf16.vlgmr.msra.gmra.mxu1 %v6122_v50  ;;  %v6373_v50 = vpack.c.b16 %v6359_v29, %v6358_v33  ;;  %v5967_v6 = vrot.slane %v5965_v41, 5  ;;  %v6303_v31 = vsel %vm8643_vm14, %v6301_v62, %v6302_v3  ;;  %v5986_v33 = vor.u32 %v5985_v4, %v5981_v23  ;;  %v5886_v41 = vld [vmem:[#allocation3 + $0x4c] sm:$0xf] }
 0x433   : > { %6444 = vmatmul.bf16.vlgmr.msra.gmra.mxu2 %v6372_v19  ;;  %v6123_v49 = vpack.c.b16 %v6109_v43, %v6108_v14  ;;  %v6253_v19 = vld [vmem:[#allocation3 + $0x30] sm:$0xe]  ;;  %v5958_v21 = vsel %vm8477_vm11, %v5953_v1, %v5957_v8 }
 0x434   : > { %v7539_v55 = vrot.slane %v6253_v19, 9  ;;  %v5968_v10 = vsel %vm8477_vm11, %v5963_v26, %v5967_v6  ;;  %v6110_v53 = vunpack.c.l.b16 %v5958_v21  ;;  %v7540_v19 = vrot.slane %v6254_v35, 9  ;;  %v5889_v35 = vld [vmem:[#allocation3 + $0x58] sm:$0xf] }
 0x435   : > { %v6003_v6 = vshll.u32 %v5886_v41, 16 }
 0x436   : > { %v5372_v63 = vpop.f32.mrf.mxu2  ;;  %v6307_v21 = vsel %vm8643_vm14, %v7540_v19, %v6306_v44 }
 0x437   : > { %v9893_v48 = vadd.f32 %v5372_v63, %v5034_v45  ;;  %v4996_v24 = vpop.f32.mrf.mxu1  ;;  %v5882_v45 = vld [vmem:[#allocation3 + $0x3c] sm:$0xf]  ;;  %v6111_v63 = vunpack.c.l.b16 %v5968_v10 }
 0x438   : > { %v5035_v12 = vadd.f32 %v4996_v24, %v9781_v36  ;;  %v5970_v20 = vshrl.u32 %v5882_v45, 16  ;;  %v5973_v59 = vshll.u32 %v5882_v45, 16  ;;  %v6361_v24 = vunpack.c.l.b16 %v6303_v31 }
 0x439   : > { %v6124_v8 = vpack.c.b16 %v6111_v63, %v6110_v53  ;;  %v5887_v53 = vld [vmem:[#allocation3 + $0x50] sm:$0x1] }
 0x43a   : > { %v5972_v39 = vrot.slane %v5970_v20, 4  ;;  %v5975_v27 = vrot.slane %v5973_v59, 5  ;;  %v6005_v20 = vrot.slane %v6003_v6, 5 }
 0x43c   : > { %v5976_v43 = vor.u32 %v5975_v27, %v5972_v39  ;;  %v6013_v39 = vshll.u32 %v5887_v53, 16  ;;  %v6313_v27 = vrot.slane %v5886_v41, 5 }
 0x43e   : > { %v5374_v16 = vpop.f32.mrf.mxu2 }
 0x43f   : > { %v9904_v47 = vadd.f32 %v5374_v16, %v5035_v12  ;;  %v4999_v52 = vpop.f32.mrf.mxu1  ;;  %v5884_v12 = vld [vmem:[#allocation3 + $0x44] sm:$0x1]  ;;  %v5885_v16 = vld [vmem:[#allocation3 + $0x48] sm:$0xf] }
 0x440   : > { %v5036_v36 = vadd.f32 %v4999_v52, %v9795_v11  ;;  %v6300_v11 = vsel %vm8643_vm14, %v7539_v55, %v6299_v56  ;;  %v5989_v29 = vshll.u32 %v5884_v12, 16  ;;  %v5977_v56 = vrot.slane %v5976_v43, 4 }
 0x441   : > { %v6360_v37 = vunpack.c.l.b16 %v6300_v11  ;;  %v6308_v52 = vrot.slane %v6306_v44, 4  ;;  %v5994_v1 = vshrl.u32 %v5885_v16, 16  ;;  %v5997_v26 = vshll.u32 %v5885_v16, 16 }
 0x442   : > { %6199 = vmatmul.bf16.gmra.mxu1 %v6123_v49  ;;  %v5987_v49 = vrot.slane %v5986_v33, 4  ;;  %v6007_v55 = vshrl.u32 %v5886_v41, 16  ;;  %v6015_v33 = vrot.slane %v6013_v39, 5  ;;  %v6316_v44 = vrot.slane %v5887_v53, 5  ;;  %v5892_v39 = vld [vmem:[#allocation3 + $0x64] sm:$0xf] }
 0x443   : > { %6449 = vmatmul.bf16.gmra.mxu2 %v6373_v50  ;;  %v6374_v7 = vpack.c.b16 %v6361_v24, %v6360_v37  ;;  %v5991_v50 = vrot.slane %v5989_v29, 5  ;;  %v5996_v10 = vrot.slane %v5994_v1, 4  ;;  %v5999_v31 = vrot.slane %v5997_v26, 5 }
 0x444   : > { %v6009_v59 = vrot.slane %v6007_v55, 4  ;;  %v6031_v1 = vshrl.u32 %v5889_v35, 16 }
 0x445   : > { %v5992_v34 = vsel %vm8477_vm11, %v5987_v49, %v5991_v50  ;;  %v6000_v63 = vor.u32 %v5999_v31, %v5996_v10 }
 0x446   : > { %v5377_v25 = vpop.f32.mrf.mxu2  ;;  %v6113_v38 = vunpack.c.l.b16 %v5992_v34  ;;  %v6010_v37 = vor.u32 %v6009_v59, %v6005_v20  ;;  %v6033_v10 = vrot.slane %v6031_v1, 4 }
 0x447   : > { %v9915_v0 = vadd.f32 %v5377_v25, %v5036_v36  ;;  %v5001_v51 = vpop.f32.mrf.mxu1  ;;  %v6309_v36 = vrot.slane %v5884_v12, 5 }
 0x448   : > { %v5037_v40 = vadd.f32 %v5001_v51, %v9797_v22  ;;  %v6362_v51 = vunpack.c.l.b16 %v6307_v21  ;;  %v6011_v43 = vrot.slane %v6010_v37, 4  ;;  %v6256_v37 = vld [vmem:[#allocation3 + $0x54] sm:$0xe] }
 0x449   : > { %v6310_v25 = vsel %vm8643_vm14, %v6308_v52, %v6309_v36  ;;  %v6027_v36 = vshll.u32 %v5889_v35, 16 }
 0x44e   : > { %v5379_v32 = vpop.f32.mrf.mxu2 }
 0x44f   : > { %v9918_v14 = vadd.f32 %v5379_v32, %v5037_v40  ;;  %v5004_v18 = vpop.f32.mrf.mxu1  ;;  %v6363_v40 = vunpack.c.l.b16 %v6310_v25  ;;  %v6255_v32 = vld [vmem:[#allocation3 + $0x48] sm:$0xe]  ;;  %v6029_v25 = vrot.slane %v6027_v36, 5 }
 0x450   : > { %v5038_v22 = vadd.f32 %v5004_v18, %v9808_v5  ;;  %v5982_v5 = vsel %vm8477_vm11, %v5977_v56, %v5981_v23  ;;  %v7541_v29 = vrot.slane %v6255_v32, 9  ;;  %v6315_v18 = vrot.slane %v6313_v27, 4 }
 0x451   : > { %v6112_v9 = vunpack.c.l.b16 %v5982_v5  ;;  %v6375_v12 = vpack.c.b16 %v6363_v40, %v6362_v51  ;;  %v6016_v56 = vsel %vm8477_vm11, %v6011_v43, %v6015_v33  ;;  %v6034_v51 = vor.u32 %v6033_v10, %v6029_v25 }
 0x452   : > { %6204 = vmatmul.bf16.gmra.mxu1 %v6124_v8  ;;  %v6317_v49 = vsel %vm8643_vm14, %v6315_v18, %v6316_v44  ;;  %v7542_v32 = vrot.slane %v6256_v37, 9  ;;  %v6051_v33 = vshll.u32 %v5892_v39, 16  ;;  %v5895_v37 = vld [vmem:[#allocation3 + $0x70] sm:$0xf] }
 0x453   : > { %6454 = vmatmul.bf16.gmra.mxu2 %v6374_v7  ;;  %v6125_v4 = vpack.c.b16 %v6113_v38, %v6112_v9  ;;  %v6001_v7 = vrot.slane %v6000_v63, 4  ;;  %v6320_v63 = vrot.slane %v5889_v35, 5 }
 0x455   : > { %v6006_v16 = vsel %vm8477_vm11, %v6001_v7, %v6005_v20 }
 0x456   : > { %v5382_v62 = vpop.f32.mrf.mxu2  ;;  %v6114_v55 = vunpack.c.l.b16 %v6006_v16  ;;  %v6321_v16 = vsel %vm8643_vm14, %v7542_v32, %v6320_v63 }
 0x457   : > { %v9921_v3 = vadd.f32 %v5382_v62, %v5038_v22  ;;  %v5006_v45 = vpop.f32.mrf.mxu1  ;;  %v5888_v22 = vld [vmem:[#allocation3 + $0x54] sm:$0xf]  ;;  %v6115_v62 = vunpack.c.l.b16 %v6016_v56 }
 0x458   : > { %v5039_v11 = vadd.f32 %v5006_v45, %v9815_v61  ;;  %v6018_v50 = vshrl.u32 %v5888_v22, 16  ;;  %v6021_v52 = vshll.u32 %v5888_v22, 16  ;;  %v6365_v45 = vunpack.c.l.b16 %v6317_v49 }
 0x459   : > { %v6126_v20 = vpack.c.b16 %v6115_v62, %v6114_v55  ;;  %v5893_v55 = vld [vmem:[#allocation3 + $0x68] sm:$0x1] }
 0x45a   : > { %v6020_v34 = vrot.slane %v6018_v50, 4  ;;  %v6023_v21 = vrot.slane %v6021_v52, 5  ;;  %v6053_v50 = vrot.slane %v6051_v33, 5 }
 0x45c   : > { %v6024_v38 = vor.u32 %v6023_v21, %v6020_v34  ;;  %v6061_v34 = vshll.u32 %v5893_v55, 16  ;;  %v6327_v21 = vrot.slane %v5892_v39, 5 }
 0x45e   : > { %v5384_v24 = vpop.f32.mrf.mxu2 }
 0x45f   : > { %v9932_v23 = vadd.f32 %v5384_v24, %v5039_v11  ;;  %v5009_v8 = vpop.f32.mrf.mxu1  ;;  %v5890_v11 = vld [vmem:[#allocation3 + $0x5c] sm:$0x1]  ;;  %v5891_v24 = vld [vmem:[#allocation3 + $0x60] sm:$0xf] }
 0x460   : > { %v5040_v61 = vadd.f32 %v5009_v8, %v9829_v54  ;;  %v6314_v54 = vsel %vm8643_vm14, %v7541_v29, %v6313_v27  ;;  %v6037_v40 = vshll.u32 %v5890_v11, 16  ;;  %v6025_v27 = vrot.slane %v6024_v38, 4 }
 0x461   : > { %v6364_v5 = vunpack.c.l.b16 %v6314_v54  ;;  %v6322_v8 = vrot.slane %v6320_v63, 4  ;;  %v6042_v7 = vshrl.u32 %v5891_v24, 16  ;;  %v6045_v43 = vshll.u32 %v5891_v24, 16 }
 0x462   : > { %6209 = vmatmul.bf16.gmra.mxu1 %v6125_v4  ;;  %v6035_v4 = vrot.slane %v6034_v51, 4  ;;  %v6055_v29 = vshrl.u32 %v5892_v39, 16  ;;  %v6063_v51 = vrot.slane %v6061_v34, 5  ;;  %v6330_v63 = vrot.slane %v5893_v55, 5  ;;  %v5817_v34 = vpop.f32.mrf.mxu0 }
 0x463   : > { %6459 = vmatmul.bf16.gmra.mxu2 %v6375_v12  ;;  %v6376_v59 = vpack.c.b16 %v6365_v45, %v6364_v5  ;;  %v6039_v12 = vrot.slane %v6037_v40, 5  ;;  %v6044_v56 = vrot.slane %v6042_v7, 4  ;;  %v6047_v49 = vrot.slane %v6045_v43, 5 }
 0x464   : > { %v6057_v52 = vrot.slane %v6055_v29, 4  ;;  %v6079_v7 = vshrl.u32 %v5895_v37, 16 }
 0x465   : > { %v6040_v35 = vsel %vm8477_vm11, %v6035_v4, %v6039_v12  ;;  %v6048_v62 = vor.u32 %v6047_v49, %v6044_v56  ;;  %v5622_v49 = vpop.f32.mrf.mxu3 }
 0x466   : > { %v5387_v41 = vpop.f32.mrf.mxu2  ;;  %v6117_v1 = vunpack.c.l.b16 %v6040_v35  ;;  %v6058_v5 = vor.u32 %v6057_v52, %v6053_v50  ;;  %v6081_v56 = vrot.slane %v6079_v7, 4 }
 0x467   : > { %v9943_v19 = vadd.f32 %v5387_v41, %v5040_v61  ;;  %v5011_v26 = vpop.f32.mrf.mxu1  ;;  %v6323_v61 = vrot.slane %v5890_v11, 5 }
 0x468   : > { %v5041_v6 = vadd.f32 %v5011_v26, %v9831_v17  ;;  %v6366_v26 = vunpack.c.l.b16 %v6321_v16  ;;  %v6059_v38 = vrot.slane %v6058_v5, 4 }
 0x469   : > { %v6324_v41 = vsel %vm8643_vm14, %v6322_v8, %v6323_v61  ;;  %v6075_v61 = vshll.u32 %v5895_v37, 16 }
 0x46e   : > { %v5389_v31 = vpop.f32.mrf.mxu2 }
 0x46f   : > { %v9946_v9 = vadd.f32 %v5389_v31, %v5041_v6  ;;  %v5014_v53 = vpop.f32.mrf.mxu1  ;;  %v6367_v6 = vunpack.c.l.b16 %v6324_v41  ;;  %v6257_v31 = vld [vmem:[#allocation3 + $0x60] sm:$0xe]  ;;  %v6077_v41 = vrot.slane %v6075_v61, 5 }
 0x470   : > { %v5042_v17 = vadd.f32 %v5014_v53, %v9842_v46  ;;  %v6030_v46 = vsel %vm8477_vm11, %v6025_v27, %v6029_v25  ;;  %v7543_v40 = vrot.slane %v6257_v31, 9  ;;  %v6329_v53 = vrot.slane %v6327_v21, 4 }
 0x471   : > { %v6116_v36 = vunpack.c.l.b16 %v6030_v46  ;;  %v6377_v11 = vpack.c.b16 %v6367_v6, %v6366_v26  ;;  %v6064_v27 = vsel %vm8477_vm11, %v6059_v38, %v6063_v51  ;;  %v6082_v6 = vor.u32 %v6081_v56, %v6077_v41  ;;  %v5624_v51 = vpop.f32.mrf.mxu3 }
 0x472   : > { %6214 = vmatmul.bf16.gmra.mxu1 %v6126_v20  ;;  %v6331_v4 = vsel %vm8643_vm14, %v6329_v53, %v6330_v63 }
 0x473   : > { %6464 = vmatmul.bf16.gmra.mxu2 %v6376_v59  ;;  %v6127_v10 = vpack.c.b16 %v6117_v1, %v6116_v36  ;;  %v6049_v59 = vrot.slane %v6048_v62, 4 }
 0x475   : > { %v6054_v24 = vsel %vm8477_vm11, %v6049_v59, %v6053_v50 }
 0x476   : > { %v5392_v18 = vpop.f32.mrf.mxu2  ;;  %v6118_v29 = vunpack.c.l.b16 %v6054_v24 }
 0x477   : > { %v9949_v44 = vadd.f32 %v5392_v18, %v5042_v17  ;;  %v5016_v22 = vpop.f32.mrf.mxu1  ;;  %v5894_v17 = vld [vmem:[#allocation3 + $0x6c] sm:$0xf]  ;;  %v6119_v18 = vunpack.c.l.b16 %v6064_v27 }
 0x478   : > { %v5043_v54 = vadd.f32 %v5016_v22, %v9848_v15  ;;  %v6066_v12 = vshrl.u32 %v5894_v17, 16  ;;  %v6069_v8 = vshll.u32 %v5894_v17, 16  ;;  %v6369_v22 = vunpack.c.l.b16 %v6331_v4  ;;  %v5819_v4 = vpop.f32.mrf.mxu0 }
 0x479   : > { %v6128_v52 = vpack.c.b16 %v6119_v18, %v6118_v29 }
 0x47a   : > { %v6068_v35 = vrot.slane %v6066_v12, 4  ;;  %v6071_v16 = vrot.slane %v6069_v8, 5 }
 0x47c   : > { %v6072_v26 = vor.u32 %v6071_v16, %v6068_v35  ;;  %v5662_v16 = vadd.f32 %v5622_v49, %v9893_v48  ;;  %v10006_v48 = vld [vmem:[%s10254_s20] ss:$0 sm:$0xff] }
 0x47e   : > { %v5394_v45 = vpop.f32.mrf.mxu2 }
 0x47f   : > { %v9960_v25 = vadd.f32 %v5394_v45, %v5043_v54  ;;  %v5019_v20 = vpop.f32.mrf.mxu1  ;;  %v5896_v54 = vld [vmem:[#allocation3 + $0x74] sm:$0x1]  ;;  %v6258_v45 = vld [vmem:[#allocation3 + $0x6c] sm:$0xe] }
 0x480   : > { %v5044_v15 = vadd.f32 %v5019_v20, %v9859_v28  ;;  %v6328_v28 = vsel %vm8643_vm14, %v7543_v40, %v6327_v21  ;;  %v6085_v62 = vshll.u32 %v5896_v54, 16  ;;  %v6073_v21 = vrot.slane %v6072_v26, 4  ;;  %v5822_v42 = vpop.f32.mrf.mxu0 }
 0x481   : > { %v6368_v46 = vunpack.c.l.b16 %v6328_v28  ;;  %v7544_v31 = vrot.slane %v6258_v45, 9  ;;  %v10255_v45 = vld [vmem:[#allocation27_spill] sm:$0xff] }
 0x482   : > { %6219 = vmatmul.bf16.gmra.mxu1 %v6127_v10  ;;  %v6083_v10 = vrot.slane %v6082_v6, 4  ;;  %v6078_v53 = vsel %vm8477_vm11, %v6073_v21, %v6077_v41  ;;  %v5663_v6 = vadd.f32 %v5624_v51, %v9904_v47 }
 0x483   : > { %6469 = vmatmul.bf16.gmra.mxu2 %v6377_v11  ;;  %v6378_v1 = vpack.c.b16 %v6369_v22, %v6368_v46  ;;  %v6087_v11 = vrot.slane %v6085_v62, 5  ;;  %v6120_v24 = vunpack.c.l.b16 %v6078_v53 }
 0x486   : > { %v5397_v39 = vpop.f32.mrf.mxu2 }
 0x487   : > { %v9971_v32 = vadd.f32 %v5397_v39, %v5044_v15  ;;  %v5021_v43 = vpop.f32.mrf.mxu1  ;;  %v6337_v15 = vrot.slane %v5896_v54, 5 }
 0x488   : > { %v5045_v33 = vadd.f32 %v5021_v43, %v9866_v2  ;;  %v6334_v2 = vrot.slane %v5895_v37, 5  ;;  %v5824_v56 = vpop.f32.mrf.mxu0 }
 0x48a   : > { %v6336_v20 = vrot.slane %v6334_v2, 4  ;;  %v6335_v63 = vsel %vm8643_vm14, %v7544_v31, %v6334_v2  ;;  %v5858_v2 = vadd.f32 %v5819_v4, %v5663_v6 }
 0x48b   : > { %v6370_v27 = vunpack.c.l.b16 %v6335_v63 }
 0x48c   : > { %v6338_v17 = vsel %vm8643_vm14, %v6336_v20, %v6337_v15 }
 0x48d   : > { %v6371_v28 = vunpack.c.l.b16 %v6338_v17 }
 0x48e   : > { %v5399_v50 = vpop.f32.mrf.mxu2 }
 0x48f   : > { %v9974_v36 = vadd.f32 %v5399_v50, %v5045_v33  ;;  %v5024_v55 = vpop.f32.mrf.mxu1  ;;  %v6379_v7 = vpack.c.b16 %v6371_v28, %v6370_v27  ;;  %v5627_v33 = vpop.f32.mrf.mxu3  ;;  %v5857_v50 = vadd.f32 %v5817_v34, %v5662_v16 }
 0x490   : > { %v5046_v5 = vadd.f32 %v5024_v55, %v9876_v58  ;;  %v6088_v58 = vsel %vm8477_vm11, %v6083_v10, %v6087_v11  ;;  %v5827_v62 = vpop.f32.mrf.mxu0  ;;  %v5664_v47 = vadd.f32 %v5627_v33, %v9915_v0 }
 0x491   : > { %v6121_v39 = vunpack.c.l.b16 %v6088_v58  ;;  %v10256_v58 = vld [vmem:[#allocation28_spill] sm:$0xff] }
 0x492   : > { %6224 = vmatmul.bf16.gmra.mxu1 %v6128_v52  ;;  %v10000_v52 = vld [vmem:[%s10253_s19] ss:$0 sm:$0xff]  ;;  %v5859_v51 = vadd.f32 %v5822_v42, %v5664_v47  ;;  %s8058_s19 = sshra.s32 %s6608_s23, 4  ;;  %s8059_s19 = int_to_ptr.hbm [resolvable:$true] %s8058_s19 }
 0x493   : > { %6474 = vmatmul.bf16.gmra.mxu2 %v6378_v1  ;;  %v6129_v61 = vpack.c.b16 %v6121_v39, %v6120_v24  ;;  %s8060_s22 = scalar_lea.hbm %s8059_s19, 128  ;;  %p8065_p3 = scmp.lt.s32.totalorder %s8059_s19, %s10272_s14 }
 0x494   : > { %p8061_p11 = scmp.ne.s32.totalorder %s8059_s19, %s8060_s22  ;;  %p8066_p5 = scmp.lt.s32.totalorder %s8064_s12, %s8060_s22 }
 0x496   : > { %v5402_v59 = vpop.f32.mrf.mxu2  ;;  %p8062_p0 = pnand %p8061_p11, %p8292_p6  ;;  %p8067_p7 = por %p8066_p5, %p8065_p3 }
 0x497   : > { %v9977_v38 = vadd.f32 %v5402_v59, %v5046_v5  ;;  %v5026_v40 = vpop.f32.mrf.mxu1  ;;  %v5629_v22 = vpop.f32.mrf.mxu3 }
 0x498   : > { %v5047_v37 = vadd.f32 %v5026_v40, %v9878_v57  ;;  %v5829_v53 = vpop.f32.mrf.mxu0  ;;  %v5665_v24 = vadd.f32 %v5629_v22, %v9918_v14  ;;  %p8063_p2 = pneg %p8062_p0 }
 0x49a   : > { %p8068_p8 = pnand %p8067_p7, %p8063_p2 }
 0x49e   : > { %v5404_v12 = vpop.f32.mrf.mxu2 }
 0x49f   : > { %v9988_v8 = vadd.f32 %v5404_v12, %v5047_v37  ;;  %v5029_v60 = vpop.f32.mrf.mxu1  ;;  %v5632_v1 = vpop.f32.mrf.mxu3  ;;  %v5860_v12 = vadd.f32 %v5824_v56, %v5665_v24 }
 0x4a0   : > { %v5048_v43 = vadd.f32 %v5029_v60, %v9888_v13  ;;  %v5832_v33 = vpop.f32.mrf.mxu0 }
 0x4a2   : > { %6229 = vmatmul.bf16.gmra.mxu1 %v6129_v61 }
 0x4a3   : > { %6479 = vmatmul.bf16.gmra.mxu2 %v6379_v7  ;;  %v10257_v7 = vld [vmem:[#allocation31_spill] sm:$0xff] }
 0x4a6   : > { %v5407_v29 = vpop.f32.mrf.mxu2 }
 0x4a7   : > { %v9991_v18 = vadd.f32 %v5407_v29, %v5048_v43  ;;  %v5031_v57 = vpop.f32.mrf.mxu1  ;;  %v5634_v20 = vpop.f32.mrf.mxu3  ;;  %v5666_v29 = vadd.f32 %v5632_v1, %v9921_v3 }
 0x4a8   : > { %v5049_v46 = vadd.f32 %v5031_v57, %v9890_v30  ;;  %v5667_v6 = vadd.f32 %v5634_v20, %v9932_v23  ;;  %v5834_v1 = vpop.f32.mrf.mxu0 }
 0x4ae   : > { %v5409_v35 = vpop.f32.mrf.mxu2 }
 0x4af   : > { %v9995_v41 = vadd.f32 %v5409_v35, %v5049_v46  ;;  %v6195_v54 = vpop.f32.mrf.mxu1  ;;  %v5637_v4 = vpop.f32.mrf.mxu3  ;;  %v5861_v35 = vadd.f32 %v5827_v62, %v5666_v29 }
 0x4b0   : > { %v6235_v13 = vadd.f32 %v6195_v54, %v5857_v50  ;;  %v10258_v54 = vld [vmem:[#allocation32_spill] sm:$0xff]  ;;  %v5668_v47 = vadd.f32 %v5637_v4, %v9943_v19 }
 0x4b6   : > { %v6445_v26 = vpop.f32.mrf.mxu2 }
 0x4b7   : > { %v6485_v30 = vadd.f32 %v6445_v26, %v6235_v13  ;;  %v6197_v49 = vpop.f32.mrf.mxu1  ;;  %v5639_v56 = vpop.f32.mrf.mxu3 }
 0x4b8   : > { %v6236_v21 = vadd.f32 %v6197_v49, %v5858_v2  ;;  %v5862_v2 = vadd.f32 %v5829_v53, %v5667_v6 }
 0x4b9   : > { %v6505_v55 = vmul.f32 %v10000_v52, %v6485_v30 }
 0x4bb   : > { %v6525_v5 = vadd.f32 %v10006_v48, %v6505_v55 }
 0x4bd   : > { %v6541_v34 = vadd.f32 %v6525_v5, %v10255_v45  ;;  %v10259_v5 = vld [vmem:[#allocation33_spill] sm:$0xff] }
 0x4be   : > { %v6447_v10 = vpop.f32.mrf.mxu2 }
 0x4bf   : > { %v6557_v11 = vmax.f32 %v6541_v34, 0.0  ;;  %v6486_v31 = vadd.f32 %v6447_v10, %v6236_v21  ;;  %v6200_v15 = vpop.f32.mrf.mxu1  ;;  %v5642_v21 = vpop.f32.mrf.mxu3 }
 0x4c0   : > { %v6237_v17 = vadd.f32 %v6200_v15, %v5859_v51  ;;  %v5837_v15 = vpop.f32.mrf.mxu0 }
 0x4c1   : > { %6573 = vst [vmem:[%s9675_s1] sm:$0xff] %v6557_v11  ;;  %v6506_v59 = vmul.f32 %v10000_v52, %v6486_v31 }
 0x4c3   : > { %v6526_v40 = vadd.f32 %v10006_v48, %v6506_v59  ;;  %v5863_v59 = vadd.f32 %v5832_v33, %v5668_v47 }
 0x4c5   : > { %v6542_v63 = vadd.f32 %v6526_v40, %v10256_v58  ;;  %v10260_v40 = vld [vmem:[#allocation34_spill] sm:$0xff] }
 0x4c6   : > { %v6450_v37 = vpop.f32.mrf.mxu2 }
 0x4c7   : > { %v6558_v39 = vmax.f32 %v6542_v63, 0.0  ;;  %v6487_v0 = vadd.f32 %v6450_v37, %v6237_v17  ;;  %v6202_v27 = vpop.f32.mrf.mxu1  ;;  %v5669_v17 = vadd.f32 %v5639_v56, %v9946_v9  ;;  %v5644_v24 = vpop.f32.mrf.mxu3 }
 0x4c8   : > { %v6238_v43 = vadd.f32 %v6202_v27, %v5860_v12  ;;  %v5839_v4 = vpop.f32.mrf.mxu0  ;;  %v10261_v12 = vld [vmem:[#allocation35_spill] sm:$0xff] }
 0x4c9   : > { %6574 = vst [vmem:[%s9675_s1 + $0x8] sm:$0xff] %v6558_v39  ;;  %v6507_v28 = vmul.f32 %v10000_v52, %v6487_v0  ;;  %v5864_v27 = vadd.f32 %v5834_v1, %v5669_v17 }
 0x4cb   : > { %v6527_v61 = vadd.f32 %v10006_v48, %v6507_v28 }
 0x4cd   : > { %v6543_v60 = vadd.f32 %v6527_v61, %v10257_v7 }
 0x4ce   : > { %v6452_v42 = vpop.f32.mrf.mxu2 }
 0x4cf   : > { %v6559_v57 = vmax.f32 %v6543_v60, 0.0  ;;  %v6488_v14 = vadd.f32 %v6452_v42, %v6238_v43  ;;  %v6205_v46 = vpop.f32.mrf.mxu1  ;;  %v5670_v43 = vadd.f32 %v5642_v21, %v9949_v44 }
 0x4d0   : > { %v6239_v13 = vadd.f32 %v6205_v46, %v5861_v35  ;;  %v5842_v56 = vpop.f32.mrf.mxu0 }
 0x4d1   : > { %6575 = vst [vmem:[%s9675_s1 + $0x10] sm:$0xff] %v6559_v57  ;;  %v6508_v22 = vmul.f32 %v10000_v52, %v6488_v14  ;;  %v5647_v57 = vpop.f32.mrf.mxu3  ;;  %v5865_v14 = vadd.f32 %v5837_v15, %v5670_v43 }
 0x4d3   : > { %v6528_v16 = vadd.f32 %v10006_v48, %v6508_v22  ;;  %v10262_v22 = vld [vmem:[#allocation36_spill] sm:$0xff] }
 0x4d5   : > { %v6544_v50 = vadd.f32 %v6528_v16, %v10258_v54 }
 0x4d6   : > { %v6455_v26 = vpop.f32.mrf.mxu2 }
 0x4d7   : > { %v6560_v30 = vmax.f32 %v6544_v50, 0.0  ;;  %v6489_v3 = vadd.f32 %v6455_v26, %v6239_v13  ;;  %v6207_v49 = vpop.f32.mrf.mxu1  ;;  %v5671_v50 = vadd.f32 %v5644_v24, %v9960_v25 }
 0x4d8   : > { %v6240_v34 = vadd.f32 %v6207_v49, %v5862_v2  ;;  %v10263_v49 = vld [vmem:[#allocation37_spill] sm:$0xff] }
 0x4d9   : > { %6576 = vst [vmem:[%s9675_s1 + $0x18] sm:$0xff] %v6560_v30  ;;  %v6509_v55 = vmul.f32 %v10000_v52, %v6489_v3  ;;  %v5866_v30 = vadd.f32 %v5839_v4, %v5671_v50  ;;  %v5649_v1 = vpop.f32.mrf.mxu3 }
 0x4db   : > { %v6529_v62 = vadd.f32 %v10006_v48, %v6509_v55 }
 0x4dd   : > { %v6545_v45 = vadd.f32 %v6529_v62, %v10259_v5  ;;  %v5672_v5 = vadd.f32 %v5647_v57, %v9971_v32 }
 0x4de   : > { %v6457_v10 = vpop.f32.mrf.mxu2 }
 0x4df   : > { %v6561_v11 = vmax.f32 %v6545_v45, 0.0  ;;  %v6490_v23 = vadd.f32 %v6457_v10, %v6240_v34  ;;  %v6210_v31 = vpop.f32.mrf.mxu1  ;;  %v5844_v34 = vpop.f32.mrf.mxu0  ;;  %v5867_v47 = vadd.f32 %v5842_v56, %v5672_v5 }
 0x4e0   : > { %v6241_v58 = vadd.f32 %v6210_v31, %v5863_v59 }
 0x4e1   : > { %6577 = vst [vmem:[%s9675_s1 + $0x20] sm:$0xff] %v6561_v11  ;;  %v6510_v20 = vmul.f32 %v10000_v52, %v6490_v23  ;;  %v10264_v23 = vld [vmem:[#allocation38_spill] sm:$0xff]  ;;  %v5652_v15 = vpop.f32.mrf.mxu3 }
 0x4e3   : > { %v6530_v51 = vadd.f32 %v10006_v48, %v6510_v20 }
 0x4e5   : > { %v6546_v53 = vadd.f32 %v6530_v51, %v10260_v40  ;;  %v5673_v51 = vadd.f32 %v5649_v1, %v9974_v36 }
 0x4e6   : > { %v6460_v63 = vpop.f32.mrf.mxu2 }
 0x4e7   : > { %v6562_v37 = vmax.f32 %v6546_v53, 0.0  ;;  %v6491_v19 = vadd.f32 %v6460_v63, %v6241_v58  ;;  %v6212_v39 = vpop.f32.mrf.mxu1  ;;  %v5847_v63 = vpop.f32.mrf.mxu0  ;;  %v5868_v17 = vadd.f32 %v5844_v34, %v5673_v51 }
 0x4e8   : > { %v6242_v7 = vadd.f32 %v6212_v39, %v5864_v27  ;;  %v5674_v27 = vadd.f32 %v5652_v15, %v9977_v38 }
 0x4e9   : > { %6578 = vst [vmem:[%s9675_s1 + $0x28] sm:$0xff] %v6562_v37  ;;  %v6511_v0 = vmul.f32 %v10000_v52, %v6491_v19  ;;  %v10265_v19 = vld [vmem:[#allocation21_spill] sm:$0xff]  ;;  %v5654_v4 = vpop.f32.mrf.mxu3 }
 0x4ea   : > { %v5675_v57 = vadd.f32 %v5654_v4, %v9988_v8 }
 0x4eb   : > { %v6531_v28 = vadd.f32 %v10006_v48, %v6511_v0 }
 0x4ed   : > { %v6547_v61 = vadd.f32 %v6531_v28, %v10261_v12 }
 0x4ee   : > { %v6462_v60 = vpop.f32.mrf.mxu2 }
 0x4ef   : > { %v6563_v33 = vmax.f32 %v6547_v61, 0.0  ;;  %v6492_v9 = vadd.f32 %v6462_v60, %v6242_v7  ;;  %v6215_v42 = vpop.f32.mrf.mxu1  ;;  %v5869_v7 = vadd.f32 %v5847_v63, %v5674_v27  ;;  %v5849_v43 = vpop.f32.mrf.mxu0 }
 0x4f0   : > { %v6243_v16 = vadd.f32 %v6215_v42, %v5865_v14 }
 0x4f1   : > { %6579 = vst [vmem:[%s9675_s1 + $0x30] sm:$0xff] %v6563_v33  ;;  %v6512_v29 = vmul.f32 %v10000_v52, %v6492_v9  ;;  %v10266_v33 = vld [vmem:[#allocation22_spill] sm:$0xff] }
 0x4f3   : > { %v6532_v46 = vadd.f32 %v10006_v48, %v6512_v29 }
 0x4f5   : > { %v6548_v35 = vadd.f32 %v6532_v46, %v10262_v22 }
 0x4f6   : > { %v6465_v54 = vpop.f32.mrf.mxu2 }
 0x4f7   : > { %v6564_v13 = vmax.f32 %v6548_v35, 0.0  ;;  %v6493_v44 = vadd.f32 %v6465_v54, %v6243_v16  ;;  %v6217_v26 = vpop.f32.mrf.mxu1  ;;  %v5657_v35 = vpop.f32.mrf.mxu3  ;;  %v5870_v16 = vadd.f32 %v5849_v43, %v5675_v57  ;;  %v10267_v54 = vld [vmem:[#allocation24_spill] sm:$0xff] }
 0x4f8   : > { %v6244_v2 = vadd.f32 %v6217_v26, %v5866_v30 }
 0x4f9   : > { %6580 = vst [vmem:[%s9675_s1 + $0x38] sm:$0xff] %v6564_v13  ;;  %v6513_v6 = vmul.f32 %v10000_v52, %v6493_v44  ;;  %v5852_v44 = vpop.f32.mrf.mxu0 }
 0x4fb   : > { %v6533_v3 = vadd.f32 %v10006_v48, %v6513_v6  ;;  %v5676_v6 = vadd.f32 %v5657_v35, %v9991_v18 }
 0x4fd   : > { %v6549_v55 = vadd.f32 %v6533_v3, %v10263_v49  ;;  %v5871_v49 = vadd.f32 %v5852_v44, %v5676_v6 }
 0x4fe   : > { %v6467_v62 = vpop.f32.mrf.mxu2 }
 0x4ff   : > { %v6565_v45 = vmax.f32 %v6549_v55, 0.0  ;;  %v6494_v25 = vadd.f32 %v6467_v62, %v6244_v2  ;;  %v6220_v21 = vpop.f32.mrf.mxu1  ;;  %v5659_v2 = vpop.f32.mrf.mxu3  ;;  %v10269_v62 = vld [vmem:[#allocation26_spill] sm:$0xff] }
 0x500   : > { %v6245_v20 = vadd.f32 %v6220_v21, %v5867_v47  ;;  %v5677_v34 = vadd.f32 %v5659_v2, %v9995_v41 }
 0x501   : > { %6581 = vst [vmem:[%s9675_s1 + $0x40] sm:$0xff] %v6565_v45  ;;  %v6514_v10 = vmul.f32 %v10000_v52, %v6494_v25 }
 0x503   : > { %v6534_v11 = vadd.f32 %v10006_v48, %v6514_v10  ;;  %v5854_v10 = vpop.f32.mrf.mxu0 }
 0x505   : > { %v6550_v31 = vadd.f32 %v6534_v11, %v10264_v23  ;;  %v5872_v23 = vadd.f32 %v5854_v10, %v5677_v34 }
 0x506   : > { %v6470_v59 = vpop.f32.mrf.mxu2 }
 0x507   : > { %v6566_v40 = vmax.f32 %v6550_v31, 0.0  ;;  %v6495_v32 = vadd.f32 %v6470_v59, %v6245_v20  ;;  %v6222_v53 = vpop.f32.mrf.mxu1  ;;  %v10270_v20 = vld [vmem:[#allocation29_spill] sm:$0xff] }
 0x508   : > { %v6246_v39 = vadd.f32 %v6222_v53, %v5868_v17 }
 0x509   : > { %6582 = vst [vmem:[%s9675_s1 + $0x48] sm:$0xff] %v6566_v40  ;;  %v6515_v58 = vmul.f32 %v10000_v52, %v6495_v32 }
 0x50b   : > { %v6535_v37 = vadd.f32 %v10006_v48, %v6515_v58  ;;  %v10274_v58 = vld [vmem:[#allocation30_spill] sm:$0xff] }
 0x50d   : > { %v6551_v24 = vadd.f32 %v6535_v37, %v10265_v19 }
 0x50e   : > { %v6472_v0 = vpop.f32.mrf.mxu2 }
 0x50f   : > { %v6567_v28 = vmax.f32 %v6551_v24, 0.0  ;;  %v6496_v36 = vadd.f32 %v6472_v0, %v6246_v39  ;;  %v6225_v12 = vpop.f32.mrf.mxu1 }
 0x510   : > { %v6247_v42 = vadd.f32 %v6225_v12, %v5869_v7 }
 0x511   : > { %6583 = vst [vmem:[%s9675_s1 + $0x50] sm:$0xff] %v6567_v28  ;;  %v6516_v61 = vmul.f32 %v10000_v52, %v6496_v36 }
 0x513   : > { %v6536_v60 = vadd.f32 %v10006_v48, %v6516_v61 }
 0x515   : > { %v6552_v9 = vadd.f32 %v6536_v60, %v10266_v33 }
 0x516   : > { %v6475_v29 = vpop.f32.mrf.mxu2 }
 0x517   : > { %v6568_v14 = vmax.f32 %v6552_v9, 0.0  ;;  %v6497_v38 = vadd.f32 %v6475_v29, %v6247_v42  ;;  %v6227_v46 = vpop.f32.mrf.mxu1 }
 0x518   : > { %v6248_v13 = vadd.f32 %v6227_v46, %v5870_v16 }
 0x519   : > { %6584 = vst [vmem:[%s9675_s1 + $0x58] sm:$0xff] %v6568_v14  ;;  %v6517_v22 = vmul.f32 %v10000_v52, %v6497_v38 }
 0x51b   : > { %v6537_v56 = vadd.f32 %v10006_v48, %v6517_v22 }
 0x51d   : > { %v6553_v50 = vadd.f32 %v6537_v56, %v10267_v54 }
 0x51e   : > { %v6477_v26 = vpop.f32.mrf.mxu2 }
 0x51f   : > { %v6569_v8 = vmax.f32 %v6553_v50, 0.0  ;;  %v6498_v30 = vadd.f32 %v6477_v26, %v6248_v13  ;;  %v6230_v3 = vpop.f32.mrf.mxu1 }
 0x520   : > { %v6249_v45 = vadd.f32 %v6230_v3, %v5871_v49 }
 0x521   : > { %6585 = vst [vmem:[%s9675_s1 + $0x60] sm:$0xff] %v6569_v8  ;;  %v6518_v1 = vmul.f32 %v10000_v52, %v6498_v30 }
 0x523   : > { %v6538_v55 = vadd.f32 %v10006_v48, %v6518_v1 }
 0x525   : > { %v6554_v5 = vadd.f32 %v6538_v55, %v10269_v62 }
 0x526   : > { %v6480_v25 = vpop.f32.mrf.mxu2 }
 0x527   : > { %v6570_v21 = vmax.f32 %v6554_v5, 0.0  ;;  %v6499_v18 = vadd.f32 %v6480_v25, %v6249_v45  ;;  %v6232_v11 = vpop.f32.mrf.mxu1 }
 0x528   : > { %v6250_v59 = vadd.f32 %v6232_v11, %v5872_v23 }
 0x529   : > { %6586 = vst [vmem:[%s9675_s1 + $0x68] sm:$0xff] %v6570_v21  ;;  %v6519_v47 = vmul.f32 %v10000_v52, %v6499_v18 }
 0x52b   : > { %v6539_v31 = vadd.f32 %v10006_v48, %v6519_v47 }
 0x52d   : > { %v6555_v15 = vadd.f32 %v6539_v31, %v10270_v20 }
 0x52e   : > { %v6482_v41 = vpop.f32.mrf.mxu2 }
 0x52f   : > { %v6571_v51 = vmax.f32 %v6555_v15, 0.0  ;;  %v6500_v40 = vadd.f32 %v6482_v41, %v6250_v59 }
 0x531   : > { %6587 = vst [vmem:[%s9675_s1 + $0x70] sm:$0xff] %v6571_v51  ;;  %v6520_v32 = vmul.f32 %v10000_v52, %v6500_v40 }
 0x533   : > { %v6540_v53 = vadd.f32 %v10006_v48, %v6520_v32 }
 0x535   : > { %v6556_v63 = vadd.f32 %v6540_v53, %v10274_v58 }
 0x537   : > { %v6572_v17 = vmax.f32 %v6556_v63, 0.0 }
 0x539   : > { %6588 = vst [vmem:[%s9675_s1 + $0x78] sm:$0xff] %v6572_v17 }
 0x53a   : > { %8071 = shalt.err (!%p8068_p8)
}
 0x53b   : > { %s8180_s4 = smov 128   ;;  %s8181_s1 = smov 8  }
 0x53c   : > { %7813 = dma.vmem_to_hbm [thread:$0]  (%p8292_p6), %s6606_s27, 2048, %s6608_s23, %s6590_s13, %s8180_s4, %s8180_s4, %s8181_s1  }
 0x53d PF: > { %s10275_s7 = sld [smem:[#allocation14_spill]]  ;;  %p7835_p9 = scmp.ge.s32.totalorder %s8170_s11, 2 }
 0x53f   : > { %p7827_p12 = pnand %p7835_p9, %p8298_p10 }
 0x541   : > { %p7828_p13 = pneg %p7827_p12 }
 0x543   : > { %s6622_s30 = sand.u32 1, %s10275_s7  }
 0x544   : > { %s6623_s6 = scalar_lea.sflag [#allocation6], %s6622_s30 }
 0x545   : > { %8125 = dma.done.wait (%p7828_p13), %s6623_s6, 2048  }
 0x546   : > { %8127 = vsyncadd (%p7828_p13), %s6623_s6, 4294965248  ;;  %s24_s11 = sadd.s32 1, %s8170_s11   ;;  %s10277_s30 = sld [smem:[#allocation16_spill]] }
 0x547   : > { %p21_p1 = scmp.ge.s32.totalorder %s24_s11, 6   ;;  %s10278_s15 = sld [smem:[#allocation19_spill]] }
 0x548   : > { %s10279_s18 = sld [smem:[#allocation20_spill]]  ;;  %s10280_s24 = smov %s8134_s25 }
 0x549   : > { %s10281_s25 = smov %s8138_s26  ;;  %s10282_s26 = smov %s8343_s9 }
 0x54a   : > { %s10283_s27 = smov %s8146_s28  ;;  %s10284_s28 = smov %s8150_s29 }
 0x54b   : > { %s10285_s29 = smov %s8340_s17  ;;  %s10286_s8 = smov %s8166_s10 }
 0x54c   :  { %23 = sbr.rel (!%p21_p1) target bundleno = 16 (0x10), region = 131 }
 0x54d   : > { %s10287_s9 = smov %s10278_s15 }
 0x54e   : > { %s10288_s10 = smov %s10279_s18 }
 0x551   :  { %6629 = vsyncpa [#allocation5], 1 }
 0x552   :  { %6631 = vsyncpa [#allocation5 + $0x1], 1 }
 0x553   :  { %6632 = vsyncpa [#allocation8], 1 }
 0x554   :  { %6633 = vsyncpa [#allocation6], 1 }
 0x555   :  { %6635 = vsyncpa [#allocation6 + $0x1], 1 }

</bundles_post_ra>
